<compile_context>
chip_gen: v5e
topology: v5e:2x2
jax: 0.10.0
libtpu: 0.0.40
codegen_flags: <defaults>
</compile_context>

<pallas_src>
import functools

import jax
import jax.numpy as jnp
from jax import lax
from jax.experimental import pallas as pl
from jax.experimental.pallas import tpu as pltpu

BN_EPS = 1e-5
EXPANSION = 4
LANE = 128                    # pad channel dims to a multiple of the lane width
MAX_TM = 512                  # max rows per M tile
VMEM_LIMIT = 48 * 1024 * 1024  # < 64 MiB physical VMEM on v7x, fine on v5e/v6e


# ----------------------------------------------------------------------------
# small helpers
# ----------------------------------------------------------------------------
def _rup(n, m):
    return ((n + m - 1) // m) * m


def _pad_to(a, shape):
    return jnp.pad(a, [(0, t - s) for s, t in zip(a.shape, shape)])


def _pick_tm(m):
    if m >= 2 * MAX_TM:
        return MAX_TM
    if m > 256:
        return min(MAX_TM, _rup((m + 1) // 2, 8))  # >=2 row tiles -> megacore
    return max(8, _rup(m, 8))


def _pick_tk(k):
    for tk in (512, 256, 128):
        if k % tk == 0:
            return min(tk, k)
    return k


def _cparams(sem):
    return pltpu.CompilerParams(dimension_semantics=sem,
                                vmem_limit_bytes=VMEM_LIMIT)


def _bytes(dtype):
    return jnp.finfo(dtype).bits // 8


# ----------------------------------------------------------------------------
# Kernel 1: K-tiled matmul + bias (+ optional residual) (+ ReLU)
# ----------------------------------------------------------------------------
def _mm_bias_kernel(x_ref, w_ref, b_ref, o_ref, acc_ref, *, relu):
    @pl.when(pl.program_id(1) == 0)
    def _init():
        acc_ref[...] = jnp.zeros_like(acc_ref)

    acc_ref[...] += jnp.dot(x_ref[...], w_ref[...],
                            preferred_element_type=jnp.float32)

    @pl.when(pl.program_id(1) == pl.num_programs(1) - 1)
    def _fin():
        out = acc_ref[...] + b_ref[...]
        if relu:
            out = jnp.maximum(out, 0.0)
        o_ref[...] = out.astype(o_ref.dtype)


def _mm_bias_res_kernel(x_ref, w_ref, b_ref, r_ref, o_ref, acc_ref, *, relu):
    @pl.when(pl.program_id(1) == 0)
    def _init():
        acc_ref[...] = jnp.zeros_like(acc_ref)

    acc_ref[...] += jnp.dot(x_ref[...], w_ref[...],
                            preferred_element_type=jnp.float32)

    @pl.when(pl.program_id(1) == pl.num_programs(1) - 1)
    def _fin():
        out = acc_ref[...] + b_ref[...] + r_ref[...].astype(jnp.float32)
        if relu:
            out = jnp.maximum(out, 0.0)
        o_ref[...] = out.astype(o_ref.dtype)


def matmul_bias(x2d, w, b, *, relu, residual=None, out_dtype=jnp.bfloat16):
    """(M, K) @ (K, C) + b [+ residual] [ReLU].  K and C are 128-padded."""
    m, k = x2d.shape
    c = w.shape[1]
    tm = _pick_tm(m)
    mp = _rup(m, tm)
    if mp != m:
        x2d = _pad_to(x2d, (mp, k))
        if residual is not None:
            residual = _pad_to(residual, (mp, c))
    tk = _pick_tk(k)
    grid = (mp // tm, k // tk)

    in_specs = [
        pl.BlockSpec((tm, tk), lambda i, j: (i, j)),
        pl.BlockSpec((tk, c), lambda i, j: (j, 0)),
        pl.BlockSpec((1, c), lambda i, j: (0, 0)),
    ]
    args = [x2d, w, b]
    if residual is not None:
        in_specs.append(pl.BlockSpec((tm, c), lambda i, j: (i, 0)))
        args.append(residual)
        kernel = functools.partial(_mm_bias_res_kernel, relu=relu)
    else:
        kernel = functools.partial(_mm_bias_kernel, relu=relu)

    cost = pl.CostEstimate(
        flops=2 * mp * k * c, transcendentals=0,
        bytes_accessed=mp * k * 2 + k * c * 2 + mp * c * _bytes(out_dtype))

    return pl.pallas_call(
        kernel,
        out_shape=jax.ShapeDtypeStruct((mp, c), out_dtype),
        grid_spec=pltpu.PrefetchScalarGridSpec(
            num_scalar_prefetch=0,
            grid=grid,
            in_specs=in_specs,
            out_specs=pl.BlockSpec((tm, c), lambda i, j: (i, 0)),
            scratch_shapes=[pltpu.VMEM((tm, c), jnp.float32)],
        ),
        compiler_params=_cparams(("parallel", "arbitrary")),
        cost_estimate=cost,
    )(*args)


# ----------------------------------------------------------------------------
# Kernel 2: conv3 (1x1) + bn3 fused with the projection shortcut + ReLU
#           out = relu(a @ w3 + xs @ ws + bias)
# ----------------------------------------------------------------------------
def _mm2_bias_relu_kernel(a_ref, wa_ref, s_ref, ws_ref, b_ref, o_ref):
    acc = jnp.dot(a_ref[...], wa_ref[...], preferred_element_type=jnp.float32)
    acc = acc + jnp.dot(s_ref[...], ws_ref[...],
                        preferred_element_type=jnp.float32)
    out = jnp.maximum(acc + b_ref[...], 0.0)
    o_ref[...] = out.astype(o_ref.dtype)


def matmul2_bias_relu(a2d, wa, s2d, ws, b, *, out_dtype=jnp.float32):
    m, ka = a2d.shape
    ks = s2d.shape[1]
    c = wa.shape[1]
    tm = _pick_tm(m)
    mp = _rup(m, tm)
    if mp != m:
        a2d = _pad_to(a2d, (mp, ka))
        s2d = _pad_to(s2d, (mp, ks))
    grid = (mp // tm,)

    cost = pl.CostEstimate(
        flops=2 * mp * (ka + ks) * c, transcendentals=0,
        bytes_accessed=(mp * (ka + ks) * 2 + (ka + ks) * c * 2
                        + mp * c * _bytes(out_dtype)))

    return pl.pallas_call(
        _mm2_bias_relu_kernel,
        out_shape=jax.ShapeDtypeStruct((mp, c), out_dtype),
        grid_spec=pltpu.PrefetchScalarGridSpec(
            num_scalar_prefetch=0,
            grid=grid,
            in_specs=[
                pl.BlockSpec((tm, ka), lambda i: (i, 0)),
                pl.BlockSpec((ka, c), lambda i: (0, 0)),
                pl.BlockSpec((tm, ks), lambda i: (i, 0)),
                pl.BlockSpec((ks, c), lambda i: (0, 0)),
                pl.BlockSpec((1, c), lambda i: (0, 0)),
            ],
            out_specs=pl.BlockSpec((tm, c), lambda i: (i, 0)),
        ),
        compiler_params=_cparams(("parallel",)),
        cost_estimate=cost,
    )(a2d, wa, s2d, ws, b)


# ----------------------------------------------------------------------------
# Kernel 3: 3x3 conv (stride 1, pad 1) + bn2 + ReLU, no im2col materialization.
# The padded activation is flattened per image; each of the 9 taps is a
# contiguous shifted slice, so the kernel does 9 accumulating matmuls in VMEM.
# The 2 junk columns of the padded-width output frame are dropped by the
# wrapper.  Stride-2 is handled by decimating the stride-1 frame outside.
# ----------------------------------------------------------------------------
def _conv3x3_bias_relu_kernel(x_ref, w_ref, b_ref, o_ref, *, wp):
    n_rows = o_ref.shape[1]           # H * Wp output rows (padded-width frame)
    c_out = o_ref.shape[2]
    acc = jnp.zeros((n_rows, c_out), jnp.float32)
    for t in range(9):
        dy, dx = t // 3, t % 3
        off = dy * wp + dx
        patch = x_ref[0, off:off + n_rows, :]          # (H*Wp, Cin) bf16
        acc = acc + jnp.dot(patch, w_ref[t],
                            preferred_element_type=jnp.float32)
    out = jnp.maximum(acc + b_ref[...], 0.0)
    o_ref[0] = out.astype(o_ref.dtype)


def conv3x3_bias_relu(x_nhwc, w_taps, b):
    """x: (N,H,W,Cp) bf16, w_taps: (9,Cp,Coutp) bf16, b: (1,Coutp) f32.
    Returns the stride-1 conv output frame (N,H,W,Coutp) in bf16."""
    n, h, w, cp = x_nhwc.shape
    coutp = w_taps.shape[-1]
    hp, wp = h + 2, w + 2
    lp = _rup(hp * wp + 2, 8)          # +2 rows of slack for the last taps
    xflat = jnp.pad(x_nhwc, ((0, 0), (1, 1), (1, 1), (0, 0)))
    xflat = xflat.reshape(n, hp * wp, cp)
    xflat = _pad_to(xflat, (n, lp, cp))
    l_out = h * wp

    cost = pl.CostEstimate(
        flops=2 * n * l_out * 9 * cp * coutp, transcendentals=0,
        bytes_accessed=(n * lp * cp * 2 + 9 * cp * coutp * 2
                        + n * l_out * coutp * 2))

    out = pl.pallas_call(
        functools.partial(_conv3x3_bias_relu_kernel, wp=wp),
        out_shape=jax.ShapeDtypeStruct((n, l_out, coutp), jnp.bfloat16),
        grid_spec=pltpu.PrefetchScalarGridSpec(
            num_scalar_prefetch=0,
            grid=(n,),
            in_specs=[
                pl.BlockSpec((1, lp, cp), lambda i: (i, 0, 0)),
                pl.BlockSpec((9, cp, coutp), lambda i: (0, 0, 0)),
                pl.BlockSpec((1, coutp), lambda i: (0, 0)),
            ],
            out_specs=pl.BlockSpec((1, l_out, coutp), lambda i: (i, 0, 0)),
        ),
        compiler_params=_cparams(("parallel",)),
        cost_estimate=cost,
    )(xflat, w_taps, b)
    # drop the 2 junk columns of the padded-width frame
    return out.reshape(n, h, wp, coutp)[:, :, :w, :]


# ----------------------------------------------------------------------------
# Parameter construction (deterministic, synthetic)
# ----------------------------------------------------------------------------
def _make_bn(key, c):
    k1, k2, k3, k4 = jax.random.split(key, 4)
    gamma = 1.0 + 0.1 * jax.random.normal(k1, (c,), jnp.float32)
    beta = 0.1 * jax.random.normal(k2, (c,), jnp.float32)
    mean = 0.1 * jax.random.normal(k3, (c,), jnp.float32)
    var = 1.0 + 0.1 * jnp.abs(jax.random.normal(k4, (c,), jnp.float32))
    return (gamma, beta, mean, var)


def init_bottleneck_params(key, in_planes, planes, stride):
    keys = jax.random.split(key, 8)
    out_planes = EXPANSION * planes
    params = {
        "w1": 0.1 * jax.random.normal(keys[0], (planes, in_planes, 1, 1), jnp.float32),
        "bn1": _make_bn(keys[1], planes),
        "w2": 0.1 * jax.random.normal(keys[2], (planes, planes, 3, 3), jnp.float32),
        "bn2": _make_bn(keys[3], planes),
        "w3": 0.1 * jax.random.normal(keys[4], (out_planes, planes, 1, 1), jnp.float32),
        "bn3": _make_bn(keys[5], out_planes),
    }
    if stride != 1 or in_planes != out_planes:
        params["ws"] = 0.1 * jax.random.normal(
            keys[6], (out_planes, in_planes, 1, 1), jnp.float32)
        params["bns"] = _make_bn(keys[7], out_planes)
    return params


def _fold_bn(bn):
    gamma, beta, mean, var = bn
    scale = gamma / jnp.sqrt(var + BN_EPS)
    bias = beta - mean * scale
    return scale, bias


# ----------------------------------------------------------------------------
# Bottleneck forward (Pallas)
# ----------------------------------------------------------------------------
def bottleneck_forward(x_nchw, params, stride):
    n, cin, h, w = x_nchw.shape
    planes = params["w1"].shape[0]
    cout = EXPANSION * planes
    cin_pad = _rup(cin, LANE)
    p_pad = _rup(planes, LANE)
    cout_pad = _rup(cout, LANE)

    # TODO(synk): when blocks are stacked, keep activations NHWC / bf16 across
    # blocks and transpose only at the model boundary.
    x = jnp.transpose(x_nchw, (0, 2, 3, 1))                    # NHWC, f32

    # ---- conv1 (1x1) + bn1 + relu ----
    s1, b1 = _fold_bn(params["bn1"])
    w1 = params["w1"][:, :, 0, 0].T * s1[None, :]              # BN folded into W
    w1 = _pad_to(w1, (cin_pad, p_pad)).astype(jnp.bfloat16)
    b1 = _pad_to(b1.reshape(1, planes), (1, p_pad))
    m1 = n * h * w
    x2d = _pad_to(x.reshape(m1, cin), (m1, cin_pad)).astype(jnp.bfloat16)
    out1 = matmul_bias(x2d, w1, b1, relu=True, out_dtype=jnp.bfloat16)
    out1 = out1[:m1].reshape(n, h, w, p_pad)

    # ---- conv2 (3x3, pad 1) + bn2 + relu ----
    s2, b2 = _fold_bn(params["bn2"])
    w2 = jnp.transpose(params["w2"], (2, 3, 1, 0)).reshape(9, planes, planes)
    w2 = w2 * s2[None, None, :]
    w2 = _pad_to(w2, (9, p_pad, p_pad)).astype(jnp.bfloat16)
    b2 = _pad_to(b2.reshape(1, planes), (1, p_pad))
    out2 = conv3x3_bias_relu(out1, w2, b2)                     # stride-1 frame
    if stride != 1:
        # stride-s 3x3/pad-1 conv == stride-1 conv decimated at (::s, ::s)
        out2 = out2[:, ::stride, ::stride, :]
    ho, wo = out2.shape[1], out2.shape[2]
    m3 = n * ho * wo
    out2_2d = out2.reshape(m3, p_pad)

    # ---- conv3 (1x1) + bn3 + shortcut + relu ----
    s3, b3 = _fold_bn(params["bn3"])
    w3 = params["w3"][:, :, 0, 0].T * s3[None, :]              # (planes, cout)
    w3 = _pad_to(w3, (p_pad, cout_pad)).astype(jnp.bfloat16)

    if "ws" in params:
        # projection shortcut fused into the conv3 kernel
        ss, bs = _fold_bn(params["bns"])
        ws = params["ws"][:, :, 0, 0].T * ss[None, :]          # (cin, cout)
        ws = _pad_to(ws, (cin_pad, cout_pad)).astype(jnp.bfloat16)
        bias = _pad_to((b3 + bs).reshape(1, cout), (1, cout_pad))
        xs = x[:, ::stride, ::stride, :].reshape(m3, cin)
        xs = _pad_to(xs, (m3, cin_pad)).astype(jnp.bfloat16)
        out3 = matmul2_bias_relu(out2_2d, w3, xs, ws, bias,
                                 out_dtype=jnp.float32)
    else:
        # identity shortcut (stride == 1, cin == cout)
        bias = _pad_to(b3.reshape(1, cout), (1, cout_pad))
        res = _pad_to(x.reshape(m3, cin), (m3, cout_pad)).astype(jnp.bfloat16)
        out3 = matmul_bias(out2_2d, w3, bias, relu=True, residual=res,
                           out_dtype=jnp.float32)

    out3 = out3[:m3, :cout].reshape(n, ho, wo, cout)
    return jnp.transpose(out3, (0, 3, 1, 2)).astype(x_nchw.dtype)


# ----------------------------------------------------------------------------
# Pure-JAX f32 reference (mirrors the PyTorch forward, BN in eval mode)
# ----------------------------------------------------------------------------
def bottleneck_reference(x, params, stride):
    def conv(x, w, s, pad):
        return lax.conv_general_dilated(
            x, w, (s, s), [(pad, pad), (pad, pad)],
            dimension_numbers=("NCHW", "OIHW", "NCHW"))

    def bn(x, p):
        g, b, m, v = p
        return (g[None, :, None, None] * (x - m[None, :, None, None])
                / jnp.sqrt(v + BN_EPS)[None, :, None, None]
                + b[None, :, None, None])

    out = jax.nn.relu(bn(conv(x, params["w1"], 1, 0), params["bn1"]))
    out = jax.nn.relu(bn(conv(out, params["w2"], stride, 1), params["bn2"]))
    out = bn(conv(out, params["w3"], 1, 0), params["bn3"])
    sc = bn(conv(x, params["ws"], stride, 0), params["bns"]) if "ws" in params else x
    return jax.nn.relu(out + sc)


# ----------------------------------------------------------------------------
if __name__ == "__main__":
    key = jax.random.PRNGKey(0)
    kx, kp1, kp2, kp3 = jax.random.split(key, 4)

    fwd = jax.jit(bottleneck_forward, static_argnums=2)

    N, H, W = 2, 16, 16
    # (in_planes, planes, stride): projection s=1, projection s=2, identity
    configs = [(4, 4, 1, kp1), (4, 4, 2, kp2), (16, 4, 1, kp3)]

    for in_planes, planes, stride, kp in configs:
        x = jax.random.normal(kx, (N, in_planes, H, W), jnp.float32)
        params = init_bottleneck_params(kp, in_planes, planes, stride)
        out = jax.block_until_ready(fwd(x, params, stride))
        ref = bottleneck_reference(x, params, stride)
        assert out.shape == ref.shape, (out.shape, ref.shape)
        # bf16 matmul operands with f32 accumulation -> bf16-level tolerance
        assert jnp.allclose(out, ref, rtol=3e-2, atol=3e-2), (
            in_planes, planes, stride, float(jnp.max(jnp.abs(out - ref))))

    print("KERNEL_OK")
</pallas_src>

<mosaic_0001>
module attributes {stable_mosaic.version = 11 : i64} {
  func.func @_mm_bias_kernel(%arg0: i32, %arg1: i32, %arg2: memref<256x128xbf16, #tpu.memory_space<vmem>>, %arg3: memref<128x128xbf16, #tpu.memory_space<vmem>>, %arg4: memref<1x128xf32, #tpu.memory_space<vmem>>, %arg5: memref<256x128xbf16, #tpu.memory_space<vmem>>, %arg6: memref<256x128xf32, #tpu.memory_space<vmem>>) attributes {dimension_semantics = [#tpu.dimension_semantics<parallel>, #tpu.dimension_semantics<arbitrary>], iteration_bounds = array<i64: 2, 1>, scalar_prefetch = 0 : i64, scratch_operands = 1 : i64, tpu.core_type = #tpu.core_type<tc>, window_params = [{transform_indices = @transform_0, window_bounds = array<i64: 256, 128>}, {transform_indices = @transform_1, window_bounds = array<i64: 128, 128>}, {pipeline_mode = #tpu.pipeline_mode<synchronous>, transform_indices = @transform_2, window_bounds = array<i64: 1, 128>}, {transform_indices = @transform_3, window_bounds = array<i64: 256, 128>}]} {
    %c0_i32 = arith.constant 0 : i32
    %0 = arith.cmpi eq, %arg1, %c0_i32 : i32
    %1 = arith.extui %0 : i1 to i32
    %c0_i32_0 = arith.constant 0 : i32
    %2 = arith.cmpi ne, %1, %c0_i32_0 : i32
    scf.if %2 {
      %cst_10 = arith.constant 0.000000e+00 : f32
      %12 = vector.broadcast %cst_10 : f32 to vector<256x128xf32>
      %c0_11 = arith.constant 0 : index
      %c0_12 = arith.constant 0 : index
      %13 = vector.load %arg6[%c0_11, %c0_12] : memref<256x128xf32, #tpu.memory_space<vmem>>, vector<256x128xf32>
      tpu.vector_store %arg6[%c0_11, %c0_12], %12 {strides = array<i32>} : memref<256x128xf32, #tpu.memory_space<vmem>>, vector<256x128xf32>,
    } else {
    }
    %c0 = arith.constant 0 : index
    %c0_1 = arith.constant 0 : index
    %3 = vector.load %arg6[%c0, %c0_1] : memref<256x128xf32, #tpu.memory_space<vmem>>, vector<256x128xf32>
    %c0_2 = arith.constant 0 : index
    %c0_3 = arith.constant 0 : index
    %4 = vector.load %arg2[%c0_2, %c0_3] : memref<256x128xbf16, #tpu.memory_space<vmem>>, vector<256x128xbf16>
    %c0_4 = arith.constant 0 : index
    %c0_5 = arith.constant 0 : index
    %5 = vector.load %arg3[%c0_4, %c0_5] : memref<128x128xbf16, #tpu.memory_space<vmem>>, vector<128x128xbf16>
    %cst = arith.constant dense<0.000000e+00> : vector<256x128xf32>
    %6 = tpu.matmul %4, %5, %cst {dimension_numbers = #tpu.dot_dimension_numbers<[1], [0], [0], [1], [0, 0, 1, 1], [], []>} : vector<256x128xbf16>, vector<128x128xbf16>, vector<256x128xf32> -> vector<256x128xf32>
    %7 = arith.addf %3, %6 : vector<256x128xf32>
    %c0_6 = arith.constant 0 : index
    %c0_7 = arith.constant 0 : index
    %8 = vector.load %arg6[%c0_6, %c0_7] : memref<256x128xf32, #tpu.memory_space<vmem>>, vector<256x128xf32>
    tpu.vector_store %arg6[%c0_6, %c0_7], %7 {strides = array<i32>} : memref<256x128xf32, #tpu.memory_space<vmem>>, vector<256x128xf32>,
    %c0_i32_8 = arith.constant 0 : i32
    %9 = arith.cmpi eq, %arg1, %c0_i32_8 : i32
    %10 = arith.extui %9 : i1 to i32
    %c0_i32_9 = arith.constant 0 : i32
    %11 = arith.cmpi ne, %10, %c0_i32_9 : i32
    scf.if %11 {
      %c0_10 = arith.constant 0 : index
      %c0_11 = arith.constant 0 : index
      %12 = vector.load %arg6[%c0_10, %c0_11] : memref<256x128xf32, #tpu.memory_space<vmem>>, vector<256x128xf32>
      %c0_12 = arith.constant 0 : index
      %c0_13 = arith.constant 0 : index
      %13 = vector.load %arg4[%c0_12, %c0_13] : memref<1x128xf32, #tpu.memory_space<vmem>>, vector<1x128xf32>
      %14 = vector.broadcast %13 : vector<1x128xf32> to vector<256x128xf32>
      %15 = arith.addf %12, %14 : vector<256x128xf32>
      %cst_14 = arith.constant 0.000000e+00 : f32
      %16 = vector.broadcast %cst_14 : f32 to vector<256x128xf32>
      %17 = arith.maximumf %15, %16 : vector<256x128xf32>
      %18 = arith.truncf %17 : vector<256x128xf32> to vector<256x128xbf16>
      %c0_15 = arith.constant 0 : index
      %c0_16 = arith.constant 0 : index
      %19 = vector.load %arg5[%c0_15, %c0_16] : memref<256x128xbf16, #tpu.memory_space<vmem>>, vector<256x128xbf16>
      tpu.vector_store %arg5[%c0_15, %c0_16], %18 {strides = array<i32>} : memref<256x128xbf16, #tpu.memory_space<vmem>>, vector<256x128xbf16>,
    } else {
    }
    return
  }
  func.func @transform_0(%arg0: i32, %arg1: i32) -> (i32, i32) {
    %c0_i32 = arith.constant 0 : i32
    return %arg0, %arg1 : i32, i32
  }
  func.func @transform_1(%arg0: i32, %arg1: i32) -> (i32, i32) {
    %c0_i32 = arith.constant 0 : i32
    %c0_i32_0 = arith.constant 0 : i32
    return %arg1, %c0_i32 : i32, i32
  }
  func.func @transform_2(%arg0: i32, %arg1: i32) -> (i32, i32) {
    %c0_i32 = arith.constant 0 : i32
    %c0_i32_0 = arith.constant 0 : i32
    %c0_i32_1 = arith.constant 0 : i32
    return %c0_i32, %c0_i32_0 : i32, i32
  }
  func.func @transform_3(%arg0: i32, %arg1: i32) -> (i32, i32) {
    %c0_i32 = arith.constant 0 : i32
    %c0_i32_0 = arith.constant 0 : i32
    return %arg0, %c0_i32 : i32, i32
  }
}

module attributes {stable_mosaic.version = 11 : i64} {
  func.func @_conv3x3_bias_relu_kernel(%arg0: i32, %arg1: memref<1x328x128xbf16, #tpu.memory_space<vmem>>, %arg2: memref<9x128x128xbf16, #tpu.memory_space<vmem>>, %arg3: memref<1x128xf32, #tpu.memory_space<vmem>>, %arg4: memref<1x288x128xbf16, #tpu.memory_space<vmem>>) attributes {dimension_semantics = [#tpu.dimension_semantics<parallel>], iteration_bounds = array<i64: 2>, scalar_prefetch = 0 : i64, scratch_operands = 0 : i64, tpu.core_type = #tpu.core_type<tc>, window_params = [{transform_indices = @transform_0, window_bounds = array<i64: 1, 328, 128>}, {pipeline_mode = #tpu.pipeline_mode<synchronous>, transform_indices = @transform_1, window_bounds = array<i64: 9, 128, 128>}, {pipeline_mode = #tpu.pipeline_mode<synchronous>, transform_indices = @transform_2, window_bounds = array<i64: 1, 128>}, {transform_indices = @transform_3, window_bounds = array<i64: 1, 288, 128>}]} {
    %cst = arith.constant 0.000000e+00 : f32
    %0 = vector.broadcast %cst : f32 to vector<288x128xf32>
    %c0 = arith.constant 0 : index
    %c0_0 = arith.constant 0 : index
    %c0_1 = arith.constant 0 : index
    %1 = vector.load %arg1[%c0, %c0_0, %c0_1] : memref<1x328x128xbf16, #tpu.memory_space<vmem>>, vector<1x288x128xbf16>
    %2 = vector.shape_cast %1 : vector<1x288x128xbf16> to vector<288x128xbf16>
    %c0_2 = arith.constant 0 : index
    %c0_3 = arith.constant 0 : index
    %c0_4 = arith.constant 0 : index
    %3 = vector.load %arg2[%c0_2, %c0_3, %c0_4] : memref<9x128x128xbf16, #tpu.memory_space<vmem>>, vector<1x128x128xbf16>
    %4 = vector.shape_cast %3 : vector<1x128x128xbf16> to vector<128x128xbf16>
    %cst_5 = arith.constant dense<0.000000e+00> : vector<288x128xf32>
    %5 = tpu.matmul %2, %4, %cst_5 {dimension_numbers = #tpu.dot_dimension_numbers<[1], [0], [0], [1], [0, 0, 1, 1], [], []>} : vector<288x128xbf16>, vector<128x128xbf16>, vector<288x128xf32> -> vector<288x128xf32>
    %6 = arith.addf %0, %5 : vector<288x128xf32>
    %c0_6 = arith.constant 0 : index
    %c1 = arith.constant 1 : index
    %c0_7 = arith.constant 0 : index
    %7 = vector.load %arg1[%c0_6, %c1, %c0_7] : memref<1x328x128xbf16, #tpu.memory_space<vmem>>, vector<1x288x128xbf16>
    %8 = vector.shape_cast %7 : vector<1x288x128xbf16> to vector<288x128xbf16>
    %c1_8 = arith.constant 1 : index
    %c0_9 = arith.constant 0 : index
    %c0_10 = arith.constant 0 : index
    %9 = vector.load %arg2[%c1_8, %c0_9, %c0_10] : memref<9x128x128xbf16, #tpu.memory_space<vmem>>, vector<1x128x128xbf16>
    %10 = vector.shape_cast %9 : vector<1x128x128xbf16> to vector<128x128xbf16>
    %cst_11 = arith.constant dense<0.000000e+00> : vector<288x128xf32>
    %11 = tpu.matmul %8, %10, %cst_11 {dimension_numbers = #tpu.dot_dimension_numbers<[1], [0], [0], [1], [0, 0, 1, 1], [], []>} : vector<288x128xbf16>, vector<128x128xbf16>, vector<288x128xf32> -> vector<288x128xf32>
    %12 = arith.addf %6, %11 : vector<288x128xf32>
    %c0_12 = arith.constant 0 : index
    %c2 = arith.constant 2 : index
    %c0_13 = arith.constant 0 : index
    %13 = vector.load %arg1[%c0_12, %c2, %c0_13] : memref<1x328x128xbf16, #tpu.memory_space<vmem>>, vector<1x288x128xbf16>
    %14 = vector.shape_cast %13 : vector<1x288x128xbf16> to vector<288x128xbf16>
    %c2_14 = arith.constant 2 : index
    %c0_15 = arith.constant 0 : index
    %c0_16 = arith.constant 0 : index
    %15 = vector.load %arg2[%c2_14, %c0_15, %c0_16] : memref<9x128x128xbf16, #tpu.memory_space<vmem>>, vector<1x128x128xbf16>
    %16 = vector.shape_cast %15 : vector<1x128x128xbf16> to vector<128x128xbf16>
    %cst_17 = arith.constant dense<0.000000e+00> : vector<288x128xf32>
    %17 = tpu.matmul %14, %16, %cst_17 {dimension_numbers = #tpu.dot_dimension_numbers<[1], [0], [0], [1], [0, 0, 1, 1], [], []>} : vector<288x128xbf16>, vector<128x128xbf16>, vector<288x128xf32> -> vector<288x128xf32>
    %18 = arith.addf %12, %17 : vector<288x128xf32>
    %c0_18 = arith.constant 0 : index
    %c18 = arith.constant 18 : index
    %c0_19 = arith.constant 0 : index
    %19 = vector.load %arg1[%c0_18, %c18, %c0_19] : memref<1x328x128xbf16, #tpu.memory_space<vmem>>, vector<1x288x128xbf16>
    %20 = vector.shape_cast %19 : vector<1x288x128xbf16> to vector<288x128xbf16>
    %c3 = arith.constant 3 : index
    %c0_20 = arith.constant 0 : index
    %c0_21 = arith.constant 0 : index
    %21 = vector.load %arg2[%c3, %c0_20, %c0_21] : memref<9x128x128xbf16, #tpu.memory_space<vmem>>, vector<1x128x128xbf16>
    %22 = vector.shape_cast %21 : vector<1x128x128xbf16> to vector<128x128xbf16>
    %cst_22 = arith.constant dense<0.000000e+00> : vector<288x128xf32>
    %23 = tpu.matmul %20, %22, %cst_22 {dimension_numbers = #tpu.dot_dimension_numbers<[1], [0], [0], [1], [0, 0, 1, 1], [], []>} : vector<288x128xbf16>, vector<128x128xbf16>, vector<288x128xf32> -> vector<288x128xf32>
    %24 = arith.addf %18, %23 : vector<288x128xf32>
    %c0_23 = arith.constant 0 : index
    %c19 = arith.constant 19 : index
    %c0_24 = arith.constant 0 : index
    %25 = vector.load %arg1[%c0_23, %c19, %c0_24] : memref<1x328x128xbf16, #tpu.memory_space<vmem>>, vector<1x288x128xbf16>
    %26 = vector.shape_cast %25 : vector<1x288x128xbf16> to vector<288x128xbf16>
    %c4 = arith.constant 4 : index
    %c0_25 = arith.constant 0 : index
    %c0_26 = arith.constant 0 : index
    %27 = vector.load %arg2[%c4, %c0_25, %c0_26] : memref<9x128x128xbf16, #tpu.memory_space<vmem>>, vector<1x128x128xbf16>
    %28 = vector.shape_cast %27 : vector<1x128x128xbf16> to vector<128x128xbf16>
    %cst_27 = arith.constant dense<0.000000e+00> : vector<288x128xf32>
    %29 = tpu.matmul %26, %28, %cst_27 {dimension_numbers = #tpu.dot_dimension_numbers<[1], [0], [0], [1], [0, 0, 1, 1], [], []>} : vector<288x128xbf16>, vector<128x128xbf16>, vector<288x128xf32> -> vector<288x128xf32>
    %30 = arith.addf %24, %29 : vector<288x128xf32>
    %c0_28 = arith.constant 0 : index
    %c20 = arith.constant 20 : index
    %c0_29 = arith.constant 0 : index
    %31 = vector.load %arg1[%c0_28, %c20, %c0_29] : memref<1x328x128xbf16, #tpu.memory_space<vmem>>, vector<1x288x128xbf16>
    %32 = vector.shape_cast %31 : vector<1x288x128xbf16> to vector<288x128xbf16>
    %c5 = arith.constant 5 : index
    %c0_30 = arith.constant 0 : index
    %c0_31 = arith.constant 0 : index
    %33 = vector.load %arg2[%c5, %c0_30, %c0_31] : memref<9x128x128xbf16, #tpu.memory_space<vmem>>, vector<1x128x128xbf16>
    %34 = vector.shape_cast %33 : vector<1x128x128xbf16> to vector<128x128xbf16>
    %cst_32 = arith.constant dense<0.000000e+00> : vector<288x128xf32>
    %35 = tpu.matmul %32, %34, %cst_32 {dimension_numbers = #tpu.dot_dimension_numbers<[1], [0], [0], [1], [0, 0, 1, 1], [], []>} : vector<288x128xbf16>, vector<128x128xbf16>, vector<288x128xf32> -> vector<288x128xf32>
    %36 = arith.addf %30, %35 : vector<288x128xf32>
    %c0_33 = arith.constant 0 : index
    %c36 = arith.constant 36 : index
    %c0_34 = arith.constant 0 : index
    %37 = vector.load %arg1[%c0_33, %c36, %c0_34] : memref<1x328x128xbf16, #tpu.memory_space<vmem>>, vector<1x288x128xbf16>
    %38 = vector.shape_cast %37 : vector<1x288x128xbf16> to vector<288x128xbf16>
    %c6 = arith.constant 6 : index
    %c0_35 = arith.constant 0 : index
    %c0_36 = arith.constant 0 : index
    %39 = vector.load %arg2[%c6, %c0_35, %c0_36] : memref<9x128x128xbf16, #tpu.memory_space<vmem>>, vector<1x128x128xbf16>
    %40 = vector.shape_cast %39 : vector<1x128x128xbf16> to vector<128x128xbf16>
    %cst_37 = arith.constant dense<0.000000e+00> : vector<288x128xf32>
    %41 = tpu.matmul %38, %40, %cst_37 {dimension_numbers = #tpu.dot_dimension_numbers<[1], [0], [0], [1], [0, 0, 1, 1], [], []>} : vector<288x128xbf16>, vector<128x128xbf16>, vector<288x128xf32> -> vector<288x128xf32>
    %42 = arith.addf %36, %41 : vector<288x128xf32>
    %c0_38 = arith.constant 0 : index
    %c37 = arith.constant 37 : index
    %c0_39 = arith.constant 0 : index
    %43 = vector.load %arg1[%c0_38, %c37, %c0_39] : memref<1x328x128xbf16, #tpu.memory_space<vmem>>, vector<1x288x128xbf16>
    %44 = vector.shape_cast %43 : vector<1x288x128xbf16> to vector<288x128xbf16>
    %c7 = arith.constant 7 : index
    %c0_40 = arith.constant 0 : index
    %c0_41 = arith.constant 0 : index
    %45 = vector.load %arg2[%c7, %c0_40, %c0_41] : memref<9x128x128xbf16, #tpu.memory_space<vmem>>, vector<1x128x128xbf16>
    %46 = vector.shape_cast %45 : vector<1x128x128xbf16> to vector<128x128xbf16>
    %cst_42 = arith.constant dense<0.000000e+00> : vector<288x128xf32>
    %47 = tpu.matmul %44, %46, %cst_42 {dimension_numbers = #tpu.dot_dimension_numbers<[1], [0], [0], [1], [0, 0, 1, 1], [], []>} : vector<288x128xbf16>, vector<128x128xbf16>, vector<288x128xf32> -> vector<288x128xf32>
    %48 = arith.addf %42, %47 : vector<288x128xf32>
    %c0_43 = arith.constant 0 : index
    %c38 = arith.constant 38 : index
    %c0_44 = arith.constant 0 : index
    %49 = vector.load %arg1[%c0_43, %c38, %c0_44] : memref<1x328x128xbf16, #tpu.memory_space<vmem>>, vector<1x288x128xbf16>
    %50 = vector.shape_cast %49 : vector<1x288x128xbf16> to vector<288x128xbf16>
    %c8 = arith.constant 8 : index
    %c0_45 = arith.constant 0 : index
    %c0_46 = arith.constant 0 : index
    %51 = vector.load %arg2[%c8, %c0_45, %c0_46] : memref<9x128x128xbf16, #tpu.memory_space<vmem>>, vector<1x128x128xbf16>
    %52 = vector.shape_cast %51 : vector<1x128x128xbf16> to vector<128x128xbf16>
    %cst_47 = arith.constant dense<0.000000e+00> : vector<288x128xf32>
    %53 = tpu.matmul %50, %52, %cst_47 {dimension_numbers = #tpu.dot_dimension_numbers<[1], [0], [0], [1], [0, 0, 1, 1], [], []>} : vector<288x128xbf16>, vector<128x128xbf16>, vector<288x128xf32> -> vector<288x128xf32>
    %54 = arith.addf %48, %53 : vector<288x128xf32>
    %c0_48 = arith.constant 0 : index
    %c0_49 = arith.constant 0 : index
    %55 = vector.load %arg3[%c0_48, %c0_49] : memref<1x128xf32, #tpu.memory_space<vmem>>, vector<1x128xf32>
    %56 = vector.broadcast %55 : vector<1x128xf32> to vector<288x128xf32>
    %57 = arith.addf %54, %56 : vector<288x128xf32>
    %cst_50 = arith.constant 0.000000e+00 : f32
    %58 = vector.broadcast %cst_50 : f32 to vector<288x128xf32>
    %59 = arith.maximumf %57, %58 : vector<288x128xf32>
    %60 = arith.truncf %59 : vector<288x128xf32> to vector<288x128xbf16>
    %c0_51 = arith.constant 0 : index
    %c0_52 = arith.constant 0 : index
    %c0_53 = arith.constant 0 : index
    %61 = vector.load %arg4[%c0_51, %c0_52, %c0_53] : memref<1x288x128xbf16, #tpu.memory_space<vmem>>, vector<1x288x128xbf16>
    %62 = vector.shape_cast %61 : vector<1x288x128xbf16> to vector<288x128xbf16>
    %63 = vector.shape_cast %60 : vector<288x128xbf16> to vector<1x288x128xbf16>
    tpu.vector_store %arg4[%c0_51, %c0_52, %c0_53], %63 {strides = array<i32>} : memref<1x288x128xbf16, #tpu.memory_space<vmem>>, vector<1x288x128xbf16>,
    return
  }
  func.func @transform_0(%arg0: i32) -> (i32, i32, i32) {
    %c0_i32 = arith.constant 0 : i32
    %c0_i32_0 = arith.constant 0 : i32
    %c0_i32_1 = arith.constant 0 : i32
    return %arg0, %c0_i32, %c0_i32_0 : i32, i32, i32
  }
  func.func @transform_1(%arg0: i32) -> (i32, i32, i32) {
    %c0_i32 = arith.constant 0 : i32
    %c0_i32_0 = arith.constant 0 : i32
    %c0_i32_1 = arith.constant 0 : i32
    %c0_i32_2 = arith.constant 0 : i32
    return %c0_i32, %c0_i32_0, %c0_i32_1 : i32, i32, i32
  }
  func.func @transform_2(%arg0: i32) -> (i32, i32) {
    %c0_i32 = arith.constant 0 : i32
    %c0_i32_0 = arith.constant 0 : i32
    %c0_i32_1 = arith.constant 0 : i32
    return %c0_i32, %c0_i32_0 : i32, i32
  }
  func.func @transform_3(%arg0: i32) -> (i32, i32, i32) {
    %c0_i32 = arith.constant 0 : i32
    %c0_i32_0 = arith.constant 0 : i32
    %c0_i32_1 = arith.constant 0 : i32
    return %arg0, %c0_i32, %c0_i32_0 : i32, i32, i32
  }
}

module attributes {stable_mosaic.version = 11 : i64} {
  func.func @_mm2_bias_relu_kernel(%arg0: i32, %arg1: memref<256x128xbf16, #tpu.memory_space<vmem>>, %arg2: memref<128x128xbf16, #tpu.memory_space<vmem>>, %arg3: memref<256x128xbf16, #tpu.memory_space<vmem>>, %arg4: memref<128x128xbf16, #tpu.memory_space<vmem>>, %arg5: memref<1x128xf32, #tpu.memory_space<vmem>>, %arg6: memref<256x128xf32, #tpu.memory_space<vmem>>) attributes {dimension_semantics = [#tpu.dimension_semantics<parallel>], iteration_bounds = array<i64: 2>, scalar_prefetch = 0 : i64, scratch_operands = 0 : i64, tpu.core_type = #tpu.core_type<tc>, window_params = [{transform_indices = @transform_0, window_bounds = array<i64: 256, 128>}, {pipeline_mode = #tpu.pipeline_mode<synchronous>, transform_indices = @transform_1, window_bounds = array<i64: 128, 128>}, {transform_indices = @transform_2, window_bounds = array<i64: 256, 128>}, {pipeline_mode = #tpu.pipeline_mode<synchronous>, transform_indices = @transform_3, window_bounds = array<i64: 128, 128>}, {pipeline_mode = #tpu.pipeline_mode<synchronous>, transform_indices = @transform_4, window_bounds = array<i64: 1, 128>}, {transform_indices = @transform_5, window_bounds = array<i64: 256, 128>}]} {
    %c0 = arith.constant 0 : index
    %c0_0 = arith.constant 0 : index
    %0 = vector.load %arg1[%c0, %c0_0] : memref<256x128xbf16, #tpu.memory_space<vmem>>, vector<256x128xbf16>
    %c0_1 = arith.constant 0 : index
    %c0_2 = arith.constant 0 : index
    %1 = vector.load %arg2[%c0_1, %c0_2] : memref<128x128xbf16, #tpu.memory_space<vmem>>, vector<128x128xbf16>
    %cst = arith.constant dense<0.000000e+00> : vector<256x128xf32>
    %2 = tpu.matmul %0, %1, %cst {dimension_numbers = #tpu.dot_dimension_numbers<[1], [0], [0], [1], [0, 0, 1, 1], [], []>} : vector<256x128xbf16>, vector<128x128xbf16>, vector<256x128xf32> -> vector<256x128xf32>
    %c0_3 = arith.constant 0 : index
    %c0_4 = arith.constant 0 : index
    %3 = vector.load %arg3[%c0_3, %c0_4] : memref<256x128xbf16, #tpu.memory_space<vmem>>, vector<256x128xbf16>
    %c0_5 = arith.constant 0 : index
    %c0_6 = arith.constant 0 : index
    %4 = vector.load %arg4[%c0_5, %c0_6] : memref<128x128xbf16, #tpu.memory_space<vmem>>, vector<128x128xbf16>
    %cst_7 = arith.constant dense<0.000000e+00> : vector<256x128xf32>
    %5 = tpu.matmul %3, %4, %cst_7 {dimension_numbers = #tpu.dot_dimension_numbers<[1], [0], [0], [1], [0, 0, 1, 1], [], []>} : vector<256x128xbf16>, vector<128x128xbf16>, vector<256x128xf32> -> vector<256x128xf32>
    %6 = arith.addf %2, %5 : vector<256x128xf32>
    %c0_8 = arith.constant 0 : index
    %c0_9 = arith.constant 0 : index
    %7 = vector.load %arg5[%c0_8, %c0_9] : memref<1x128xf32, #tpu.memory_space<vmem>>, vector<1x128xf32>
    %8 = vector.broadcast %7 : vector<1x128xf32> to vector<256x128xf32>
    %9 = arith.addf %6, %8 : vector<256x128xf32>
    %cst_10 = arith.constant 0.000000e+00 : f32
    %10 = vector.broadcast %cst_10 : f32 to vector<256x128xf32>
    %11 = arith.maximumf %9, %10 : vector<256x128xf32>
    %c0_11 = arith.constant 0 : index
    %c0_12 = arith.constant 0 : index
    %12 = vector.load %arg6[%c0_11, %c0_12] : memref<256x128xf32, #tpu.memory_space<vmem>>, vector<256x128xf32>
    tpu.vector_store %arg6[%c0_11, %c0_12], %11 {strides = array<i32>} : memref<256x128xf32, #tpu.memory_space<vmem>>, vector<256x128xf32>,
    return
  }
  func.func @transform_0(%arg0: i32) -> (i32, i32) {
    %c0_i32 = arith.constant 0 : i32
    %c0_i32_0 = arith.constant 0 : i32
    return %arg0, %c0_i32 : i32, i32
  }
  func.func @transform_1(%arg0: i32) -> (i32, i32) {
    %c0_i32 = arith.constant 0 : i32
    %c0_i32_0 = arith.constant 0 : i32
    %c0_i32_1 = arith.constant 0 : i32
    return %c0_i32, %c0_i32_0 : i32, i32
  }
  func.func @transform_2(%arg0: i32) -> (i32, i32) {
    %c0_i32 = arith.constant 0 : i32
    %c0_i32_0 = arith.constant 0 : i32
    return %arg0, %c0_i32 : i32, i32
  }
  func.func @transform_3(%arg0: i32) -> (i32, i32) {
    %c0_i32 = arith.constant 0 : i32
    %c0_i32_0 = arith.constant 0 : i32
    %c0_i32_1 = arith.constant 0 : i32
    return %c0_i32, %c0_i32_0 : i32, i32
  }
  func.func @transform_4(%arg0: i32) -> (i32, i32) {
    %c0_i32 = arith.constant 0 : i32
    %c0_i32_0 = arith.constant 0 : i32
    %c0_i32_1 = arith.constant 0 : i32
    return %c0_i32, %c0_i32_0 : i32, i32
  }
  func.func @transform_5(%arg0: i32) -> (i32, i32) {
    %c0_i32 = arith.constant 0 : i32
    %c0_i32_0 = arith.constant 0 : i32
    return %arg0, %c0_i32 : i32, i32
  }
}

</mosaic_0001>

<bundles_post_ra>
// kernel: bottleneck_forward.3
= control target key start
LH: loop header
LB: loop body
LE: loop exit
PB: predicated region body
PF: predicated region fallthrough
CT: control target
= control target key end

     0   :  { %s1202_s12 = smov 0   ;;  %s1204_s13 = smov 0   ;;  %s1342_s0 = inlined_call_operand.vmem [shape: bf16[512,128], index: 0, kind: input, shape index: {}]   ;;  %s1343_s1 = inlined_call_operand.vmem [shape: bf16[128,128], index: 1, kind: input, shape index: {}]   ;;  %s1344_s2 = inlined_call_operand.vmem [shape: f32[1,128], index: 2, kind: input, shape index: {}]   ;;  %s1345_s3 = inlined_call_operand.vmem [shape: bf16[512,128], index: 3, kind: output, shape index: {}]  }
   0x1   :  { %s1206_s14 = smov 0  }
   0x2 LB: > { %s25_s15 = sadd.s32 1, %s1176_s13  ;;  %p887_p0 = scmp.ge.s32.totalorder %s1180_s14, 1  ;;  %s1180_s14 = sphi %s1206_s14, %s13_s14   ;;  %s1176_s13 = sphi %s1204_s13, %s1347_s13   ;;  %s1172_s12 = sphi %s1202_s12, %s1346_s12  }
   0x3   : > { %p27_p1 = scmp.ge.s32.totalorder %s25_s15, 2  ;;  %p166_p2 = scmp.lt.s32.totalorder %s1180_s14, 3 }
   0x5   : > { %s1349_s15 = smov (%p27_p1, %s25_s15), 0  ;;  %p167_p3 = pnand %p887_p0, %p166_p2 }
   0x6   : > { %s888_s24 = sshll.u32 (!%p167_p3), %s1172_s12, 5 }
   0x7   : > { %170 = sbr.rel (%p167_p3) target bundleno = 241 (0xf1), region = 32  ;;  %p199_p4 = scmp.lt.s32.totalorder (!%p167_p3), %s888_s24, 63 }
   0xc   : > { %v1013_v0 = vld [vmem:[%s1343_s1 + $0x38] sm:$0xff]  ;;  %v1012_v1 = vld [vmem:[%s1343_s1 + $0x30] sm:$0xff]  ;;  %v1011_v2 = vld [vmem:[%s1343_s1 + $0x28] sm:$0xff]  ;;  %s1351_s24 = smov (!%p199_p4, %s888_s24), 63 }
   0xd   : > { %479 = vmatpush.bf16.msra.mxu0 %v1013_v0  ;;  %1109 = vmatpush.bf16.msra.mxu1 %v1013_v0  ;;  %v1010_v3 = vld [vmem:[%s1343_s1 + $0x20] sm:$0xff]  ;;  %v1009_v4 = vld [vmem:[%s1343_s1 + $0x18] sm:$0xff]  ;;  %v1008_v5 = vld [vmem:[%s1343_s1 + $0x10] sm:$0xff]  ;;  %s889_s4 = sshll.u32 %s1351_s24, 2 }
   0xe   : > { %1110 = vmatpush.bf16.msra.mxu2 %v1013_v0  ;;  %1111 = vmatpush.bf16.msra.mxu3 %v1013_v0  ;;  %v1007_v6 = vld [vmem:[%s1343_s1 + $0x8] sm:$0xff]  ;;  %v1006_v7 = vld [vmem:[%s1343_s1] sm:$0xff]  ;;  %s1255_s9 = scalar_lea.vmem %s1342_s0, %s889_s4  ;;  %s1287_s17 = scalar_lea.vmem %s1345_s3, %s889_s4 }
   0xf   : > { %v990_v8 = vld [vmem:[%s1255_s9] sm:$0xff]  ;;  %v991_v12 = vld [vmem:[%s1255_s9 + $0x8] sm:$0xff]  ;;  %v992_v16 = vld [vmem:[%s1255_s9 + $0x10] sm:$0xff] }
  0x10   : > { %v994_v9 = vld [vmem:[%s1255_s9 + $0x20] sm:$0xff]  ;;  %v995_v13 = vld [vmem:[%s1255_s9 + $0x28] sm:$0xff]  ;;  %v996_v17 = vld [vmem:[%s1255_s9 + $0x30] sm:$0xff] }
  0x11   : > { %480 = vmatpush.bf16.msra.mxu0 %v1012_v1  ;;  %1112 = vmatpush.bf16.msra.mxu1 %v1012_v1  ;;  %v998_v10 = vld [vmem:[%s1255_s9 + $0x40] sm:$0xff]  ;;  %v999_v14 = vld [vmem:[%s1255_s9 + $0x48] sm:$0xff]  ;;  %v1000_v18 = vld [vmem:[%s1255_s9 + $0x50] sm:$0xff] }
  0x12   : > { %1113 = vmatpush.bf16.msra.mxu2 %v1012_v1  ;;  %1114 = vmatpush.bf16.msra.mxu3 %v1012_v1  ;;  %v1002_v11 = vld [vmem:[%s1255_s9 + $0x60] sm:$0xff]  ;;  %v1003_v15 = vld [vmem:[%s1255_s9 + $0x68] sm:$0xff]  ;;  %v1004_v19 = vld [vmem:[%s1255_s9 + $0x70] sm:$0xff] }
  0x13   : > { %v993_v20 = vld [vmem:[%s1255_s9 + $0x18] sm:$0xff]  ;;  %v1276_v26 = vld [vmem:[%s1344_s2] ss:$0 sm:$0xff] }
  0x14   : > { %v997_v21 = vld [vmem:[%s1255_s9 + $0x38] sm:$0xff] }
  0x15   : > { %481 = vmatpush.bf16.msra.mxu0 %v1011_v2  ;;  %1115 = vmatpush.bf16.msra.mxu1 %v1011_v2  ;;  %v1001_v22 = vld [vmem:[%s1255_s9 + $0x58] sm:$0xff] }
  0x16   : > { %1116 = vmatpush.bf16.msra.mxu2 %v1011_v2  ;;  %1117 = vmatpush.bf16.msra.mxu3 %v1011_v2  ;;  %v1005_v23 = vld [vmem:[%s1255_s9 + $0x78] sm:$0xff] }
  0x19   : > { %482 = vmatpush.bf16.msra.mxu0 %v1010_v3  ;;  %1118 = vmatpush.bf16.msra.mxu1 %v1010_v3 }
  0x1a   : > { %1119 = vmatpush.bf16.msra.mxu2 %v1010_v3  ;;  %1120 = vmatpush.bf16.msra.mxu3 %v1010_v3 }
  0x1d   : > { %483 = vmatpush.bf16.msra.mxu0 %v1009_v4  ;;  %1121 = vmatpush.bf16.msra.mxu1 %v1009_v4 }
  0x1e   : > { %1122 = vmatpush.bf16.msra.mxu2 %v1009_v4  ;;  %1123 = vmatpush.bf16.msra.mxu3 %v1009_v4 }
  0x21   : > { %484 = vmatpush.bf16.msra.mxu0 %v1008_v5  ;;  %1124 = vmatpush.bf16.msra.mxu1 %v1008_v5 }
  0x22   : > { %1125 = vmatpush.bf16.msra.mxu2 %v1008_v5  ;;  %1126 = vmatpush.bf16.msra.mxu3 %v1008_v5 }
  0x25   : > { %485 = vmatpush.bf16.msra.mxu0 %v1007_v6  ;;  %1127 = vmatpush.bf16.msra.mxu1 %v1007_v6 }
  0x26   : > { %1128 = vmatpush.bf16.msra.mxu2 %v1007_v6  ;;  %1129 = vmatpush.bf16.msra.mxu3 %v1007_v6 }
  0x29   : > { %486 = vmatpush.bf16.msra.mxu0 %v1006_v7  ;;  %1130 = vmatpush.bf16.msra.mxu1 %v1006_v7 }
  0x2a   : > { %1131 = vmatpush.bf16.msra.mxu2 %v1006_v7  ;;  %1132 = vmatpush.bf16.msra.mxu3 %v1006_v7 }
  0x2c   : > { %487 = vmatmul.bf16.vlgmr.msra.gmra.mxu0 %v990_v8  ;;  %507 = vmatmul.bf16.vlgmr.msra.gmra.mxu1 %v994_v9 }
  0x2d   : > { %527 = vmatmul.bf16.vlgmr.msra.gmra.mxu2 %v998_v10  ;;  %547 = vmatmul.bf16.vlgmr.msra.gmra.mxu3 %v1002_v11 }
  0x3c   : > { %492 = vmatmul.bf16.gmra.mxu0 %v991_v12  ;;  %512 = vmatmul.bf16.gmra.mxu1 %v995_v13 }
  0x3d   : > { %532 = vmatmul.bf16.gmra.mxu2 %v999_v14  ;;  %552 = vmatmul.bf16.gmra.mxu3 %v1003_v15 }
  0x4c   : > { %497 = vmatmul.bf16.gmra.mxu0 %v992_v16  ;;  %517 = vmatmul.bf16.gmra.mxu1 %v996_v17 }
  0x4d   : > { %537 = vmatmul.bf16.gmra.mxu2 %v1000_v18  ;;  %557 = vmatmul.bf16.gmra.mxu3 %v1004_v19 }
  0x5c   : > { %502 = vmatmul.bf16.gmra.mxu0 %v993_v20  ;;  %522 = vmatmul.bf16.gmra.mxu1 %v997_v21 }
  0x5d   : > { %542 = vmatmul.bf16.gmra.mxu2 %v1001_v22  ;;  %562 = vmatmul.bf16.gmra.mxu3 %v1005_v23 }
  0xa9   : > { %v488_v24 = vpop.f32.mrf.mxu0  ;;  %v508_v25 = vpop.f32.mrf.mxu1 }
  0xaa   : > { %v671_v27 = vadd.f32 %v1276_v26, %v488_v24  ;;  %v679_v28 = vadd.f32 %v1276_v26, %v508_v25 }
  0xac   : > { %v703_v35 = vmax.f32 %v671_v27, 0.0  ;;  %v711_v36 = vmax.f32 %v679_v28, 0.0 }
  0xb0   : > { %v528_v29 = vpop.f32.mrf.mxu2  ;;  %v548_v30 = vpop.f32.mrf.mxu3 }
  0xb1   : > { %v490_v31 = vpop.f32.mrf.mxu0  ;;  %v510_v32 = vpop.f32.mrf.mxu1  ;;  %v687_v41 = vadd.f32 %v1276_v26, %v528_v29  ;;  %v695_v42 = vadd.f32 %v1276_v26, %v548_v30 }
  0xb2   : > { %v672_v33 = vadd.f32 %v1276_v26, %v490_v31  ;;  %v680_v34 = vadd.f32 %v1276_v26, %v510_v32 }
  0xb3   : > { %v719_v49 = vmax.f32 %v687_v41, 0.0  ;;  %v727_v50 = vmax.f32 %v695_v42, 0.0 }
  0xb4   : > { %v704_v37 = vmax.f32 %v672_v33, 0.0  ;;  %v712_v38 = vmax.f32 %v680_v34, 0.0 }
  0xb6   : > { %v1017_v39 = vpack.c.bf16 %v704_v37, %v703_v35  ;;  %v1037_v40 = vpack.c.bf16 %v712_v38, %v711_v36 }
  0xb8   : > { %1018 = vst [vmem:[%s1287_s17] sm:$0xff] %v1017_v39   ;;  %v530_v43 = vpop.f32.mrf.mxu2  ;;  %v550_v44 = vpop.f32.mrf.mxu3 }
  0xb9   : > { %1097 = vst [vmem:[%s1287_s17 + $0x20] sm:$0xff] %v1037_v40   ;;  %v688_v45 = vadd.f32 %v1276_v26, %v530_v43  ;;  %v696_v46 = vadd.f32 %v1276_v26, %v550_v44  ;;  %v493_v47 = vpop.f32.mrf.mxu0  ;;  %v513_v48 = vpop.f32.mrf.mxu1 }
  0xba   : > { %v673_v55 = vadd.f32 %v1276_v26, %v493_v47  ;;  %v681_v56 = vadd.f32 %v1276_v26, %v513_v48 }
  0xbb   : > { %v720_v51 = vmax.f32 %v688_v45, 0.0  ;;  %v728_v52 = vmax.f32 %v696_v46, 0.0 }
  0xbc   : > { %v705_v63 = vmax.f32 %v673_v55, 0.0  ;;  %v713_v0 = vmax.f32 %v681_v56, 0.0 }
  0xbd   : > { %v1057_v53 = vpack.c.bf16 %v720_v51, %v719_v49  ;;  %v1077_v54 = vpack.c.bf16 %v728_v52, %v727_v50 }
  0xbf   : > { %1101 = vst [vmem:[%s1287_s17 + $0x40] sm:$0xff] %v1057_v53  }
  0xc0   : > { %1105 = vst [vmem:[%s1287_s17 + $0x60] sm:$0xff] %v1077_v54   ;;  %v533_v57 = vpop.f32.mrf.mxu2  ;;  %v553_v58 = vpop.f32.mrf.mxu3 }
  0xc1   : > { %v495_v59 = vpop.f32.mrf.mxu0  ;;  %v515_v60 = vpop.f32.mrf.mxu1  ;;  %v689_v5 = vadd.f32 %v1276_v26, %v533_v57  ;;  %v697_v6 = vadd.f32 %v1276_v26, %v553_v58 }
  0xc2   : > { %v674_v61 = vadd.f32 %v1276_v26, %v495_v59  ;;  %v682_v62 = vadd.f32 %v1276_v26, %v515_v60 }
  0xc3   : > { %v721_v13 = vmax.f32 %v689_v5, 0.0  ;;  %v729_v14 = vmax.f32 %v697_v6, 0.0 }
  0xc4   : > { %v706_v1 = vmax.f32 %v674_v61, 0.0  ;;  %v714_v2 = vmax.f32 %v682_v62, 0.0 }
  0xc6   : > { %v1022_v3 = vpack.c.bf16 %v706_v1, %v705_v63  ;;  %v1042_v4 = vpack.c.bf16 %v714_v2, %v713_v0 }
  0xc8   : > { %1094 = vst [vmem:[%s1287_s17 + $0x8] sm:$0xff] %v1022_v3   ;;  %v535_v7 = vpop.f32.mrf.mxu2  ;;  %v555_v8 = vpop.f32.mrf.mxu3 }
  0xc9   : > { %1098 = vst [vmem:[%s1287_s17 + $0x28] sm:$0xff] %v1042_v4   ;;  %v690_v9 = vadd.f32 %v1276_v26, %v535_v7  ;;  %v698_v10 = vadd.f32 %v1276_v26, %v555_v8  ;;  %v498_v11 = vpop.f32.mrf.mxu0  ;;  %v518_v12 = vpop.f32.mrf.mxu1 }
  0xca   : > { %v675_v19 = vadd.f32 %v1276_v26, %v498_v11  ;;  %v683_v20 = vadd.f32 %v1276_v26, %v518_v12 }
  0xcb   : > { %v722_v15 = vmax.f32 %v690_v9, 0.0  ;;  %v730_v16 = vmax.f32 %v698_v10, 0.0 }
  0xcc   : > { %v707_v28 = vmax.f32 %v675_v19, 0.0  ;;  %v715_v29 = vmax.f32 %v683_v20, 0.0 }
  0xcd   : > { %v1062_v17 = vpack.c.bf16 %v722_v15, %v721_v13  ;;  %v1082_v18 = vpack.c.bf16 %v730_v16, %v729_v14 }
  0xcf   : > { %1102 = vst [vmem:[%s1287_s17 + $0x48] sm:$0xff] %v1062_v17  }
  0xd0   : > { %1106 = vst [vmem:[%s1287_s17 + $0x68] sm:$0xff] %v1082_v18   ;;  %v538_v21 = vpop.f32.mrf.mxu2  ;;  %v558_v22 = vpop.f32.mrf.mxu3 }
  0xd1   : > { %v500_v23 = vpop.f32.mrf.mxu0  ;;  %v520_v24 = vpop.f32.mrf.mxu1  ;;  %v691_v34 = vadd.f32 %v1276_v26, %v538_v21  ;;  %v699_v35 = vadd.f32 %v1276_v26, %v558_v22 }
  0xd2   : > { %v676_v25 = vadd.f32 %v1276_v26, %v500_v23  ;;  %v684_v27 = vadd.f32 %v1276_v26, %v520_v24 }
  0xd3   : > { %v723_v42 = vmax.f32 %v691_v34, 0.0  ;;  %v731_v43 = vmax.f32 %v699_v35, 0.0 }
  0xd4   : > { %v708_v30 = vmax.f32 %v676_v25, 0.0  ;;  %v716_v31 = vmax.f32 %v684_v27, 0.0 }
  0xd6   : > { %v1027_v32 = vpack.c.bf16 %v708_v30, %v707_v28  ;;  %v1047_v33 = vpack.c.bf16 %v716_v31, %v715_v29 }
  0xd8   : > { %1095 = vst [vmem:[%s1287_s17 + $0x10] sm:$0xff] %v1027_v32   ;;  %v540_v36 = vpop.f32.mrf.mxu2  ;;  %v560_v37 = vpop.f32.mrf.mxu3 }
  0xd9   : > { %1099 = vst [vmem:[%s1287_s17 + $0x30] sm:$0xff] %v1047_v33   ;;  %v692_v38 = vadd.f32 %v1276_v26, %v540_v36  ;;  %v700_v39 = vadd.f32 %v1276_v26, %v560_v37  ;;  %v503_v40 = vpop.f32.mrf.mxu0  ;;  %v523_v41 = vpop.f32.mrf.mxu1 }
  0xda   : > { %v677_v48 = vadd.f32 %v1276_v26, %v503_v40  ;;  %v685_v49 = vadd.f32 %v1276_v26, %v523_v41 }
  0xdb   : > { %v724_v44 = vmax.f32 %v692_v38, 0.0  ;;  %v732_v45 = vmax.f32 %v700_v39, 0.0 }
  0xdc   : > { %v709_v56 = vmax.f32 %v677_v48, 0.0  ;;  %v717_v57 = vmax.f32 %v685_v49, 0.0 }
  0xdd   : > { %v1067_v46 = vpack.c.bf16 %v724_v44, %v723_v42  ;;  %v1087_v47 = vpack.c.bf16 %v732_v45, %v731_v43 }
  0xdf   : > { %1103 = vst [vmem:[%s1287_s17 + $0x50] sm:$0xff] %v1067_v46  }
  0xe0   : > { %1107 = vst [vmem:[%s1287_s17 + $0x70] sm:$0xff] %v1087_v47   ;;  %v543_v50 = vpop.f32.mrf.mxu2  ;;  %v563_v51 = vpop.f32.mrf.mxu3 }
  0xe1   : > { %v505_v52 = vpop.f32.mrf.mxu0  ;;  %v525_v53 = vpop.f32.mrf.mxu1  ;;  %v693_v62 = vadd.f32 %v1276_v26, %v543_v50  ;;  %v701_v63 = vadd.f32 %v1276_v26, %v563_v51 }
  0xe2   : > { %v678_v54 = vadd.f32 %v1276_v26, %v505_v52  ;;  %v686_v55 = vadd.f32 %v1276_v26, %v525_v53 }
  0xe3   : > { %v725_v4 = vmax.f32 %v693_v62, 0.0  ;;  %v733_v5 = vmax.f32 %v701_v63, 0.0 }
  0xe4   : > { %v710_v58 = vmax.f32 %v678_v54, 0.0  ;;  %v718_v59 = vmax.f32 %v686_v55, 0.0 }
  0xe6   : > { %v1032_v60 = vpack.c.bf16 %v710_v58, %v709_v56  ;;  %v1052_v61 = vpack.c.bf16 %v718_v59, %v717_v57 }
  0xe8   : > { %1096 = vst [vmem:[%s1287_s17 + $0x18] sm:$0xff] %v1032_v60   ;;  %v545_v0 = vpop.f32.mrf.mxu2  ;;  %v565_v1 = vpop.f32.mrf.mxu3 }
  0xe9   : > { %1100 = vst [vmem:[%s1287_s17 + $0x38] sm:$0xff] %v1052_v61   ;;  %v694_v2 = vadd.f32 %v1276_v26, %v545_v0  ;;  %v702_v3 = vadd.f32 %v1276_v26, %v565_v1 }
  0xeb   : > { %v726_v6 = vmax.f32 %v694_v2, 0.0  ;;  %v734_v7 = vmax.f32 %v702_v3, 0.0 }
  0xed   : > { %v1072_v8 = vpack.c.bf16 %v726_v6, %v725_v4  ;;  %v1092_v9 = vpack.c.bf16 %v734_v7, %v733_v5 }
  0xef   : > { %1104 = vst [vmem:[%s1287_s17 + $0x58] sm:$0xff] %v1072_v8  }
  0xf0   : > { %1108 = vst [vmem:[%s1287_s17 + $0x78] sm:$0xff] %v1092_v9  }
  0xf1 PF: > { %s13_s14 = sadd.s32 1, %s1180_s14   ;;  %s1346_s12 = smov %s1176_s13 }
  0xf2   : > { %p10_p5 = scmp.ge.s32.totalorder %s13_s14, 4   ;;  %s1347_s13 = smov %s1349_s15 }
  0xf4   :  { %12 = sbr.rel (!%p10_p5) target bundleno = 2 (0x2), region = 73 }

// kernel: bottleneck_forward.5
= control target key start
LH: loop header
LB: loop body
LE: loop exit
PB: predicated region body
PF: predicated region fallthrough
CT: control target
= control target key end

     0   :  { %s1296_s18 = smov 0   ;;  %s1475_s0 = inlined_call_operand.vmem [shape: bf16[512,128], index: 0, kind: input, shape index: {}]   ;;  %s1476_s1 = inlined_call_operand.vmem [shape: bf16[128,128], index: 1, kind: input, shape index: {}]   ;;  %s1477_s2 = inlined_call_operand.vmem [shape: bf16[512,128], index: 2, kind: input, shape index: {}]   ;;  %s1478_s3 = inlined_call_operand.vmem [shape: bf16[128,128], index: 3, kind: input, shape index: {}]   ;;  %s1479_s4 = inlined_call_operand.vmem [shape: f32[1,128], index: 4, kind: input, shape index: {}]   ;;  %s1480_s5 = inlined_call_operand.vmem [shape: f32[512,128], index: 5, kind: output, shape index: {}]  }
   0x1 LB: > { %s980_s19 = sadd.s32 4294967295, %s1264_s18   ;;  %p984_p0 = scmp.ge.s32.totalorder %s1264_s18, 1  ;;  %s1264_s18 = sphi %s1296_s18, %s15_s18  }
   0x2   : > { %p199_p1 = scmp.lt.s32.totalorder %s1264_s18, 3 }
   0x4   : > { %p200_p2 = pnand %p984_p0, %p199_p1 }
   0x5   : > { %s985_s11 = sshll.u32 (!%p200_p2), %s980_s19, 5 }
   0x6   : > { %203 = sbr.rel (%p200_p2) target bundleno = 303 (0x12f), region = 40  ;;  %p233_p3 = scmp.lt.s32.totalorder (!%p200_p2), %s985_s11, 63 }
   0xb   : > { %v1232_v0 = vld [vmem:[%s1478_s3 + $0x38] sm:$0xff]  ;;  %v1231_v2 = vld [vmem:[%s1478_s3 + $0x30] sm:$0xff]  ;;  %v1230_v4 = vld [vmem:[%s1478_s3 + $0x28] sm:$0xff]  ;;  %s1482_s11 = smov (!%p233_p3, %s985_s11), 63 }
   0xc   : > { %v1208_v1 = vld [vmem:[%s1476_s1 + $0x38] sm:$0xff]  ;;  %490 = vmatpush.bf16.msra.mxu0 %v1232_v0  ;;  %1233 = vmatpush.bf16.msra.mxu2 %v1232_v0  ;;  %v1207_v3 = vld [vmem:[%s1476_s1 + $0x30] sm:$0xff]  ;;  %v1206_v5 = vld [vmem:[%s1476_s1 + $0x28] sm:$0xff]  ;;  %s986_s25 = sshll.u32 %s1482_s11, 2  ;;  %s990_s14 = sshll.u32 %s1482_s11, 3 }
   0xd   : > { %723 = vmatpush.bf16.msra.mxu1 %v1208_v1  ;;  %1241 = vmatpush.bf16.msra.mxu3 %v1208_v1  ;;  %v1229_v6 = vld [vmem:[%s1478_s3 + $0x20] sm:$0xff]  ;;  %v1228_v8 = vld [vmem:[%s1478_s3 + $0x18] sm:$0xff]  ;;  %v1227_v10 = vld [vmem:[%s1478_s3 + $0x10] sm:$0xff]  ;;  %s1355_s30 = scalar_lea.vmem %s1477_s2, %s986_s25  ;;  %s1363_s10 = scalar_lea.vmem %s1475_s0, %s986_s25 }
   0xe   : > { %v1205_v7 = vld [vmem:[%s1476_s1 + $0x20] sm:$0xff]  ;;  %v1204_v9 = vld [vmem:[%s1476_s1 + $0x18] sm:$0xff]  ;;  %v1203_v11 = vld [vmem:[%s1476_s1 + $0x10] sm:$0xff]  ;;  %s1407_s17 = scalar_lea.vmem %s1480_s5, %s990_s14 }
   0xf   : > { %v1226_v12 = vld [vmem:[%s1478_s3 + $0x8] sm:$0xff]  ;;  %v1225_v14 = vld [vmem:[%s1478_s3] sm:$0xff]  ;;  %v1211_v24 = vld [vmem:[%s1355_s30 + $0x10] sm:$0xff] }
  0x10   : > { %491 = vmatpush.bf16.msra.mxu0 %v1231_v2  ;;  %1234 = vmatpush.bf16.msra.mxu2 %v1231_v2  ;;  %v1202_v13 = vld [vmem:[%s1476_s1 + $0x8] sm:$0xff]  ;;  %v1201_v15 = vld [vmem:[%s1476_s1] sm:$0xff]  ;;  %v1219_v25 = vld [vmem:[%s1355_s30 + $0x50] sm:$0xff] }
  0x11   : > { %724 = vmatpush.bf16.msra.mxu1 %v1207_v3  ;;  %1242 = vmatpush.bf16.msra.mxu3 %v1207_v3  ;;  %v1209_v16 = vld [vmem:[%s1355_s30] sm:$0xff]  ;;  %v1210_v20 = vld [vmem:[%s1355_s30 + $0x8] sm:$0xff]  ;;  %v1187_v26 = vld [vmem:[%s1363_s10 + $0x10] sm:$0xff] }
  0x12   : > { %v1217_v17 = vld [vmem:[%s1355_s30 + $0x40] sm:$0xff]  ;;  %v1218_v21 = vld [vmem:[%s1355_s30 + $0x48] sm:$0xff]  ;;  %v1195_v27 = vld [vmem:[%s1363_s10 + $0x50] sm:$0xff] }
  0x13   : > { %v1185_v18 = vld [vmem:[%s1363_s10] sm:$0xff]  ;;  %v1186_v22 = vld [vmem:[%s1363_s10 + $0x8] sm:$0xff]  ;;  %v1212_v28 = vld [vmem:[%s1355_s30 + $0x18] sm:$0xff] }
  0x14   : > { %492 = vmatpush.bf16.msra.mxu0 %v1230_v4  ;;  %1235 = vmatpush.bf16.msra.mxu2 %v1230_v4  ;;  %v1193_v19 = vld [vmem:[%s1363_s10 + $0x40] sm:$0xff]  ;;  %v1194_v23 = vld [vmem:[%s1363_s10 + $0x48] sm:$0xff]  ;;  %v1220_v29 = vld [vmem:[%s1355_s30 + $0x58] sm:$0xff] }
  0x15   : > { %725 = vmatpush.bf16.msra.mxu1 %v1206_v5  ;;  %1243 = vmatpush.bf16.msra.mxu3 %v1206_v5  ;;  %v1188_v30 = vld [vmem:[%s1363_s10 + $0x18] sm:$0xff]  ;;  %v1213_v32 = vld [vmem:[%s1355_s30 + $0x20] sm:$0xff]  ;;  %v1214_v36 = vld [vmem:[%s1355_s30 + $0x28] sm:$0xff] }
  0x16   : > { %v1196_v31 = vld [vmem:[%s1363_s10 + $0x58] sm:$0xff]  ;;  %v1221_v33 = vld [vmem:[%s1355_s30 + $0x60] sm:$0xff]  ;;  %v1222_v37 = vld [vmem:[%s1355_s30 + $0x68] sm:$0xff] }
  0x17   : > { %v1189_v34 = vld [vmem:[%s1363_s10 + $0x20] sm:$0xff]  ;;  %v1190_v38 = vld [vmem:[%s1363_s10 + $0x28] sm:$0xff]  ;;  %v1215_v40 = vld [vmem:[%s1355_s30 + $0x30] sm:$0xff] }
  0x18   : > { %493 = vmatpush.bf16.msra.mxu0 %v1229_v6  ;;  %1236 = vmatpush.bf16.msra.mxu2 %v1229_v6  ;;  %v1197_v35 = vld [vmem:[%s1363_s10 + $0x60] sm:$0xff]  ;;  %v1198_v39 = vld [vmem:[%s1363_s10 + $0x68] sm:$0xff]  ;;  %v1223_v41 = vld [vmem:[%s1355_s30 + $0x70] sm:$0xff] }
  0x19   : > { %726 = vmatpush.bf16.msra.mxu1 %v1205_v7  ;;  %1244 = vmatpush.bf16.msra.mxu3 %v1205_v7  ;;  %v1191_v42 = vld [vmem:[%s1363_s10 + $0x30] sm:$0xff]  ;;  %v1216_v44 = vld [vmem:[%s1355_s30 + $0x38] sm:$0xff]  ;;  %v1400_v49 = vld [vmem:[%s1479_s4] ss:$0 sm:$0xff] }
  0x1a   : > { %v1199_v43 = vld [vmem:[%s1363_s10 + $0x70] sm:$0xff]  ;;  %v1224_v45 = vld [vmem:[%s1355_s30 + $0x78] sm:$0xff] }
  0x1b   : > { %v1192_v46 = vld [vmem:[%s1363_s10 + $0x38] sm:$0xff] }
  0x1c   : > { %494 = vmatpush.bf16.msra.mxu0 %v1228_v8  ;;  %1237 = vmatpush.bf16.msra.mxu2 %v1228_v8  ;;  %v1200_v47 = vld [vmem:[%s1363_s10 + $0x78] sm:$0xff] }
  0x1d   : > { %727 = vmatpush.bf16.msra.mxu1 %v1204_v9  ;;  %1245 = vmatpush.bf16.msra.mxu3 %v1204_v9 }
  0x20   : > { %495 = vmatpush.bf16.msra.mxu0 %v1227_v10  ;;  %1238 = vmatpush.bf16.msra.mxu2 %v1227_v10 }
  0x21   : > { %728 = vmatpush.bf16.msra.mxu1 %v1203_v11  ;;  %1246 = vmatpush.bf16.msra.mxu3 %v1203_v11 }
  0x24   : > { %496 = vmatpush.bf16.msra.mxu0 %v1226_v12  ;;  %1239 = vmatpush.bf16.msra.mxu2 %v1226_v12 }
  0x25   : > { %729 = vmatpush.bf16.msra.mxu1 %v1202_v13  ;;  %1247 = vmatpush.bf16.msra.mxu3 %v1202_v13 }
  0x28   : > { %497 = vmatpush.bf16.msra.mxu0 %v1225_v14  ;;  %1240 = vmatpush.bf16.msra.mxu2 %v1225_v14 }
  0x29   : > { %730 = vmatpush.bf16.msra.mxu1 %v1201_v15  ;;  %1248 = vmatpush.bf16.msra.mxu3 %v1201_v15 }
  0x2b   : > { %498 = vmatmul.bf16.vlgmr.msra.gmra.mxu0 %v1209_v16  ;;  %538 = vmatmul.bf16.vlgmr.msra.gmra.mxu2 %v1217_v17 }
  0x2c   : > { %731 = vmatmul.bf16.vlgmr.msra.gmra.mxu1 %v1185_v18  ;;  %771 = vmatmul.bf16.vlgmr.msra.gmra.mxu3 %v1193_v19 }
  0x3b   : > { %503 = vmatmul.bf16.gmra.mxu0 %v1210_v20  ;;  %543 = vmatmul.bf16.gmra.mxu2 %v1218_v21 }
  0x3c   : > { %736 = vmatmul.bf16.gmra.mxu1 %v1186_v22  ;;  %776 = vmatmul.bf16.gmra.mxu3 %v1194_v23 }
  0x4b   : > { %508 = vmatmul.bf16.gmra.mxu0 %v1211_v24  ;;  %548 = vmatmul.bf16.gmra.mxu2 %v1219_v25 }
  0x4c   : > { %741 = vmatmul.bf16.gmra.mxu1 %v1187_v26  ;;  %781 = vmatmul.bf16.gmra.mxu3 %v1195_v27 }
  0x5b   : > { %513 = vmatmul.bf16.gmra.mxu0 %v1212_v28  ;;  %553 = vmatmul.bf16.gmra.mxu2 %v1220_v29 }
  0x5c   : > { %746 = vmatmul.bf16.gmra.mxu1 %v1188_v30  ;;  %786 = vmatmul.bf16.gmra.mxu3 %v1196_v31 }
  0x6b   : > { %518 = vmatmul.bf16.gmra.mxu0 %v1213_v32  ;;  %558 = vmatmul.bf16.gmra.mxu2 %v1221_v33 }
  0x6c   : > { %751 = vmatmul.bf16.gmra.mxu1 %v1189_v34  ;;  %791 = vmatmul.bf16.gmra.mxu3 %v1197_v35 }
  0x7b   : > { %523 = vmatmul.bf16.gmra.mxu0 %v1214_v36  ;;  %563 = vmatmul.bf16.gmra.mxu2 %v1222_v37 }
  0x7c   : > { %756 = vmatmul.bf16.gmra.mxu1 %v1190_v38  ;;  %796 = vmatmul.bf16.gmra.mxu3 %v1198_v39 }
  0x8b   : > { %528 = vmatmul.bf16.gmra.mxu0 %v1215_v40  ;;  %568 = vmatmul.bf16.gmra.mxu2 %v1223_v41 }
  0x8c   : > { %761 = vmatmul.bf16.gmra.mxu1 %v1191_v42  ;;  %801 = vmatmul.bf16.gmra.mxu3 %v1199_v43 }
  0x9b   : > { %533 = vmatmul.bf16.gmra.mxu0 %v1216_v44  ;;  %573 = vmatmul.bf16.gmra.mxu2 %v1224_v45 }
  0x9c   : > { %766 = vmatmul.bf16.gmra.mxu1 %v1192_v46  ;;  %806 = vmatmul.bf16.gmra.mxu3 %v1200_v47 }
  0xa8   : > { %v499_v48 = vpop.f32.mrf.mxu0 }
  0xa9   : > { %v732_v50 = vpop.f32.mrf.mxu1 }
  0xaa   : > { %v733_v51 = vadd.f32 %v732_v50, %v499_v48 }
  0xac   : > { %v816_v52 = vadd.f32 %v1400_v49, %v733_v51 }
  0xae   : > { %v848_v53 = vmax.f32 %v816_v52, 0.0  ;;  %v539_v54 = vpop.f32.mrf.mxu2 }
  0xaf   : > { %v772_v55 = vpop.f32.mrf.mxu3 }
  0xb0   : > { %880 = vst [vmem:[%s1407_s17] sm:$0xff] %v848_v53  ;;  %v773_v56 = vadd.f32 %v772_v55, %v539_v54  ;;  %v501_v57 = vpop.f32.mrf.mxu0 }
  0xb1   : > { %v734_v58 = vpop.f32.mrf.mxu1 }
  0xb2   : > { %v832_v59 = vadd.f32 %v1400_v49, %v773_v56  ;;  %v735_v60 = vadd.f32 %v734_v58, %v501_v57 }
  0xb4   : > { %v864_v61 = vmax.f32 %v832_v59, 0.0  ;;  %v817_v62 = vadd.f32 %v1400_v49, %v735_v60 }
  0xb6   : > { %896 = vst [vmem:[%s1407_s17 + $0x80] sm:$0xff] %v864_v61  ;;  %v849_v63 = vmax.f32 %v817_v62, 0.0  ;;  %v541_v0 = vpop.f32.mrf.mxu2 }
  0xb7   : > { %v774_v1 = vpop.f32.mrf.mxu3 }
  0xb8   : > { %881 = vst [vmem:[%s1407_s17 + $0x8] sm:$0xff] %v849_v63  ;;  %v775_v2 = vadd.f32 %v774_v1, %v541_v0  ;;  %v504_v3 = vpop.f32.mrf.mxu0 }
  0xb9   : > { %v737_v4 = vpop.f32.mrf.mxu1 }
  0xba   : > { %v833_v5 = vadd.f32 %v1400_v49, %v775_v2  ;;  %v738_v6 = vadd.f32 %v737_v4, %v504_v3 }
  0xbc   : > { %v865_v7 = vmax.f32 %v833_v5, 0.0  ;;  %v818_v8 = vadd.f32 %v1400_v49, %v738_v6 }
  0xbe   : > { %897 = vst [vmem:[%s1407_s17 + $0x88] sm:$0xff] %v865_v7  ;;  %v850_v9 = vmax.f32 %v818_v8, 0.0  ;;  %v544_v10 = vpop.f32.mrf.mxu2 }
  0xbf   : > { %v777_v11 = vpop.f32.mrf.mxu3 }
  0xc0   : > { %882 = vst [vmem:[%s1407_s17 + $0x10] sm:$0xff] %v850_v9  ;;  %v778_v12 = vadd.f32 %v777_v11, %v544_v10  ;;  %v506_v13 = vpop.f32.mrf.mxu0 }
  0xc1   : > { %v739_v14 = vpop.f32.mrf.mxu1 }
  0xc2   : > { %v834_v15 = vadd.f32 %v1400_v49, %v778_v12  ;;  %v740_v16 = vadd.f32 %v739_v14, %v506_v13 }
  0xc4   : > { %v866_v17 = vmax.f32 %v834_v15, 0.0  ;;  %v819_v18 = vadd.f32 %v1400_v49, %v740_v16 }
  0xc6   : > { %898 = vst [vmem:[%s1407_s17 + $0x90] sm:$0xff] %v866_v17  ;;  %v851_v19 = vmax.f32 %v819_v18, 0.0  ;;  %v546_v20 = vpop.f32.mrf.mxu2 }
  0xc7   : > { %v779_v21 = vpop.f32.mrf.mxu3 }
  0xc8   : > { %883 = vst [vmem:[%s1407_s17 + $0x18] sm:$0xff] %v851_v19  ;;  %v780_v22 = vadd.f32 %v779_v21, %v546_v20  ;;  %v509_v23 = vpop.f32.mrf.mxu0 }
  0xc9   : > { %v742_v24 = vpop.f32.mrf.mxu1 }
  0xca   : > { %v835_v25 = vadd.f32 %v1400_v49, %v780_v22  ;;  %v743_v26 = vadd.f32 %v742_v24, %v509_v23 }
  0xcc   : > { %v867_v27 = vmax.f32 %v835_v25, 0.0  ;;  %v820_v28 = vadd.f32 %v1400_v49, %v743_v26 }
  0xce   : > { %899 = vst [vmem:[%s1407_s17 + $0x98] sm:$0xff] %v867_v27  ;;  %v852_v29 = vmax.f32 %v820_v28, 0.0  ;;  %v549_v30 = vpop.f32.mrf.mxu2 }
  0xcf   : > { %v782_v31 = vpop.f32.mrf.mxu3 }
  0xd0   : > { %884 = vst [vmem:[%s1407_s17 + $0x20] sm:$0xff] %v852_v29  ;;  %v783_v32 = vadd.f32 %v782_v31, %v549_v30  ;;  %v511_v33 = vpop.f32.mrf.mxu0 }
  0xd1   : > { %v744_v34 = vpop.f32.mrf.mxu1 }
  0xd2   : > { %v836_v35 = vadd.f32 %v1400_v49, %v783_v32  ;;  %v745_v36 = vadd.f32 %v744_v34, %v511_v33 }
  0xd4   : > { %v868_v37 = vmax.f32 %v836_v35, 0.0  ;;  %v821_v38 = vadd.f32 %v1400_v49, %v745_v36 }
  0xd6   : > { %900 = vst [vmem:[%s1407_s17 + $0xa0] sm:$0xff] %v868_v37  ;;  %v853_v39 = vmax.f32 %v821_v38, 0.0  ;;  %v551_v40 = vpop.f32.mrf.mxu2 }
  0xd7   : > { %v784_v41 = vpop.f32.mrf.mxu3 }
  0xd8   : > { %885 = vst [vmem:[%s1407_s17 + $0x28] sm:$0xff] %v853_v39  ;;  %v785_v42 = vadd.f32 %v784_v41, %v551_v40  ;;  %v514_v43 = vpop.f32.mrf.mxu0 }
  0xd9   : > { %v747_v44 = vpop.f32.mrf.mxu1 }
  0xda   : > { %v837_v45 = vadd.f32 %v1400_v49, %v785_v42  ;;  %v748_v46 = vadd.f32 %v747_v44, %v514_v43 }
  0xdc   : > { %v869_v47 = vmax.f32 %v837_v45, 0.0  ;;  %v822_v48 = vadd.f32 %v1400_v49, %v748_v46 }
  0xde   : > { %901 = vst [vmem:[%s1407_s17 + $0xa8] sm:$0xff] %v869_v47  ;;  %v854_v50 = vmax.f32 %v822_v48, 0.0  ;;  %v554_v51 = vpop.f32.mrf.mxu2 }
  0xdf   : > { %v787_v52 = vpop.f32.mrf.mxu3 }
  0xe0   : > { %886 = vst [vmem:[%s1407_s17 + $0x30] sm:$0xff] %v854_v50  ;;  %v788_v53 = vadd.f32 %v787_v52, %v554_v51  ;;  %v516_v54 = vpop.f32.mrf.mxu0 }
  0xe1   : > { %v749_v55 = vpop.f32.mrf.mxu1 }
  0xe2   : > { %v838_v56 = vadd.f32 %v1400_v49, %v788_v53  ;;  %v750_v57 = vadd.f32 %v749_v55, %v516_v54 }
  0xe4   : > { %v870_v58 = vmax.f32 %v838_v56, 0.0  ;;  %v823_v59 = vadd.f32 %v1400_v49, %v750_v57 }
  0xe6   : > { %902 = vst [vmem:[%s1407_s17 + $0xb0] sm:$0xff] %v870_v58  ;;  %v855_v60 = vmax.f32 %v823_v59, 0.0  ;;  %v556_v61 = vpop.f32.mrf.mxu2 }
  0xe7   : > { %v789_v62 = vpop.f32.mrf.mxu3 }
  0xe8   : > { %887 = vst [vmem:[%s1407_s17 + $0x38] sm:$0xff] %v855_v60  ;;  %v790_v63 = vadd.f32 %v789_v62, %v556_v61  ;;  %v519_v0 = vpop.f32.mrf.mxu0 }
  0xe9   : > { %v752_v1 = vpop.f32.mrf.mxu1 }
  0xea   : > { %v839_v2 = vadd.f32 %v1400_v49, %v790_v63  ;;  %v753_v3 = vadd.f32 %v752_v1, %v519_v0 }
  0xec   : > { %v871_v4 = vmax.f32 %v839_v2, 0.0  ;;  %v824_v5 = vadd.f32 %v1400_v49, %v753_v3 }
  0xee   : > { %903 = vst [vmem:[%s1407_s17 + $0xb8] sm:$0xff] %v871_v4  ;;  %v856_v6 = vmax.f32 %v824_v5, 0.0  ;;  %v559_v7 = vpop.f32.mrf.mxu2 }
  0xef   : > { %v792_v8 = vpop.f32.mrf.mxu3 }
  0xf0   : > { %888 = vst [vmem:[%s1407_s17 + $0x40] sm:$0xff] %v856_v6  ;;  %v793_v9 = vadd.f32 %v792_v8, %v559_v7  ;;  %v521_v10 = vpop.f32.mrf.mxu0 }
  0xf1   : > { %v754_v11 = vpop.f32.mrf.mxu1 }
  0xf2   : > { %v840_v12 = vadd.f32 %v1400_v49, %v793_v9  ;;  %v755_v13 = vadd.f32 %v754_v11, %v521_v10 }
  0xf4   : > { %v872_v14 = vmax.f32 %v840_v12, 0.0  ;;  %v825_v15 = vadd.f32 %v1400_v49, %v755_v13 }
  0xf6   : > { %904 = vst [vmem:[%s1407_s17 + $0xc0] sm:$0xff] %v872_v14  ;;  %v857_v16 = vmax.f32 %v825_v15, 0.0  ;;  %v561_v17 = vpop.f32.mrf.mxu2 }
  0xf7   : > { %v794_v18 = vpop.f32.mrf.mxu3 }
  0xf8   : > { %889 = vst [vmem:[%s1407_s17 + $0x48] sm:$0xff] %v857_v16  ;;  %v795_v19 = vadd.f32 %v794_v18, %v561_v17  ;;  %v524_v20 = vpop.f32.mrf.mxu0 }
  0xf9   : > { %v757_v21 = vpop.f32.mrf.mxu1 }
  0xfa   : > { %v841_v22 = vadd.f32 %v1400_v49, %v795_v19  ;;  %v758_v23 = vadd.f32 %v757_v21, %v524_v20 }
  0xfc   : > { %v873_v24 = vmax.f32 %v841_v22, 0.0  ;;  %v826_v25 = vadd.f32 %v1400_v49, %v758_v23 }
  0xfe   : > { %905 = vst [vmem:[%s1407_s17 + $0xc8] sm:$0xff] %v873_v24  ;;  %v858_v26 = vmax.f32 %v826_v25, 0.0  ;;  %v564_v27 = vpop.f32.mrf.mxu2 }
  0xff   : > { %v797_v28 = vpop.f32.mrf.mxu3 }
 0x100   : > { %890 = vst [vmem:[%s1407_s17 + $0x50] sm:$0xff] %v858_v26  ;;  %v798_v29 = vadd.f32 %v797_v28, %v564_v27  ;;  %v526_v30 = vpop.f32.mrf.mxu0 }
 0x101   : > { %v759_v31 = vpop.f32.mrf.mxu1 }
 0x102   : > { %v842_v32 = vadd.f32 %v1400_v49, %v798_v29  ;;  %v760_v33 = vadd.f32 %v759_v31, %v526_v30 }
 0x104   : > { %v874_v34 = vmax.f32 %v842_v32, 0.0  ;;  %v827_v35 = vadd.f32 %v1400_v49, %v760_v33 }
 0x106   : > { %906 = vst [vmem:[%s1407_s17 + $0xd0] sm:$0xff] %v874_v34  ;;  %v859_v36 = vmax.f32 %v827_v35, 0.0  ;;  %v566_v37 = vpop.f32.mrf.mxu2 }
 0x107   : > { %v799_v38 = vpop.f32.mrf.mxu3 }
 0x108   : > { %891 = vst [vmem:[%s1407_s17 + $0x58] sm:$0xff] %v859_v36  ;;  %v800_v39 = vadd.f32 %v799_v38, %v566_v37  ;;  %v529_v40 = vpop.f32.mrf.mxu0 }
 0x109   : > { %v762_v41 = vpop.f32.mrf.mxu1 }
 0x10a   : > { %v843_v42 = vadd.f32 %v1400_v49, %v800_v39  ;;  %v763_v43 = vadd.f32 %v762_v41, %v529_v40 }
 0x10c   : > { %v875_v44 = vmax.f32 %v843_v42, 0.0  ;;  %v828_v45 = vadd.f32 %v1400_v49, %v763_v43 }
 0x10e   : > { %907 = vst [vmem:[%s1407_s17 + $0xd8] sm:$0xff] %v875_v44  ;;  %v860_v46 = vmax.f32 %v828_v45, 0.0  ;;  %v569_v47 = vpop.f32.mrf.mxu2 }
 0x10f   : > { %v802_v48 = vpop.f32.mrf.mxu3 }
 0x110   : > { %892 = vst [vmem:[%s1407_s17 + $0x60] sm:$0xff] %v860_v46  ;;  %v803_v50 = vadd.f32 %v802_v48, %v569_v47  ;;  %v531_v51 = vpop.f32.mrf.mxu0 }
 0x111   : > { %v764_v52 = vpop.f32.mrf.mxu1 }
 0x112   : > { %v844_v53 = vadd.f32 %v1400_v49, %v803_v50  ;;  %v765_v54 = vadd.f32 %v764_v52, %v531_v51 }
 0x114   : > { %v876_v55 = vmax.f32 %v844_v53, 0.0  ;;  %v829_v56 = vadd.f32 %v1400_v49, %v765_v54 }
 0x116   : > { %908 = vst [vmem:[%s1407_s17 + $0xe0] sm:$0xff] %v876_v55  ;;  %v861_v57 = vmax.f32 %v829_v56, 0.0  ;;  %v571_v58 = vpop.f32.mrf.mxu2 }
 0x117   : > { %v804_v59 = vpop.f32.mrf.mxu3 }
 0x118   : > { %893 = vst [vmem:[%s1407_s17 + $0x68] sm:$0xff] %v861_v57  ;;  %v805_v60 = vadd.f32 %v804_v59, %v571_v58  ;;  %v534_v61 = vpop.f32.mrf.mxu0 }
 0x119   : > { %v767_v62 = vpop.f32.mrf.mxu1 }
 0x11a   : > { %v845_v63 = vadd.f32 %v1400_v49, %v805_v60  ;;  %v768_v0 = vadd.f32 %v767_v62, %v534_v61 }
 0x11c   : > { %v877_v1 = vmax.f32 %v845_v63, 0.0  ;;  %v830_v2 = vadd.f32 %v1400_v49, %v768_v0 }
 0x11e   : > { %909 = vst [vmem:[%s1407_s17 + $0xe8] sm:$0xff] %v877_v1  ;;  %v862_v3 = vmax.f32 %v830_v2, 0.0  ;;  %v574_v4 = vpop.f32.mrf.mxu2 }
 0x11f   : > { %v807_v5 = vpop.f32.mrf.mxu3 }
 0x120   : > { %894 = vst [vmem:[%s1407_s17 + $0x70] sm:$0xff] %v862_v3  ;;  %v808_v6 = vadd.f32 %v807_v5, %v574_v4  ;;  %v536_v7 = vpop.f32.mrf.mxu0 }
 0x121   : > { %v769_v8 = vpop.f32.mrf.mxu1 }
 0x122   : > { %v846_v9 = vadd.f32 %v1400_v49, %v808_v6  ;;  %v770_v10 = vadd.f32 %v769_v8, %v536_v7 }
 0x124   : > { %v878_v11 = vmax.f32 %v846_v9, 0.0  ;;  %v831_v12 = vadd.f32 %v1400_v49, %v770_v10 }
 0x126   : > { %910 = vst [vmem:[%s1407_s17 + $0xf0] sm:$0xff] %v878_v11  ;;  %v863_v13 = vmax.f32 %v831_v12, 0.0  ;;  %v576_v14 = vpop.f32.mrf.mxu2 }
 0x127   : > { %v809_v15 = vpop.f32.mrf.mxu3 }
 0x128   : > { %895 = vst [vmem:[%s1407_s17 + $0x78] sm:$0xff] %v863_v13  ;;  %v810_v16 = vadd.f32 %v809_v15, %v576_v14 }
 0x12a   : > { %v847_v17 = vadd.f32 %v1400_v49, %v810_v16 }
 0x12c   : > { %v879_v18 = vmax.f32 %v847_v17, 0.0 }
 0x12e   : > { %911 = vst [vmem:[%s1407_s17 + $0xf8] sm:$0xff] %v879_v18 }
 0x12f PF: > { %s15_s18 = sadd.s32 1, %s1264_s18  }
 0x130   : > { %p12_p4 = scmp.ge.s32.totalorder %s15_s18, 4  }
 0x132   :  { %14 = sbr.rel (!%p12_p4) target bundleno = 1 (0x1), region = 73 }

// kernel: bottleneck_forward.4
= control target key start
LH: loop header
LB: loop body
LE: loop exit
PB: predicated region body
PF: predicated region fallthrough
CT: control target
= control target key end

     0   :  { %s4305_s12 = smov 0   ;;  %s5492_s0 = inlined_call_operand.vmem [shape: bf16[2,328,128], index: 0, kind: input, shape index: {}]   ;;  %s5493_s1 = inlined_call_operand.vmem [shape: bf16[9,128,128], index: 1, kind: input, shape index: {}]   ;;  %s5494_s2 = inlined_call_operand.vmem [shape: f32[1,128], index: 2, kind: input, shape index: {}]   ;;  %s5495_s3 = inlined_call_operand.vmem [shape: bf16[2,288,128], index: 3, kind: output, shape index: {}]  }
   0x1 LB: > { %s3352_s13 = sadd.s32 4294967295, %s4283_s12   ;;  %p3356_p0 = scmp.ge.s32.totalorder %s4283_s12, 1  ;;  %s4283_s12 = sphi %s4305_s12, %s13_s12  }
   0x2   : > { %p137_p1 = scmp.lt.s32.totalorder %s4283_s12, 3 }
   0x4   : > { %p138_p2 = pnand %p3356_p0, %p137_p1 }
   0x6   : > { %141 = sbr.rel (%p138_p2) target bundleno = 836 (0x344), region = 32 }
   0xb   : > { %v4013_v0 = vld [vmem:[%s5493_s1 + $0x78] sm:$0xff]  ;;  %p161_p3 = scmp.lt.s32.totalorder %s3352_s13, 1  ;;  %v4012_v1 = vld [vmem:[%s5493_s1 + $0x70] sm:$0xff]  ;;  %v4011_v2 = vld [vmem:[%s5493_s1 + $0x68] sm:$0xff]  ;;  %vm334_vm0 = vsmask.f32 7424 }
   0xc   : > { %4218 = vmatpush.bf16.msra.mxu1 %v4013_v0  ;;  %4219 = vmatpush.bf16.msra.mxu2 %v4013_v0  ;;  %v4010_v3 = vld [vmem:[%s5493_s1 + $0x60] sm:$0xff]  ;;  %v4009_v5 = vld [vmem:[%s5493_s1 + $0x58] sm:$0xff]  ;;  %v4008_v11 = vld [vmem:[%s5493_s1 + $0x50] sm:$0xff]  ;;  %vm834_vm1 = vcmask 1046528   ;;  %vm1479_vm2 = vsmask.f32 6400 }
   0xd   : > { %s5523_s13 = smov (!%p161_p3, %s3352_s13), 1  ;;  %549 = vmatpush.bf16.msra.mxu0 %v4013_v0  ;;  %4220 = vmatpush.bf16.msra.mxu3 %v4013_v0  ;;  %v4007_v20 = vld [vmem:[%s5493_s1 + $0x48] sm:$0xff]  ;;  %v4006_v31 = vld [vmem:[%s5493_s1 + $0x40] sm:$0xff]  ;;  %v4021_v36 = vld [vmem:[%s5493_s1 + $0xb8] sm:$0xff]  ;;  %vm2517_vm3 = vsmask.f32 5376 }
   0xe   : > { %s4242_s20 = smul.u32 164, %s5523_s13  ;;  %v4005_v39 = vld [vmem:[%s5493_s1 + $0x38] sm:$0xff]  ;;  %v4020_v46 = vld [vmem:[%s5493_s1 + $0xb0] sm:$0xff]  ;;  %v4019_v54 = vld [vmem:[%s5493_s1 + $0xa8] sm:$0xff]  ;;  %vm1872_vm4 = vcmask 1045504   ;;  %vm2910_vm5 = vcmask 1044480  }
   0xf   : > { %v4054_v40 = vld [vmem:[%s5493_s1 + $0x138] sm:$0xff]  ;;  %v4004_v47 = vld [vmem:[%s5493_s1 + $0x30] sm:$0xff]  ;;  %v4003_v55 = vld [vmem:[%s5493_s1 + $0x28] sm:$0xff]  ;;  %s4243_s19 = smul.u32 144, %s5523_s13 }
  0x10   : > { %4221 = vmatpush.bf16.msra.mxu1 %v4012_v1  ;;  %4222 = vmatpush.bf16.msra.mxu2 %v4012_v1  ;;  %s4331_s25 = scalar_lea.vmem %s5492_s0, %s4242_s20  ;;  %v4053_v48 = vld [vmem:[%s5493_s1 + $0x130] sm:$0xff]  ;;  %v4046_v52 = vld [vmem:[%s5493_s1 + $0xf8] sm:$0xff]  ;;  %v4052_v56 = vld [vmem:[%s5493_s1 + $0x128] sm:$0xff] }
  0x11   : > { %550 = vmatpush.bf16.msra.mxu0 %v4012_v1  ;;  %4223 = vmatpush.bf16.msra.mxu3 %v4012_v1  ;;  %v4334_v4 = vld [vmem:[%s4331_s25 + $0x28] sm:$0xff]  ;;  %v4340_v6 = vld [vmem:[%s4331_s25 + $0x50] sm:$0xff]  ;;  %v4343_v7 = vld [vmem:[%s4331_s25] sm:$0xff]   ;;  %s5276_s22 = scalar_lea.vmem %s5495_s3, %s4243_s19 }
  0x12   : > { %v4346_v8 = vld [vmem:[%s4331_s25 + $0x30] sm:$0xff]  ;;  %v375_v9 = vshll.u32 %v4334_v4, 16  ;;  %v4350_v10 = vld [vmem:[%s4331_s25 + $0x58] sm:$0xff]  ;;  %v415_v12 = vshll.u32 %v4340_v6, 16  ;;  %v4357_v13 = vld [vmem:[%s4331_s25 + $0x8] sm:$0xff]  ;;  %v338_v14 = vshll.u32 %v4343_v7, 16 }
  0x13   : > { %v3995_v15 = vld [vmem:[%s4331_s25 + $0x78] sm:$0xff]  ;;  %v379_v17 = vshrl.u32 %v4334_v4, 16  ;;  %v383_v18 = vshll.u32 %v4346_v8, 16  ;;  %v423_v19 = vshll.u32 %v4350_v10, 16  ;;  %v419_v22 = vshrl.u32 %v4340_v6, 16  ;;  %v4373_v23 = vld [vmem:[%s4331_s25 + $0x80] sm:$0xff] }
  0x14   : > { %4224 = vmatpush.bf16.msra.mxu1 %v4011_v2  ;;  %4225 = vmatpush.bf16.msra.mxu2 %v4011_v2  ;;  %v4361_v16 = vrot.slane %v375_v9, 1  ;;  %v4369_v21 = vrot.slane %v415_v12, 1  ;;  %v455_v24 = vshll.u32 %v3995_v15, 16  ;;  %v336_v25 = vshrl.u32 %v4343_v7, 16  ;;  %v4411_v49 = vld [vmem:[%s4331_s25 + $0x38] sm:$0xff]  ;;  %v4414_v50 = vld [vmem:[%s4331_s25 + $0x60] sm:$0xff] }
  0x15   : > { %551 = vmatpush.bf16.msra.mxu0 %v4011_v2  ;;  %4226 = vmatpush.bf16.msra.mxu3 %v4011_v2  ;;  %v340_v26 = vrot.slane %v338_v14, 1  ;;  %v343_v27 = vshll.u32 %v4357_v13, 16  ;;  %v385_v29 = vrot.slane %v383_v18, 1  ;;  %v4378_v30 = vrot.slane %v423_v19, 1  ;;  %v4421_v53 = vld [vmem:[%s4331_s25 + $0x10] sm:$0xff]  ;;  %v4440_v62 = vld [vmem:[%s4331_s25 + $0x88] sm:$0xff] }
  0x16   : > { %v381_v28 = vor.u32 %v379_v17, %v4361_v16  ;;  %v421_v32 = vor.u32 %v419_v22, %v4369_v21  ;;  %v4384_v33 = vrot.slane %v455_v24, 1  ;;  %v459_v34 = vshrl.u32 %v3995_v15, 16  ;;  %v4045_v61 = vld [vmem:[%s5493_s1 + $0xf0] sm:$0xff]  ;;  %v4018_v1 = vld [vmem:[%s5493_s1 + $0xa0] sm:$0xff]  ;;  %v4044_v17 = vld [vmem:[%s5493_s1 + $0xe8] sm:$0xff] }
  0x17   : > { %v463_v35 = vshll.u32 %v4373_v23, 16  ;;  %v341_v37 = vor.u32 %v340_v26, %v336_v25  ;;  %v345_v38 = vrot.slane %v343_v27, 1  ;;  %v387_v57 = vshrl.u32 %v4346_v8, 16  ;;  %v4002_v2 = vld [vmem:[%s5493_s1 + $0x20] sm:$0xff]  ;;  %v4460_v18 = vld [vmem:[%s4331_s25 + $0x48] sm:$0xff]  ;;  %v4017_v22 = vld [vmem:[%s5493_s1 + $0x98] sm:$0xff] }
  0x18   : > { %4227 = vmatpush.bf16.msra.mxu1 %v4010_v3  ;;  %4228 = vmatpush.bf16.msra.mxu2 %v4010_v3  ;;  %v386_v41 = vsel %vm334_vm0, %v381_v28, %v385_v29  ;;  %v426_v42 = vsel %vm334_vm0, %v421_v32, %v4378_v30  ;;  %v461_v43 = vor.u32 %v459_v34, %v4384_v33  ;;  %v391_v58 = vshll.u32 %v4411_v49, 16  ;;  %v223_v32 = vld [vmem:[%s4331_s25 + $0x90] sm:$0x1] }
  0x19   : > { %552 = vmatpush.bf16.msra.mxu0 %v4010_v3  ;;  %4229 = vmatpush.bf16.msra.mxu3 %v4010_v3  ;;  %v465_v44 = vrot.slane %v463_v35, 1  ;;  %v346_v45 = vsel %vm334_vm0, %v341_v37, %v345_v38  ;;  %v427_v59 = vshrl.u32 %v4350_v10, 16  ;;  %v431_v60 = vshll.u32 %v4414_v50, 16  ;;  %v4051_v3 = vld [vmem:[%s5493_s1 + $0x120] sm:$0xff]  ;;  %v4050_v37 = vld [vmem:[%s5493_s1 + $0x118] sm:$0xff] }
  0x1a   : > { %v347_v63 = vshrl.u32 %v4357_v13, 16  ;;  %v351_v0 = vshll.u32 %v4421_v53, 16  ;;  %v393_v9 = vrot.slane %v391_v58, 1  ;;  %v467_v14 = vshrl.u32 %v4373_v23, 16  ;;  %v4001_v23 = vld [vmem:[%s5493_s1 + $0x18] sm:$0xff] }
  0x1b   : > { %v466_v51 = vsel %vm334_vm0, %v461_v43, %v465_v44  ;;  %v433_v12 = vrot.slane %v431_v60, 1  ;;  %v471_v15 = vshll.u32 %v4440_v62, 16  ;;  %v407_v28 = vshll.u32 %v4460_v18, 16  ;;  %v4015_v43 = vld [vmem:[%s5493_s1 + $0x88] sm:$0xff] }
  0x1c   : > { %4230 = vmatpush.bf16.msra.mxu1 %v4009_v5  ;;  %4231 = vmatpush.bf16.msra.mxu2 %v4009_v5  ;;  %v349_v19 = vor.u32 %v347_v63, %v345_v38  ;;  %v469_v26 = vor.u32 %v467_v14, %v465_v44  ;;  %v4043_v38 = vld [vmem:[%s5493_s1 + $0xe0] sm:$0xff]  ;;  %v4049_v44 = vld [vmem:[%s5493_s1 + $0x110] sm:$0xff] }
  0x1d   : > { %553 = vmatpush.bf16.msra.mxu0 %v4009_v5  ;;  %4232 = vmatpush.bf16.msra.mxu3 %v4009_v5  ;;  %v389_v5 = vor.u32 %v387_v57, %v385_v29  ;;  %v473_v27 = vrot.slane %v471_v15, 1  ;;  %v4480_v35 = vrot.slane %v407_v28, 1  ;;  %v355_v57 = vshrl.u32 %v4421_v53, 16  ;;  %v3998_v28 = vld [vmem:[%s5493_s1] sm:$0xff] }
  0x1f   : > { %v394_v24 = vsel %vm334_vm0, %v389_v5, %v393_v9  ;;  %v474_v34 = vsel %vm334_vm0, %v469_v26, %v473_v27  ;;  %v4014_v26 = vld [vmem:[%s5493_s1 + $0x80] sm:$0xff] }
  0x20   : > { %4233 = vmatpush.bf16.msra.mxu1 %v4008_v11  ;;  %4234 = vmatpush.bf16.msra.mxu2 %v4008_v11 }
  0x21   : > { %554 = vmatpush.bf16.msra.mxu0 %v4008_v11  ;;  %4235 = vmatpush.bf16.msra.mxu3 %v4008_v11  ;;  %v429_v11 = vor.u32 %v427_v59, %v4378_v30  ;;  %v4473_v30 = vld [vmem:[%s4331_s25 + $0x40] sm:$0xff] }
  0x23   : > { %v434_v25 = vsel %vm334_vm0, %v429_v11, %v433_v12 }
  0x24   : > { %4236 = vmatpush.bf16.msra.mxu1 %v4007_v20  ;;  %4237 = vmatpush.bf16.msra.mxu2 %v4007_v20 }
  0x25   : > { %555 = vmatpush.bf16.msra.mxu0 %v4007_v20  ;;  %4238 = vmatpush.bf16.msra.mxu3 %v4007_v20  ;;  %v353_v20 = vrot.slane %v351_v0, 1 }
  0x27   : > { %v354_v29 = vsel %vm334_vm0, %v349_v19, %v353_v20 }
  0x28   : > { %4239 = vmatpush.bf16.msra.mxu1 %v4006_v31  ;;  %4240 = vmatpush.bf16.msra.mxu2 %v4006_v31 }
  0x29   : > { %556 = vmatpush.bf16.msra.mxu0 %v4006_v31  ;;  %4241 = vmatpush.bf16.msra.mxu3 %v4006_v31  ;;  %v4476_v31 = vld [vmem:[%s4331_s25 + $0x68] sm:$0xff] }
  0x2b   : > { %582 = vmatmul.bf16.vlgmr.msra.gmra.mxu1 %v386_v41  ;;  %607 = vmatmul.bf16.vlgmr.msra.gmra.mxu2 %v426_v42  ;;  %v4493_v41 = vld [vmem:[%s4331_s25 + $0x18] sm:$0xff]  ;;  %v4000_v42 = vld [vmem:[%s5493_s1 + $0x10] sm:$0xff] }
  0x2c   : > { %938 = vmatpush.bf16.msrb.mxu2 %v4021_v36  ;;  %714 = vmatpush.bf16.msrb.mxu1 %v4005_v39  ;;  %v4016_v36 = vld [vmem:[%s5493_s1 + $0x90] sm:$0xff]  ;;  %v314_v39 = vunpack.c.l.b16 %v223_v32  ;;  %v359_v58 = vshll.u32 %v4493_v41, 16  ;;  %v4559_v32 = vld [vmem:[%s4331_s25 + $0xc] sm:$0xf] }
  0x2d   : > { %1716 = vmatpush.bf16.msrb.mxu0 %v4054_v40  ;;  %632 = vmatmul.bf16.vlgmr.msra.gmra.mxu3 %v466_v51  ;;  %v411_v40 = vshrl.u32 %v4460_v18, 16  ;;  %v439_v51 = vshll.u32 %v4476_v31, 16 }
  0x2e   : > { %557 = vmatmul.bf16.vlgmr.msra.gmra.mxu0 %v346_v45  ;;  %1323 = vmatpush.bf16.msrb.mxu3 %v4046_v52  ;;  %v4510_v52 = vld [vmem:[%s4331_s25 + $0x20] sm:$0xff]  ;;  %v361_v5 = vrot.slane %v359_v58, 1 }
  0x2f   : > { %v413_v45 = vor.u32 %v411_v40, %v4480_v35  ;;  %v441_v63 = vrot.slane %v439_v51, 1  ;;  %v367_v0 = vshll.u32 %v4510_v52, 16  ;;  %v5496_v40 = vunpack.c.l.b16 %v4559_v32 }
  0x30   : > { %939 = vmatpush.bf16.msrb.mxu2 %v4020_v46  ;;  %715 = vmatpush.bf16.msrb.mxu1 %v4004_v47  ;;  %v395_v46 = vshrl.u32 %v4411_v49, 16  ;;  %v399_v47 = vshll.u32 %v4473_v30, 16 }
  0x31   : > { %1717 = vmatpush.bf16.msrb.mxu0 %v4053_v48  ;;  %v435_v48 = vshrl.u32 %v4414_v50, 16 }
  0x32   : > { %1324 = vmatpush.bf16.msrb.mxu3 %v4045_v61  ;;  %v397_v59 = vor.u32 %v395_v46, %v393_v9  ;;  %v401_v60 = vrot.slane %v399_v47, 1  ;;  %v4022_v46 = vld [vmem:[%s4331_s25 + $0x10] sm:$0xff] }
  0x33   : > { %v437_v61 = vor.u32 %v435_v48, %v433_v12  ;;  %v369_v12 = vrot.slane %v367_v0, 1  ;;  %v1221_v58 = vrot.slane %v4022_v46, 1  ;;  %v4103_v0 = vld [vmem:[%s5493_s1 + $0x238] sm:$0xff] }
  0x34   : > { %940 = vmatpush.bf16.msrb.mxu2 %v4019_v54  ;;  %716 = vmatpush.bf16.msrb.mxu1 %v4003_v55  ;;  %v4512_v54 = vpack.c.b16 %v314_v39, %v314_v39  ;;  %v4042_v55 = vld [vmem:[%s5493_s1 + $0xd8] sm:$0xff]  ;;  %v402_v11 = vsel %vm334_vm0, %v397_v59, %v401_v60 }
  0x35   : > { %1718 = vmatpush.bf16.msrb.mxu0 %v4052_v56  ;;  %v4519_v56 = vsel %vm334_vm0, %v413_v45, %v4369_v21  ;;  %v4041_v21 = vld [vmem:[%s5493_s1 + $0xd0] sm:$0xff]  ;;  %v442_v9 = vsel %vm334_vm0, %v437_v61, %v441_v63 }
  0x36   : > { %1325 = vmatpush.bf16.msrb.mxu3 %v4044_v17 }
  0x38   : > { %941 = vmatpush.bf16.msrb.mxu2 %v4018_v1  ;;  %717 = vmatpush.bf16.msrb.mxu1 %v4002_v2  ;;  %v475_v1 = vshrl.u32 %v4440_v62, 16  ;;  %v479_v2 = vshll.u32 %v4512_v54, 16  ;;  %v371_v62 = vshrl.u32 %v4510_v52, 16 }
  0x39   : > { %1719 = vmatpush.bf16.msrb.mxu0 %v4051_v3  ;;  %v357_v3 = vor.u32 %v355_v57, %v353_v20  ;;  %v3999_v20 = vld [vmem:[%s5493_s1 + $0x8] sm:$0xff] }
  0x3a   : > { %1326 = vmatpush.bf16.msrb.mxu3 %v4043_v38  ;;  %v477_v14 = vor.u32 %v475_v1, %v473_v27  ;;  %v481_v15 = vrot.slane %v479_v2, 1  ;;  %v373_v19 = vor.u32 %v371_v62, %v369_v12  ;;  %v4048_v27 = vld [vmem:[%s5493_s1 + $0x108] sm:$0xff]  ;;  %v1489_v62 = vshrl.u32 %v4022_v46, 16 }
  0x3b   : > { %587 = vmatmul.bf16.gmra.mxu1 %v394_v24  ;;  %612 = vmatmul.bf16.gmra.mxu2 %v434_v25  ;;  %v362_v17 = vsel %vm334_vm0, %v357_v3, %v361_v5  ;;  %v4040_v25 = vld [vmem:[%s5493_s1 + $0xc8] sm:$0xff] }
  0x3c   : > { %942 = vmatpush.bf16.msrb.mxu2 %v4017_v22  ;;  %718 = vmatpush.bf16.msrb.mxu1 %v4001_v23  ;;  %v4534_v22 = vld [vmem:[%s4331_s25 + $0x70] sm:$0xff]  ;;  %v482_v23 = vsel %vm334_vm0, %v477_v14, %v481_v15  ;;  %v378_v24 = vsel %vm334_vm0, %v373_v19, %v4361_v16  ;;  %v4039_v16 = vld [vmem:[%s5493_s1 + $0xc0] sm:$0xff] }
  0x3d   : > { %1720 = vmatpush.bf16.msrb.mxu0 %v4050_v37  ;;  %637 = vmatmul.bf16.gmra.mxu3 %v474_v34  ;;  %v403_v34 = vshrl.u32 %v4473_v30, 16  ;;  %v443_v37 = vshrl.u32 %v4476_v31, 16  ;;  %v447_v38 = vshll.u32 %v4534_v22, 16  ;;  %v451_v1 = vshrl.u32 %v4534_v22, 16 }
  0x3e   : > { %562 = vmatmul.bf16.gmra.mxu0 %v354_v29  ;;  %1327 = vmatpush.bf16.msrb.mxu3 %v4042_v55  ;;  %v1073_v29 = vld [vmem:[%s4331_s25 + $0x8] sm:$0xe] }
  0x3f   : > { %v1164_v39 = vunpack.c.l.b16 %v1073_v29  ;;  %v449_v45 = vrot.slane %v447_v38, 1  ;;  %v4094_v38 = vld [vmem:[%s5493_s1 + $0x1f0] sm:$0xff] }
  0x40   : > { %943 = vmatpush.bf16.msrb.mxu2 %v4016_v36  ;;  %719 = vmatpush.bf16.msrb.mxu1 %v4000_v42  ;;  %v4047_v36 = vld [vmem:[%s5493_s1 + $0x100] sm:$0xff]  ;;  %v363_v42 = vshrl.u32 %v4493_v41, 16 }
  0x41   : > { %1721 = vmatpush.bf16.msrb.mxu0 %v4049_v44  ;;  %v445_v44 = vor.u32 %v443_v37, %v441_v63  ;;  %v1201_v47 = vpack.c.b16 %v5496_v40, %v1164_v39  ;;  %v4062_v63 = vld [vmem:[%s5493_s1 + $0x178] sm:$0xff]  ;;  %v453_v2 = vor.u32 %v451_v1, %v449_v45  ;;  %v4086_v37 = vld [vmem:[%s5493_s1 + $0x1b0] sm:$0xff] }
  0x42   : > { %1328 = vmatpush.bf16.msrb.mxu3 %v4041_v21  ;;  %v365_v48 = vor.u32 %v363_v42, %v361_v5  ;;  %v4023_v21 = vld [vmem:[%s4331_s25 + $0x18] sm:$0xff]  ;;  %v4061_v39 = vld [vmem:[%s5493_s1 + $0x170] sm:$0xff] }
  0x43   : > { %v450_v55 = vsel %vm334_vm0, %v445_v44, %v449_v45  ;;  %v1220_v57 = vrot.slane %v1201_v47, 1  ;;  %v458_v3 = vsel %vm334_vm0, %v453_v2, %v4384_v33  ;;  %v1223_v5 = vrot.slane %v4023_v21, 1 }
  0x44   : > { %944 = vmatpush.bf16.msrb.mxu2 %v4015_v43  ;;  %720 = vmatpush.bf16.msrb.mxu1 %v3999_v20  ;;  %v405_v43 = vor.u32 %v403_v34, %v401_v60  ;;  %v370_v59 = vsel %vm334_vm0, %v365_v48, %v369_v12  ;;  %v4087_v60 = vld [vmem:[%s5493_s1 + $0x1b8] sm:$0xff]  ;;  %v4199_v12 = vld [vmem:[%s4331_s25] sm:$0xe]  ;;  %v1481_v14 = vshrl.u32 %v1201_v47, 16  ;;  %v1484_v15 = vshll.u32 %v1201_v47, 16 }
  0x45   : > { %1722 = vmatpush.bf16.msrb.mxu0 %v4048_v27  ;;  %v1222_v61 = vsel %vm834_vm1, %v1220_v57, %v1221_v58  ;;  %v4024_v27 = vld [vmem:[%s4331_s25 + $0x20] sm:$0xff]  ;;  %v1498_v42 = vshrl.u32 %v4023_v21, 16  ;;  %v838_v45 = vrot.slane %v4421_v53, 1 }
  0x46   : > { %1329 = vmatpush.bf16.msrb.mxu3 %v4040_v25  ;;  %v410_v51 = vsel %vm334_vm0, %v405_v43, %v4480_v35  ;;  %v4095_v35 = vld [vmem:[%s5493_s1 + $0x1f8] sm:$0xff]  ;;  %v1483_v20 = vrot.slane %v1481_v14, 1  ;;  %v1491_v25 = vrot.slane %v1489_v62, 1  ;;  %v1501_v43 = vshll.u32 %v4023_v21, 16  ;;  %v4085_v14 = vld [vmem:[%s5493_s1 + $0x1a8] sm:$0xff] }
  0x47   : > { %v4027_v62 = vld [vmem:[%s4331_s25 + $0x38] sm:$0xff] }
  0x48   : > { %945 = vmatpush.bf16.msrb.mxu2 %v4014_v26  ;;  %721 = vmatpush.bf16.msrb.mxu1 %v3998_v28  ;;  %v1503_v44 = vrot.slane %v1501_v43, 2 }
  0x49   : > { %1723 = vmatpush.bf16.msrb.mxu0 %v4047_v36 }
  0x4a   : > { %1330 = vmatpush.bf16.msrb.mxu3 %v4039_v16  ;;  %v1225_v16 = vrot.slane %v4024_v27, 1 }
  0x4b   : > { %592 = vmatmul.bf16.gmra.mxu1 %v402_v11  ;;  %617 = vmatmul.bf16.gmra.mxu2 %v442_v9  ;;  %v4198_v11 = vld [vmem:[%s4331_s25] sm:$0xf0]  ;;  %v1224_v9 = vsel %vm834_vm1, %v1221_v58, %v1223_v5 }
  0x4c   : > { %2361 = vmatpush.bf16.msra.mxu2 %v4087_v60  ;;  %1976 = vmatpush.bf16.msra.mxu1 %v4062_v63  ;;  %v4200_v19 = vor.u32 %v4199_v12, %v4198_v11  ;;  %v1226_v36 = vsel %vm834_vm1, %v1223_v5, %v1225_v16  ;;  %v1510_v60 = vshll.u32 %v4024_v27, 16  ;;  %v840_v63 = vrot.slane %v4493_v41, 1 }
  0x4d   : > { %642 = vmatmul.bf16.gmra.mxu3 %v482_v23  ;;  %3014 = vmatpush.bf16.msra.mxu0 %v4103_v0  ;;  %v1486_v23 = vrot.slane %v1484_v15, 2  ;;  %v4026_v0 = vld [vmem:[%s4331_s25 + $0x30] sm:$0xff]  ;;  %v4093_v15 = vld [vmem:[%s5493_s1 + $0x1e8] sm:$0xff] }
  0x4e   : > { %567 = vmatmul.bf16.gmra.mxu0 %v362_v17  ;;  %2754 = vmatpush.bf16.msra.mxu3 %v4095_v35  ;;  %v1492_v17 = vshll.u32 %v4022_v46, 16  ;;  %v835_v26 = vrot.slane %v4200_v19, 1  ;;  %v4025_v46 = vld [vmem:[%s4331_s25 + $0x28] sm:$0xff]  ;;  %v1512_v35 = vrot.slane %v1510_v60, 2  ;;  %v841_v2 = vsel %vm834_vm1, %v838_v45, %v840_v63 }
  0x4f   : > { %v1229_v21 = vrot.slane %v4026_v0, 1  ;;  %v1516_v5 = vshrl.u32 %v4025_v46, 16  ;;  %v1519_v11 = vshll.u32 %v4025_v46, 16  ;;  %v4060_v19 = vld [vmem:[%s5493_s1 + $0x168] sm:$0xff] }
  0x50   : > { %v1494_v33 = vrot.slane %v1492_v17, 2  ;;  %2362 = vmatpush.bf16.msra.mxu2 %v4086_v37  ;;  %1977 = vmatpush.bf16.msra.mxu1 %v4061_v39  ;;  %v4028_v39 = vld [vmem:[%s4331_s25 + $0x40] sm:$0xff] }
  0x51   : > { %v1521_v12 = vrot.slane %v1519_v11, 2  ;;  %v4092_v11 = vld [vmem:[%s5493_s1 + $0x1e0] sm:$0xff] }
  0x52   : > { %v1495_v28 = vor.u32 %v1494_v33, %v1491_v25  ;;  %2755 = vmatpush.bf16.msra.mxu3 %v4094_v38  ;;  %v1231_v25 = vrot.slane %v4027_v62, 1  ;;  %v844_v38 = vrot.slane %v4334_v4, 1 }
  0x54   : > { %2363 = vmatpush.bf16.msra.mxu2 %v4085_v14  ;;  %1978 = vmatpush.bf16.msra.mxu1 %v4060_v19 }
  0x56   : > { %2756 = vmatpush.bf16.msra.mxu3 %v4093_v15  ;;  %v4059_v15 = vld [vmem:[%s5493_s1 + $0x160] sm:$0xff] }
  0x58   : > { %1979 = vmatpush.bf16.msra.mxu1 %v4059_v15 }
  0x5a   : > { %2757 = vmatpush.bf16.msra.mxu3 %v4092_v11  ;;  %v850_v11 = vrot.slane %v4473_v30, 1 }
  0x5b   : > { %597 = vmatmul.bf16.gmra.mxu1 %v410_v51  ;;  %622 = vmatmul.bf16.gmra.mxu2 %v450_v55  ;;  %v1227_v51 = vrot.slane %v4025_v46, 1  ;;  %v4102_v55 = vld [vmem:[%s5493_s1 + $0x230] sm:$0xff] }
  0x5c   : > { %3015 = vmatpush.bf16.msra.mxu0 %v4102_v55  ;;  %v1534_v55 = vshrl.u32 %v4027_v62, 16 }
  0x5d   : > { %1331 = vmatmul.bf16.vlgmr.msrb.gmra.mxu3 %v1222_v61  ;;  %v1228_v58 = vsel %vm834_vm1, %v1225_v16, %v1227_v51 }
  0x5e   : > { %572 = vmatmul.bf16.gmra.mxu0 %v370_v59  ;;  %v1507_v59 = vshrl.u32 %v4024_v27, 16  ;;  %v4101_v27 = vld [vmem:[%s5493_s1 + $0x228] sm:$0xff] }
  0x60   : > { %v1509_v61 = vrot.slane %v1507_v59, 1  ;;  %3016 = vmatpush.bf16.msra.mxu0 %v4101_v27 }
  0x62   : > { %v1513_v1 = vor.u32 %v1512_v35, %v1509_v61  ;;  %v1536_v61 = vrot.slane %v1534_v55, 1 }
  0x6b   : > { %602 = vmatmul.bf16.gmra.mxu1 %v4519_v56  ;;  %627 = vmatmul.bf16.gmra.mxu2 %v458_v3  ;;  %v836_v56 = vrot.slane %v4357_v13, 1 }
  0x6d   : > { %1336 = vmatmul.bf16.gmra.mxu3 %v1224_v9  ;;  %v837_v29 = vsel %vm834_vm1, %v835_v26, %v836_v56  ;;  %v839_v48 = vsel %vm834_vm1, %v836_v56, %v838_v45  ;;  %v1518_v9 = vrot.slane %v1516_v5, 1  ;;  %v1232_v56 = vsel %vm834_vm1, %v1229_v21, %v1231_v25 }
  0x6e   : > { %577 = vmatmul.bf16.gmra.mxu0 %v378_v24  ;;  %v1487_v24 = vor.u32 %v1486_v23, %v1483_v20  ;;  %v1233_v45 = vrot.slane %v4028_v39, 1 }
  0x6f   : > { %v1522_v17 = vor.u32 %v1521_v12, %v1518_v9 }
  0x70   : > { %v1496_v34 = vsel %vm1479_vm2, %v1487_v24, %v1495_v28  ;;  %v1525_v24 = vshrl.u32 %v4026_v0, 16 }
  0x71   : > { %v1523_v26 = vsel %vm1479_vm2, %v1513_v1, %v1522_v17 }
  0x7b   : > { %722 = vmatmul.bf16.vlgmr.msrb.gmra.mxu1 %v4343_v7  ;;  %946 = vmatmul.bf16.vlgmr.msrb.gmra.mxu2 %v837_v29  ;;  %v1500_v7 = vrot.slane %v1498_v42, 1 }
  0x7d   : > { %1341 = vmatmul.bf16.gmra.mxu3 %v1226_v36  ;;  %v1504_v47 = vor.u32 %v1503_v44, %v1500_v7 }
  0x7e   : > { %1724 = vmatmul.bf16.vlgmr.msrb.gmra.mxu0 %v1496_v34 }
  0x7f   : > { %v1505_v57 = vsel %vm1479_vm2, %v1495_v28, %v1504_v47  ;;  %v1514_v3 = vsel %vm1479_vm2, %v1504_v47, %v1513_v1  ;;  %v1528_v28 = vshll.u32 %v4026_v0, 16  ;;  %v846_v0 = vrot.slane %v4346_v8, 1 }
  0x81   : > { %v1530_v36 = vrot.slane %v1528_v28, 2  ;;  %v4030_v28 = vld [vmem:[%s4331_s25 + $0x50] sm:$0xff] }
  0x8b   : > { %727 = vmatmul.bf16.gmra.mxu1 %v4357_v13  ;;  %951 = vmatmul.bf16.gmra.mxu2 %v839_v48  ;;  %v1230_v13 = vsel %vm834_vm1, %v1227_v51, %v1229_v21  ;;  %v1234_v51 = vsel %vm834_vm1, %v1231_v25, %v1233_v45  ;;  %v4084_v21 = vld [vmem:[%s5493_s1 + $0x1a0] sm:$0xff] }
  0x8c   : > { %2364 = vmatpush.bf16.msra.mxu2 %v4084_v21 }
  0x8d   : > { %1346 = vmatmul.bf16.gmra.mxu3 %v1228_v58 }
  0x8e   : > { %1729 = vmatmul.bf16.gmra.mxu0 %v1505_v57  ;;  %v1537_v57 = vshll.u32 %v4027_v62, 16  ;;  %v1543_v62 = vshrl.u32 %v4028_v39, 16 }
  0x90   : > { %v1539_v35 = vrot.slane %v1537_v57, 2 }
  0x92   : > { %v1540_v1 = vor.u32 %v1539_v35, %v1536_v61 }
  0x9b   : > { %732 = vmatmul.bf16.gmra.mxu1 %v4421_v53  ;;  %956 = vmatmul.bf16.gmra.mxu2 %v841_v2  ;;  %v842_v53 = vrot.slane %v4510_v52, 1 }
  0x9d   : > { %1351 = vmatmul.bf16.gmra.mxu3 %v1230_v13  ;;  %v843_v23 = vsel %vm834_vm1, %v840_v63, %v842_v53  ;;  %v845_v44 = vsel %vm834_vm1, %v842_v53, %v844_v38  ;;  %v847_v13 = vsel %vm834_vm1, %v844_v38, %v846_v0 }
  0x9e   : > { %1734 = vmatmul.bf16.gmra.mxu0 %v1514_v3 }
  0xa8   : > { %v4638_v20 = vpop.f32.mrf.mxu1 }
  0xab   : > { %v4641_v33 = vpop.f32.mrf.mxu0  ;;  %737 = vmatmul.bf16.gmra.mxu1 %v4493_v41  ;;  %961 = vmatmul.bf16.gmra.mxu2 %v843_v23  ;;  %v1527_v41 = vrot.slane %v1525_v24, 1  ;;  %v848_v24 = vrot.slane %v4411_v49, 1 }
  0xad   : > { %1356 = vmatmul.bf16.gmra.mxu3 %v1232_v56  ;;  %v1531_v42 = vor.u32 %v1530_v36, %v1527_v41 }
  0xae   : > { %1739 = vmatmul.bf16.gmra.mxu0 %v1523_v26  ;;  %v4649_v29 = vpop.f32.mrf.mxu2  ;;  %v1545_v26 = vrot.slane %v1543_v62, 1 }
  0xaf   : > { %v1532_v47 = vsel %vm1479_vm2, %v1522_v17, %v1531_v42  ;;  %v1541_v12 = vsel %vm1479_vm2, %v1531_v42, %v1540_v1  ;;  %v1546_v17 = vshll.u32 %v4028_v39, 16  ;;  %v849_v39 = vsel %vm834_vm1, %v846_v0, %v848_v24 }
  0xb0   : > { %v4651_v16 = vpop.f32.mrf.mxu1  ;;  %v4655_v37 = vpop.f32.mrf.mxu3  ;;  %v1237_v42 = vrot.slane %v4030_v28, 1 }
  0xb1   : > { %5498 = vst [vmem:[#allocation2_spill] sm:$0xff] %v4655_v37  ;;  %v1548_v56 = vrot.slane %v1546_v17, 2 }
  0xb3   : > { %v4653_v34 = vpop.f32.mrf.mxu0  ;;  %v1549_v41 = vor.u32 %v1548_v56, %v1545_v26  ;;  %v4083_v26 = vld [vmem:[%s5493_s1 + $0x198] sm:$0xff] }
  0xb4   : > { %2365 = vmatpush.bf16.msra.mxu2 %v4083_v26 }
  0xb6   : > { %v4659_v43 = vpop.f32.mrf.mxu2 }
  0xb8   : > { %v4661_v7 = vpop.f32.mrf.mxu1  ;;  %v4667_v48 = vpop.f32.mrf.mxu3 }
  0xb9   : > { %5499 = vst [vmem:[#allocation3_spill] sm:$0xff] %v4667_v48 }
  0xbb   : > { %v4664_v46 = vpop.f32.mrf.mxu0  ;;  %742 = vmatmul.bf16.gmra.mxu1 %v4510_v52  ;;  %966 = vmatmul.bf16.gmra.mxu2 %v845_v44  ;;  %v4029_v52 = vld [vmem:[%s4331_s25 + $0x48] sm:$0xff] }
  0xbc   : > { %v1235_v5 = vrot.slane %v4029_v52, 1  ;;  %v1552_v55 = vshrl.u32 %v4029_v52, 16  ;;  %v1555_v57 = vshll.u32 %v4029_v52, 16  ;;  %v851_v52 = vsel %vm834_vm1, %v848_v24, %v850_v11  ;;  %v4091_v24 = vld [vmem:[%s5493_s1 + $0x1d8] sm:$0xff] }
  0xbd   : > { %1361 = vmatmul.bf16.gmra.mxu3 %v1234_v51 }
  0xbe   : > { %1744 = vmatmul.bf16.gmra.mxu0 %v1532_v47  ;;  %v4671_v58 = vpop.f32.mrf.mxu2  ;;  %v1236_v53 = vsel %vm834_vm1, %v1233_v45, %v1235_v5  ;;  %v1550_v45 = vsel %vm1479_vm2, %v1540_v1, %v1549_v41  ;;  %v1238_v51 = vsel %vm834_vm1, %v1235_v5, %v1237_v42  ;;  %v1554_v21 = vrot.slane %v1552_v55, 1  ;;  %2758 = vmatpush.bf16.msra.mxu3 %v4091_v24 }
  0xbf   : > { %v1557_v1 = vrot.slane %v1555_v57, 2 }
  0xc0   : > { %v4673_v59 = vpop.f32.mrf.mxu1  ;;  %v4677_v63 = vpop.f32.mrf.mxu3 }
  0xc1   : > { %5500 = vst [vmem:[#allocation4_spill] sm:$0xff] %v4677_v63 }
  0xc3   : > { %v4675_v60 = vpop.f32.mrf.mxu0 }
  0xc6   : > { %v4681_v2 = vpop.f32.mrf.mxu2 }
  0xc8   : > { %v4686_v3 = vpop.f32.mrf.mxu1  ;;  %v4695_v14 = vpop.f32.mrf.mxu3 }
  0xc9   : > { %5501 = vst [vmem:[#allocation5_spill] sm:$0xff] %v4695_v14 }
  0xcb   : > { %v4692_v9 = vpop.f32.mrf.mxu0  ;;  %747 = vmatmul.bf16.gmra.mxu1 %v4334_v4  ;;  %971 = vmatmul.bf16.gmra.mxu2 %v847_v13  ;;  %v4100_v4 = vld [vmem:[%s5493_s1 + $0x220] sm:$0xff] }
  0xcc   : > { %3017 = vmatpush.bf16.msra.mxu0 %v4100_v4 }
  0xcd   : > { %1366 = vmatmul.bf16.gmra.mxu3 %v1236_v53 }
  0xce   : > { %1749 = vmatmul.bf16.gmra.mxu0 %v1541_v12  ;;  %v4702_v19 = vpop.f32.mrf.mxu2  ;;  %v4031_v12 = vld [vmem:[%s4331_s25 + $0x58] sm:$0xff] }
  0xcf   : > { %v1239_v5 = vrot.slane %v4031_v12, 1 }
  0xd0   : > { %v4704_v23 = vpop.f32.mrf.mxu1  ;;  %v4711_v27 = vpop.f32.mrf.mxu3 }
  0xd1   : > { %5502 = vst [vmem:[#allocation6_spill] sm:$0xff] %v4711_v27  ;;  %v1240_v56 = vsel %vm834_vm1, %v1237_v42, %v1239_v5  ;;  %v4058_v42 = vld [vmem:[%s5493_s1 + $0x158] sm:$0xff] }
  0xd2   : > { %1980 = vmatpush.bf16.msra.mxu1 %v4058_v42 }
  0xd3   : > { %v4709_v25 = vpop.f32.mrf.mxu0 }
  0xd6   : > { %v4715_v36 = vpop.f32.mrf.mxu2 }
  0xd8   : > { %v4717_v38 = vpop.f32.mrf.mxu1  ;;  %v4723_v47 = vpop.f32.mrf.mxu3 }
  0xd9   : > { %5503 = vst [vmem:[#allocation7_spill] sm:$0xff] %v4723_v47 }
  0xdb   : > { %v4720_v44 = vpop.f32.mrf.mxu0  ;;  %752 = vmatmul.bf16.gmra.mxu1 %v4346_v8  ;;  %976 = vmatmul.bf16.gmra.mxu2 %v849_v39  ;;  %v1558_v8 = vor.u32 %v1557_v1, %v1554_v21  ;;  %v1561_v39 = vshrl.u32 %v4030_v28, 16  ;;  %v4099_v21 = vld [vmem:[%s5493_s1 + $0x218] sm:$0xff]  ;;  %v852_v1 = vrot.slane %v4460_v18, 1 }
  0xdc   : > { %3018 = vmatpush.bf16.msra.mxu0 %v4099_v21  ;;  %v1573_v21 = vshll.u32 %v4031_v12, 16 }
  0xdd   : > { %1371 = vmatmul.bf16.gmra.mxu3 %v1238_v51  ;;  %v1559_v17 = vsel %vm1479_vm2, %v1549_v41, %v1558_v8  ;;  %v1563_v55 = vrot.slane %v1561_v39, 1  ;;  %v853_v24 = vsel %vm834_vm1, %v850_v11, %v852_v1 }
  0xde   : > { %1754 = vmatmul.bf16.gmra.mxu0 %v1550_v45  ;;  %v4727_v61 = vpop.f32.mrf.mxu2  ;;  %v1564_v45 = vshll.u32 %v4030_v28, 16  ;;  %v1575_v37 = vrot.slane %v1573_v21, 2 }
  0xe0   : > { %v4729_v35 = vpop.f32.mrf.mxu1  ;;  %v1332_v13 = vpop.f32.mrf.mxu3  ;;  %v1566_v57 = vrot.slane %v1564_v45, 2 }
  0xe3   : > { %v4731_v0 = vpop.f32.mrf.mxu0 }
  0xe6   : > { %v4735_v15 = vpop.f32.mrf.mxu2 }
  0xe8   : > { %v4737_v53 = vpop.f32.mrf.mxu1  ;;  %v1334_v4 = vpop.f32.mrf.mxu3 }
  0xeb   : > { %v4740_v62 = vpop.f32.mrf.mxu0  ;;  %757 = vmatmul.bf16.gmra.mxu1 %v4411_v49  ;;  %981 = vmatmul.bf16.gmra.mxu2 %v851_v52  ;;  %v4032_v52 = vld [vmem:[%s4331_s25 + $0x60] sm:$0xff] }
  0xec   : > { %v1241_v39 = vrot.slane %v4032_v52, 1 }
  0xed   : > { %1376 = vmatmul.bf16.gmra.mxu3 %v1240_v56 }
  0xee   : > { %1759 = vmatmul.bf16.gmra.mxu0 %v1559_v17  ;;  %v4751_v41 = vpop.f32.mrf.mxu2  ;;  %v1567_v17 = vor.u32 %v1566_v57, %v1563_v55  ;;  %v1242_v42 = vsel %vm834_vm1, %v1239_v5, %v1241_v39  ;;  %v1570_v57 = vshrl.u32 %v4031_v12, 16 }
  0xf0   : > { %v4753_v49 = vpop.f32.mrf.mxu1  ;;  %v1337_v28 = vpop.f32.mrf.mxu3  ;;  %v1568_v40 = vsel %vm1479_vm2, %v1558_v8, %v1567_v17  ;;  %v1572_v8 = vrot.slane %v1570_v57, 1 }
  0xf2   : > { %v1576_v5 = vor.u32 %v1575_v37, %v1572_v8 }
  0xf3   : > { %v4755_v51 = vpop.f32.mrf.mxu0 }
  0xf4   : > { %v1577_v57 = vsel %vm1479_vm2, %v1567_v17, %v1576_v5 }
  0xf6   : > { %v4765_v26 = vpop.f32.mrf.mxu2 }
  0xf7   : > { %5504 = vst [vmem:[#allocation8_spill] sm:$0xff] %v4765_v26 }
  0xf8   : > { %v723_v56 = vpop.f32.mrf.mxu1  ;;  %v4769_v47 = vpop.f32.mrf.mxu3 }
  0xf9   : > { %v724_v55 = vadd.f32 %v723_v56, %v4641_v33 }
  0xfb   : > { %v1725_v45 = vpop.f32.mrf.mxu0  ;;  %762 = vmatmul.bf16.gmra.mxu1 %v4473_v30  ;;  %986 = vmatmul.bf16.gmra.mxu2 %v853_v24  ;;  %v4780_v24 = vld [vmem:[%s4331_s25 + $0x68] sm:$0xff] }
  0xfd   : > { %1381 = vmatmul.bf16.gmra.mxu3 %v1242_v42 }
  0xfe   : > { %1764 = vmatmul.bf16.gmra.mxu0 %v1568_v40  ;;  %v947_v27 = vpop.f32.mrf.mxu2  ;;  %v854_v40 = vrot.slane %v4340_v6, 1 }
  0xff   : > { %v1037_v14 = vadd.f32 %v947_v27, %v724_v55 }
 0x100   : > { %v725_v11 = vpop.f32.mrf.mxu1  ;;  %v4774_v26 = vpop.f32.mrf.mxu3  ;;  %v855_v42 = vsel %vm834_vm1, %v852_v1, %v854_v40  ;;  %v1582_v1 = vshll.u32 %v4032_v52, 16 }
 0x101   : > { %v1422_v63 = vadd.f32 %v1332_v13, %v1037_v14  ;;  %v726_v33 = vadd.f32 %v725_v11, %v4653_v34  ;;  %v1243_v14 = vrot.slane %v4780_v24, 1 }
 0x103   : > { %v1727_v48 = vpop.f32.mrf.mxu0  ;;  %v4776_v30 = vadd.f32 %v1725_v45, %v1422_v63  ;;  %v1244_v34 = vsel %vm834_vm1, %v1241_v39, %v1243_v14  ;;  %v1579_v45 = vshrl.u32 %v4032_v52, 16  ;;  %v856_v39 = vrot.slane %v4350_v10, 1  ;;  %v4098_v10 = vld [vmem:[%s5493_s1 + $0x210] sm:$0xff] }
 0x104   : > { %3019 = vmatpush.bf16.msra.mxu0 %v4098_v10 }
 0x106   : > { %v949_v12 = vpop.f32.mrf.mxu2 }
 0x107   : > { %v1038_v56 = vadd.f32 %v949_v12, %v726_v33  ;;  %v1581_v33 = vrot.slane %v1579_v45, 1  ;;  %v1584_v12 = vrot.slane %v1582_v1, 2 }
 0x108   : > { %v728_v27 = vpop.f32.mrf.mxu1  ;;  %v4786_v63 = vpop.f32.mrf.mxu3 }
 0x109   : > { %v1423_v13 = vadd.f32 %v1334_v4, %v1038_v56  ;;  %v729_v37 = vadd.f32 %v728_v27, %v4664_v46  ;;  %v4057_v46 = vld [vmem:[%s5493_s1 + $0x150] sm:$0xff] }
 0x10a   : > { %1981 = vmatpush.bf16.msra.mxu1 %v4057_v46  ;;  %v4034_v56 = vld [vmem:[%s4331_s25 + $0x70] sm:$0xff] }
 0x10b   : > { %v1730_v55 = vpop.f32.mrf.mxu0  ;;  %767 = vmatmul.bf16.gmra.mxu1 %v4460_v18  ;;  %991 = vmatmul.bf16.gmra.mxu2 %v855_v42  ;;  %v4789_v6 = vadd.f32 %v1727_v48, %v1423_v13  ;;  %v4082_v18 = vld [vmem:[%s5493_s1 + $0x190] sm:$0xff]  ;;  %v1585_v42 = vor.u32 %v1584_v12, %v1581_v33  ;;  %v1245_v45 = vrot.slane %v4034_v56, 1 }
 0x10c   : > { %v4090_v48 = vld [vmem:[%s5493_s1 + $0x1d0] sm:$0xff]  ;;  %2366 = vmatpush.bf16.msra.mxu2 %v4082_v18 }
 0x10d   : > { %1386 = vmatmul.bf16.gmra.mxu3 %v1244_v34 }
 0x10e   : > { %1769 = vmatmul.bf16.gmra.mxu0 %v1577_v57  ;;  %v952_v21 = vpop.f32.mrf.mxu2  ;;  %2759 = vmatpush.bf16.msra.mxu3 %v4090_v48 }
 0x10f   : > { %v1039_v11 = vadd.f32 %v952_v21, %v729_v37  ;;  %v857_v37 = vsel %vm834_vm1, %v854_v40, %v856_v39  ;;  %v1246_v40 = vsel %vm834_vm1, %v1243_v14, %v1245_v45 }
 0x110   : > { %v730_v4 = vpop.f32.mrf.mxu1  ;;  %v4802_v52 = vpop.f32.mrf.mxu3 }
 0x111   : > { %v1424_v17 = vadd.f32 %v1337_v28, %v1039_v11  ;;  %v731_v27 = vadd.f32 %v730_v4, %v4675_v60  ;;  %v1588_v4 = vshrl.u32 %v4780_v24, 16 }
 0x113   : > { %v1732_v8 = vpop.f32.mrf.mxu0  ;;  %v4804_v28 = vadd.f32 %v1730_v55, %v1424_v17  ;;  %v1586_v55 = vsel %vm1479_vm2, %v1576_v5, %v1585_v42  ;;  %v4253_v17 = vld [vmem:[%s4331_s25 + $0x50] sm:$0xff]  ;;  %v1591_v5 = vshll.u32 %v4780_v24, 16 }
 0x116   : > { %v954_v13 = vpop.f32.mrf.mxu2 }
 0x117   : > { %v1040_v57 = vadd.f32 %v954_v13, %v731_v27  ;;  %v1593_v27 = vrot.slane %v1591_v5, 2 }
 0x118   : > { %v733_v34 = vpop.f32.mrf.mxu1  ;;  %v4815_v11 = vpop.f32.mrf.mxu3 }
 0x119   : > { %v1425_v1 = vadd.f32 %v4769_v47, %v1040_v57  ;;  %v734_v47 = vadd.f32 %v733_v34, %v4692_v9  ;;  %v858_v9 = vrot.slane %v4414_v50, 1  ;;  %v4831_v57 = vld [vmem:[%s4331_s25 + $0x78] sm:$0xff] }
 0x11a   : > { %v1247_v10 = vrot.slane %v4831_v57, 1  ;;  %v4254_v50 = vld [vmem:[%s4331_s25 + $0x58] sm:$0xff] }
 0x11b   : > { %v1735_v21 = vpop.f32.mrf.mxu0  ;;  %772 = vmatmul.bf16.gmra.mxu1 %v4253_v17  ;;  %996 = vmatmul.bf16.gmra.mxu2 %v857_v37  ;;  %v4818_v60 = vadd.f32 %v1732_v8, %v1425_v1  ;;  %v1590_v8 = vrot.slane %v1588_v4, 1 }
 0x11d   : > { %1391 = vmatmul.bf16.gmra.mxu3 %v1246_v40  ;;  %v1594_v34 = vor.u32 %v1593_v27, %v1590_v8 }
 0x11e   : > { %1774 = vmatmul.bf16.gmra.mxu0 %v1586_v55  ;;  %v957_v33 = vpop.f32.mrf.mxu2 }
 0x11f   : > { %v1041_v12 = vadd.f32 %v957_v33, %v734_v47  ;;  %v1600_v33 = vshll.u32 %v4034_v56, 16 }
 0x120   : > { %v735_v18 = vpop.f32.mrf.mxu1  ;;  %v4825_v13 = vpop.f32.mrf.mxu3 }
 0x121   : > { %v1426_v48 = vadd.f32 %v4774_v26, %v1041_v12  ;;  %v736_v24 = vadd.f32 %v735_v18, %v4709_v25  ;;  %v859_v26 = vsel %vm834_vm1, %v856_v39, %v858_v9  ;;  %v1248_v25 = vsel %vm834_vm1, %v1245_v45, %v1247_v10 }
 0x122   : > { %v1597_v39 = vshrl.u32 %v4034_v56, 16  ;;  %v1602_v27 = vrot.slane %v1600_v33, 2 }
 0x123   : > { %v1737_v46 = vpop.f32.mrf.mxu0  ;;  %v4827_v14 = vadd.f32 %v1735_v21, %v1426_v48  ;;  %v1595_v21 = vsel %vm1479_vm2, %v1585_v42, %v1594_v34 }
 0x124   : > { %v1599_v8 = vrot.slane %v1597_v39, 1  ;;  %v4056_v39 = vld [vmem:[%s5493_s1 + $0x148] sm:$0xff] }
 0x125   : > { %1982 = vmatpush.bf16.msra.mxu1 %v4056_v39 }
 0x126   : > { %v959_v37 = vpop.f32.mrf.mxu2 }
 0x127   : > { %v1042_v1 = vadd.f32 %v959_v37, %v736_v24  ;;  %v4858_v24 = vld [vmem:[%s4331_s25 + $0x80] sm:$0xff] }
 0x128   : > { %v738_v55 = vpop.f32.mrf.mxu1  ;;  %v4838_v47 = vpop.f32.mrf.mxu3 }
 0x129   : > { %v1427_v17 = vadd.f32 %v4786_v63, %v1042_v1  ;;  %v739_v5 = vadd.f32 %v738_v55, %v4720_v44  ;;  %v4089_v44 = vld [vmem:[%s5493_s1 + $0x1c8] sm:$0xff]  ;;  %v1603_v1 = vor.u32 %v1602_v27, %v1599_v8 }
 0x12a   : > { %2760 = vmatpush.bf16.msra.mxu3 %v4089_v44 }
 0x12b   : > { %v1740_v40 = vpop.f32.mrf.mxu0  ;;  %777 = vmatmul.bf16.gmra.mxu1 %v4254_v50  ;;  %1001 = vmatmul.bf16.gmra.mxu2 %v859_v26  ;;  %v4841_v4 = vadd.f32 %v1737_v46, %v1427_v17  ;;  %v4081_v46 = vld [vmem:[%s5493_s1 + $0x188] sm:$0xff]  ;;  %v1249_v50 = vrot.slane %v4858_v24, 1 }
 0x12c   : > { %2367 = vmatpush.bf16.msra.mxu2 %v4081_v46 }
 0x12d   : > { %1396 = vmatmul.bf16.gmra.mxu3 %v1248_v25 }
 0x12e   : > { %1779 = vmatmul.bf16.gmra.mxu0 %v1595_v21  ;;  %v962_v12 = vpop.f32.mrf.mxu2 }
 0x12f   : > { %v1043_v63 = vadd.f32 %v962_v12, %v739_v5 }
 0x130   : > { %v740_v18 = vpop.f32.mrf.mxu1  ;;  %v4852_v45 = vpop.f32.mrf.mxu3 }
 0x131   : > { %v1428_v42 = vadd.f32 %v4802_v52, %v1043_v63  ;;  %v860_v52 = vrot.slane %v4476_v31, 1  ;;  %v741_v37 = vadd.f32 %v740_v18, %v4731_v0  ;;  %v4255_v0 = vld [vmem:[%s4331_s25 + $0x60] sm:$0xff]  ;;  %v1606_v63 = vshrl.u32 %v4831_v57, 16 }
 0x132   : > { %v1609_v18 = vshll.u32 %v4831_v57, 16 }
 0x133   : > { %v1742_v48 = vpop.f32.mrf.mxu0  ;;  %v4854_v56 = vadd.f32 %v1740_v40, %v1428_v42  ;;  %v861_v21 = vsel %vm834_vm1, %v858_v9, %v860_v52  ;;  %v1604_v40 = vsel %vm1479_vm2, %v1594_v34, %v1603_v1  ;;  %v1250_v9 = vsel %vm834_vm1, %v1247_v10, %v1249_v50 }
 0x134   : > { %v1608_v46 = vrot.slane %v1606_v63, 1  ;;  %v1611_v44 = vrot.slane %v1609_v18, 2  ;;  %v1615_v63 = vshrl.u32 %v4858_v24, 16 }
 0x136   : > { %v964_v55 = vpop.f32.mrf.mxu2 }
 0x137   : > { %v1044_v26 = vadd.f32 %v964_v55, %v741_v37 }
 0x138   : > { %v743_v17 = vpop.f32.mrf.mxu1  ;;  %v4868_v33 = vpop.f32.mrf.mxu3 }
 0x139   : > { %v1429_v25 = vadd.f32 %v4815_v11, %v1044_v26  ;;  %v4097_v11 = vld [vmem:[%s5493_s1 + $0x208] sm:$0xff]  ;;  %v744_v34 = vadd.f32 %v743_v17, %v4740_v62  ;;  %v862_v62 = vrot.slane %v4534_v22, 1  ;;  %v1612_v17 = vor.u32 %v1611_v44, %v1608_v46 }
 0x13a   : > { %3020 = vmatpush.bf16.msra.mxu0 %v4097_v11  ;;  %v4887_v26 = vld [vmem:[%s4331_s25 + $0x88] sm:$0xff] }
 0x13b   : > { %v1745_v5 = vpop.f32.mrf.mxu0  ;;  %782 = vmatmul.bf16.gmra.mxu1 %v4255_v0  ;;  %1006 = vmatmul.bf16.gmra.mxu2 %v861_v21  ;;  %v4871_v12 = vadd.f32 %v1742_v48, %v1429_v25  ;;  %v863_v39 = vsel %vm834_vm1, %v860_v52, %v862_v62 }
 0x13d   : > { %1401 = vmatmul.bf16.gmra.mxu3 %v1250_v9 }
 0x13e   : > { %1784 = vmatmul.bf16.gmra.mxu0 %v1604_v40  ;;  %v967_v42 = vpop.f32.mrf.mxu2 }
 0x13f   : > { %v1045_v8 = vadd.f32 %v967_v42, %v744_v34 }
 0x140   : > { %v745_v48 = vpop.f32.mrf.mxu1  ;;  %v4881_v37 = vpop.f32.mrf.mxu3 }
 0x141   : > { %v1430_v27 = vadd.f32 %v4825_v13, %v1045_v8  ;;  %v746_v57 = vadd.f32 %v745_v48, %v4755_v51  ;;  %v1251_v13 = vrot.slane %v4887_v26, 1  ;;  %v1617_v48 = vrot.slane %v1615_v63, 1 }
 0x143   : > { %v1747_v10 = vpop.f32.mrf.mxu0  ;;  %v4883_v55 = vadd.f32 %v1745_v5, %v1430_v27  ;;  %v1613_v5 = vsel %vm1479_vm2, %v1603_v1, %v1612_v17  ;;  %v1252_v51 = vsel %vm834_vm1, %v1249_v50, %v1251_v13  ;;  %v4256_v50 = vld [vmem:[%s4331_s25 + $0x78] sm:$0xff] }
 0x144   : > { %v864_v44 = vrot.slane %v4256_v50, 1 }
 0x146   : > { %v969_v21 = vpop.f32.mrf.mxu2 }
 0x147   : > { %v1046_v25 = vadd.f32 %v969_v21, %v746_v57 }
 0x148   : > { %v748_v40 = vpop.f32.mrf.mxu1  ;;  %v4894_v11 = vpop.f32.mrf.mxu3 }
 0x149   : > { %v1431_v0 = vadd.f32 %v4838_v47, %v1046_v25  ;;  %v749_v52 = vadd.f32 %v748_v40, %v4638_v20  ;;  %v1618_v47 = vshll.u32 %v4858_v24, 16  ;;  %v4910_v20 = vld [vmem:[%s4331_s25 + $0x90] sm:$0xff] }
 0x14b   : > { %v1750_v9 = vpop.f32.mrf.mxu0  ;;  %787 = vmatmul.bf16.gmra.mxu1 %v4476_v31  ;;  %1011 = vmatmul.bf16.gmra.mxu2 %v863_v39  ;;  %v4897_v34 = vadd.f32 %v1747_v10, %v1431_v0  ;;  %v1620_v27 = vrot.slane %v1618_v47, 2  ;;  %v865_v39 = vsel %vm834_vm1, %v862_v62, %v864_v44  ;;  %v1624_v47 = vshrl.u32 %v4887_v26, 16 }
 0x14d   : > { %1406 = vmatmul.bf16.gmra.mxu3 %v1252_v51  ;;  %v1621_v24 = vor.u32 %v1620_v27, %v1617_v48  ;;  %v4080_v51 = vld [vmem:[%s5493_s1 + $0x180] sm:$0xff] }
 0x14e   : > { %1789 = vmatmul.bf16.gmra.mxu0 %v1613_v5  ;;  %v972_v18 = vpop.f32.mrf.mxu2  ;;  %2368 = vmatpush.bf16.msra.mxu2 %v4080_v51 }
 0x14f   : > { %v1047_v1 = vadd.f32 %v972_v18, %v749_v52  ;;  %v1627_v18 = vshll.u32 %v4887_v26, 16 }
 0x150   : > { %v750_v42 = vpop.f32.mrf.mxu1  ;;  %v4904_v10 = vpop.f32.mrf.mxu3 }
 0x151   : > { %v1432_v31 = vadd.f32 %v4852_v45, %v1047_v1  ;;  %v751_v57 = vadd.f32 %v750_v42, %v4651_v16  ;;  %v1253_v45 = vrot.slane %v4910_v20, 1  ;;  %v4088_v16 = vld [vmem:[%s5493_s1 + $0x1c0] sm:$0xff] }
 0x152   : > { %2761 = vmatpush.bf16.msra.mxu3 %v4088_v16 }
 0x153   : > { %v1752_v8 = vpop.f32.mrf.mxu0  ;;  %v4906_v46 = vadd.f32 %v1750_v9, %v1432_v31  ;;  %v1622_v9 = vsel %vm1479_vm2, %v1612_v17, %v1621_v24  ;;  %v1254_v17 = vsel %vm834_vm1, %v1251_v13, %v1253_v45  ;;  %v1626_v13 = vrot.slane %v1624_v47, 1 }
 0x155   : > { %5505 = vst [vmem:[#allocation9_spill] sm:$0xff] %v4906_v46 }
 0x156   : > { %v974_v21 = vpop.f32.mrf.mxu2 }
 0x157   : > { %v1048_v25 = vadd.f32 %v974_v21, %v751_v57  ;;  %v1629_v57 = vrot.slane %v1627_v18, 2  ;;  %v2111_v18 = vld [vmem:[%s4331_s25 + $0x10] sm:$0xc] }
 0x158   : > { %v753_v40 = vpop.f32.mrf.mxu1  ;;  %v4923_v52 = vpop.f32.mrf.mxu3 }
 0x159   : > { %v1433_v0 = vadd.f32 %v4868_v33, %v1048_v25  ;;  %v4055_v33 = vld [vmem:[%s5493_s1 + $0x140] sm:$0xff]  ;;  %v754_v63 = vadd.f32 %v753_v40, %v4661_v7 }
 0x15a   : > { %1983 = vmatpush.bf16.msra.mxu1 %v4055_v33  ;;  %v4096_v7 = vld [vmem:[%s5493_s1 + $0x200] sm:$0xff] }
 0x15b   : > { %v1755_v5 = vpop.f32.mrf.mxu0  ;;  %792 = vmatmul.bf16.gmra.mxu1 %v4534_v22  ;;  %1016 = vmatmul.bf16.gmra.mxu2 %v865_v39  ;;  %v4929_v62 = vadd.f32 %v1752_v8, %v1433_v0  ;;  %v1109_v22 = vld [vmem:[%s4331_s25 + $0x98] sm:$0x1]  ;;  %v4945_v25 = vld [vmem:[%s4331_s25 + $0x80] sm:$0xff]  ;;  %v1630_v0 = vor.u32 %v1629_v57, %v1626_v13 }
 0x15c   : > { %v1200_v8 = vunpack.c.l.b16 %v1109_v22  ;;  %3021 = vmatpush.bf16.msra.mxu0 %v4096_v7  ;;  %v866_v40 = vrot.slane %v4945_v25, 1  ;;  %v4954_v22 = vld [vmem:[%s4331_s25 + $0x14] sm:$0xf] }
 0x15d   : > { %5506 = vst [vmem:[#allocation10_spill] sm:$0xff] %v4929_v62  ;;  %1411 = vmatmul.bf16.gmra.mxu3 %v1254_v17 }
 0x15e   : > { %1794 = vmatmul.bf16.gmra.mxu0 %v1622_v9  ;;  %v977_v1 = vpop.f32.mrf.mxu2  ;;  %v1219_v39 = vpack.c.b16 %v1200_v8, %v1200_v8  ;;  %v867_v33 = vsel %vm834_vm1, %v864_v44, %v866_v40  ;;  %v4963_v8 = vld [vmem:[%s4331_s25 + $0x18] sm:$0xff] }
 0x15f   : > { %v1049_v42 = vadd.f32 %v977_v1, %v754_v63 }
 0x160   : > { %v755_v31 = vpop.f32.mrf.mxu1  ;;  %v4940_v21 = vpop.f32.mrf.mxu3  ;;  %v1255_v17 = vrot.slane %v1219_v39, 1  ;;  %v2527_v39 = vshrl.u32 %v4963_v8, 16 }
 0x161   : > { %v1434_v48 = vadd.f32 %v4881_v37, %v1049_v42  ;;  %v756_v37 = vadd.f32 %v755_v31, %v4673_v59  ;;  %v2202_v42 = vunpack.c.l.b16 %v2111_v18  ;;  %v5497_v59 = vunpack.c.l.b16 %v4954_v22 }
 0x162   : > { %v1256_v44 = vsel %vm834_vm1, %v1253_v45, %v1255_v17  ;;  %v4258_v17 = vld [vmem:[%s4331_s25 + $0x88] sm:$0xff] }
 0x163   : > { %v1757_v27 = vpop.f32.mrf.mxu0  ;;  %v4942_v26 = vadd.f32 %v1755_v5, %v1434_v48  ;;  %v1631_v5 = vsel %vm1479_vm2, %v1621_v24, %v1630_v0  ;;  %v1633_v48 = vshrl.u32 %v4910_v20, 16 }
 0x165   : > { %5507 = vst [vmem:[#allocation11_spill] sm:$0xff] %v4942_v26 }
 0x166   : > { %v979_v9 = vpop.f32.mrf.mxu2 }
 0x167   : > { %v1050_v51 = vadd.f32 %v979_v9, %v756_v37  ;;  %v2530_v37 = vshll.u32 %v4963_v8, 16 }
 0x168   : > { %v758_v16 = vpop.f32.mrf.mxu1  ;;  %v4956_v1 = vpop.f32.mrf.mxu3 }
 0x169   : > { %v1435_v63 = vadd.f32 %v4894_v11, %v1050_v51  ;;  %v4967_v11 = vpack.c.b16 %v5497_v59, %v2202_v42  ;;  %v759_v24 = vadd.f32 %v758_v16, %v4686_v3  ;;  %v1635_v51 = vrot.slane %v1633_v48, 1 }
 0x16b   : > { %v1760_v47 = vpop.f32.mrf.mxu0  ;;  %797 = vmatmul.bf16.gmra.mxu1 %v4256_v50  ;;  %1021 = vmatmul.bf16.gmra.mxu2 %v867_v33  ;;  %v4959_v31 = vadd.f32 %v1757_v27, %v1435_v63  ;;  %v1636_v50 = vshll.u32 %v4910_v20, 16  ;;  %v2519_v45 = vshrl.u32 %v4967_v11, 16  ;;  %v2522_v7 = vshll.u32 %v4967_v11, 16  ;;  %v1458_v20 = vld [vmem:[%s4331_s25 + $0x98] sm:$0x3] }
 0x16c   : > { %v868_v63 = vrot.slane %v4258_v17, 1 }
 0x16d   : > { %5508 = vst [vmem:[#allocation12_spill] sm:$0xff] %v4959_v31  ;;  %1416 = vmatmul.bf16.gmra.mxu3 %v1256_v44  ;;  %v1638_v16 = vrot.slane %v1636_v50, 2  ;;  %v2521_v18 = vrot.slane %v2519_v45, 2  ;;  %v2524_v42 = vrot.slane %v2522_v7, 3  ;;  %v2529_v44 = vrot.slane %v2527_v39, 2 }
 0x16e   : > { %1799 = vmatmul.bf16.gmra.mxu0 %v1631_v5  ;;  %v982_v13 = vpop.f32.mrf.mxu2  ;;  %v1477_v31 = vunpack.c.l.b16 %v1458_v20  ;;  %v869_v50 = vsel %vm834_vm1, %v866_v40, %v868_v63  ;;  %v4996_v40 = vld [vmem:[%s4331_s25 + $0x20] sm:$0xff] }
 0x16f   : > { %v1051_v27 = vadd.f32 %v982_v13, %v759_v24  ;;  %v2532_v24 = vrot.slane %v2530_v37, 3  ;;  %v1639_v59 = vor.u32 %v1638_v16, %v1635_v51 }
 0x170   : > { %v760_v57 = vpop.f32.mrf.mxu1  ;;  %v4977_v33 = vpop.f32.mrf.mxu3  ;;  %v4987_v7 = vpack.c.b16 %v1477_v31, %v1477_v31 }
 0x171   : > { %v1436_v3 = vadd.f32 %v4904_v10, %v1051_v27  ;;  %v761_v13 = vadd.f32 %v760_v57, %v4704_v23  ;;  %v2525_v27 = vor.u32 %v2524_v42, %v2521_v18  ;;  %v2533_v62 = vor.u32 %v2532_v24, %v2529_v44 }
 0x172   : > { %v1640_v45 = vsel %vm1479_vm2, %v1630_v0, %v1639_v59  ;;  %v1642_v57 = vshrl.u32 %v4987_v7, 16  ;;  %v1645_v0 = vshll.u32 %v4987_v7, 16  ;;  %v870_v42 = vrot.slane %v4512_v54, 1 }
 0x173   : > { %v1762_v9 = vpop.f32.mrf.mxu0  ;;  %v4981_v5 = vadd.f32 %v1760_v47, %v1436_v3 }
 0x174   : > { %v1644_v16 = vrot.slane %v1642_v57, 1  ;;  %v1647_v20 = vrot.slane %v1645_v0, 2  ;;  %v2889_v0 = vld [vmem:[%s4331_s25 + $0x10] sm:$0x8] }
 0x176   : > { %v984_v26 = vpop.f32.mrf.mxu2 }
 0x177   : > { %v1052_v10 = vadd.f32 %v984_v26, %v761_v13  ;;  %v2534_v26 = vsel %vm2517_vm3, %v2525_v27, %v2533_v62 }
 0x178   : > { %v763_v48 = vpop.f32.mrf.mxu1  ;;  %v4989_v39 = vpop.f32.mrf.mxu3 }
 0x179   : > { %v1437_v46 = vadd.f32 %v4923_v52, %v1052_v10  ;;  %v764_v52 = vadd.f32 %v763_v48, %v4717_v38  ;;  %v1648_v10 = vor.u32 %v1647_v20, %v1644_v16 }
 0x17b   : > { %v1765_v47 = vpop.f32.mrf.mxu0  ;;  %802 = vmatmul.bf16.gmra.mxu1 %v4945_v25  ;;  %1026 = vmatmul.bf16.gmra.mxu2 %v869_v50  ;;  %v4992_v23 = vadd.f32 %v1762_v9, %v1437_v46  ;;  %v2536_v25 = vshrl.u32 %v4996_v40, 16  ;;  %v2539_v46 = vshll.u32 %v4996_v40, 16 }
 0x17d   : > { %2762 = vmatmul.bf16.vlgmr.msra.gmra.mxu3 %v2534_v26  ;;  %v2538_v44 = vrot.slane %v2536_v25, 2  ;;  %v2541_v24 = vrot.slane %v2539_v46, 3 }
 0x17e   : > { %1804 = vmatmul.bf16.gmra.mxu0 %v1640_v45  ;;  %v987_v31 = vpop.f32.mrf.mxu2  ;;  %v1851_v45 = vld [vmem:[%s4331_s25 + $0x8] sm:$0xc] }
 0x17f   : > { %v1053_v37 = vadd.f32 %v987_v31, %v764_v52  ;;  %v2542_v26 = vor.u32 %v2541_v24, %v2538_v44 }
 0x180   : > { %v765_v3 = vpop.f32.mrf.mxu1  ;;  %v5004_v18 = vpop.f32.mrf.mxu3 }
 0x181   : > { %v1438_v9 = vadd.f32 %v4940_v21, %v1053_v37  ;;  %v766_v13 = vadd.f32 %v765_v3, %v4729_v35  ;;  %v871_v21 = vsel %vm834_vm1, %v868_v63, %v870_v42  ;;  %v1870_v35 = vunpack.c.l.b16 %v1851_v45  ;;  %v5021_v63 = vld [vmem:[%s4331_s25 + $0x28] sm:$0xff] }
 0x182   : > { %v2543_v37 = vsel %vm2517_vm3, %v2533_v62, %v2542_v26  ;;  %v2545_v16 = vshrl.u32 %v5021_v63, 16  ;;  %v5510_v42 = vunpack.c.l.b16 %v4954_v22  ;;  %v2912_v22 = vrot.slane %v4963_v8, 3 }
 0x183   : > { %v1767_v51 = vpop.f32.mrf.mxu0  ;;  %v5006_v38 = vadd.f32 %v1765_v47, %v1438_v9  ;;  %v1649_v47 = vsel %vm1479_vm2, %v1639_v59, %v1648_v10  ;;  %v5509_v59 = vunpack.c.l.b16 %v4559_v32  ;;  %v2258_v32 = vrot.slane %v4967_v11, 2 }
 0x185   : > { %v1871_v9 = vpack.c.b16 %v5509_v59, %v1870_v35 }
 0x186   : > { %v989_v48 = vpop.f32.mrf.mxu2 }
 0x187   : > { %v1054_v50 = vadd.f32 %v989_v48, %v766_v13  ;;  %v4259_v13 = vld [vmem:[%s4331_s25 + $0x10] sm:$0xff] }
 0x188   : > { %v768_v27 = vpop.f32.mrf.mxu1  ;;  %v5015_v54 = vpop.f32.mrf.mxu3  ;;  %v1874_v10 = vrot.slane %v4259_v13, 2  ;;  %v2261_v13 = vrot.slane %v4996_v40, 2 }
 0x189   : > { %v1439_v52 = vadd.f32 %v4956_v1, %v1054_v50  ;;  %v769_v3 = vadd.f32 %v768_v27, %v4737_v53  ;;  %v2908_v1 = vunpack.c.l.b16 %v2889_v0  ;;  %v1873_v53 = vrot.slane %v1871_v9, 2 }
 0x18a   : > { %v2259_v50 = vrot.slane %v4963_v8, 2  ;;  %v2547_v27 = vrot.slane %v2545_v16, 2 }
 0x18b   : > { %v1770_v57 = vpop.f32.mrf.mxu0  ;;  %807 = vmatmul.bf16.gmra.mxu1 %v4258_v17  ;;  %1031 = vmatmul.bf16.gmra.mxu2 %v871_v21  ;;  %v5017_v31 = vadd.f32 %v1767_v51, %v1439_v52  ;;  %v2548_v51 = vshll.u32 %v5021_v63, 16  ;;  %v2909_v44 = vpack.c.b16 %v5510_v42, %v2908_v1 }
 0x18c   : > { %v2260_v35 = vsel %vm1872_vm4, %v2258_v32, %v2259_v50 }
 0x18d   : > { %2767 = vmatmul.bf16.gmra.mxu3 %v2543_v37  ;;  %v2550_v21 = vrot.slane %v2548_v51, 3 }
 0x18e   : > { %1809 = vmatmul.bf16.gmra.mxu0 %v1649_v47  ;;  %v992_v25 = vpop.f32.mrf.mxu2 }
 0x18f   : > { %v1055_v46 = vadd.f32 %v992_v25, %v769_v3  ;;  %v2551_v11 = vor.u32 %v2550_v21, %v2547_v27  ;;  %v2914_v21 = vrot.slane %v4996_v40, 3 }
 0x190   : > { %v770_v17 = vpop.f32.mrf.mxu1  ;;  %v5031_v24 = vpop.f32.mrf.mxu3 }
 0x191   : > { %v1440_v20 = vadd.f32 %v4977_v33, %v1055_v46  ;;  %v771_v45 = vadd.f32 %v770_v17, %v4753_v49  ;;  %v2911_v33 = vrot.slane %v2909_v44, 3  ;;  %v2552_v25 = vsel %vm2517_vm3, %v2542_v26, %v2551_v11  ;;  %v5050_v46 = vld [vmem:[%s4331_s25 + $0x30] sm:$0xff]  ;;  %v4260_v26 = vld [vmem:[%s4331_s25 + $0x18] sm:$0xff] }
 0x192   : > { %v2554_v16 = vshrl.u32 %v5050_v46, 16  ;;  %v2557_v51 = vshll.u32 %v5050_v46, 16 }
 0x193   : > { %v1772_v62 = vpop.f32.mrf.mxu0  ;;  %v5034_v48 = vadd.f32 %v1770_v57, %v1440_v20  ;;  %v1875_v57 = vsel %vm1872_vm4, %v1873_v53, %v1874_v10  ;;  %v2913_v1 = vsel %vm2910_vm5, %v2911_v33, %v2912_v22  ;;  %v1876_v53 = vrot.slane %v4260_v26, 2 }
 0x194   : > { %v2559_v32 = vrot.slane %v2557_v51, 3 }
 0x196   : > { %v994_v52 = vpop.f32.mrf.mxu2 }
 0x197   : > { %v1056_v47 = vadd.f32 %v994_v52, %v771_v45 }
 0x198   : > { %v773_v0 = vpop.f32.mrf.mxu1  ;;  %v5044_v49 = vpop.f32.mrf.mxu3 }
 0x199   : > { %v1441_v37 = vadd.f32 %v4989_v39, %v1056_v47  ;;  %v774_v59 = vadd.f32 %v773_v0, %v4649_v29  ;;  %v2556_v29 = vrot.slane %v2554_v16, 2  ;;  %v2262_v47 = vsel %vm1872_vm4, %v2259_v50, %v2261_v13 }
 0x19b   : > { %v1775_v3 = vpop.f32.mrf.mxu0  ;;  %1984 = vmatmul.bf16.vlgmr.msra.gmra.mxu1 %v1875_v57  ;;  %2369 = vmatmul.bf16.vlgmr.msra.gmra.mxu2 %v2260_v35  ;;  %v5046_v8 = vadd.f32 %v1772_v62, %v1441_v37  ;;  %v2560_v0 = vor.u32 %v2559_v32, %v2556_v29  ;;  %v2915_v37 = vsel %vm2910_vm5, %v2912_v22, %v2914_v21  ;;  %v2916_v29 = vrot.slane %v5021_v63, 3 }
 0x19d   : > { %2772 = vmatmul.bf16.gmra.mxu3 %v2552_v25  ;;  %v2561_v40 = vsel %vm2517_vm3, %v2551_v11, %v2560_v0  ;;  %v4261_v11 = vld [vmem:[%s4331_s25 + $0x20] sm:$0xff] }
 0x19e   : > { %3022 = vmatmul.bf16.vlgmr.msra.gmra.mxu0 %v2913_v1  ;;  %v997_v9 = vpop.f32.mrf.mxu2  ;;  %v5074_v1 = vld [vmem:[%s4331_s25 + $0x38] sm:$0xff]  ;;  %v1878_v51 = vrot.slane %v4261_v11, 2 }
 0x19f   : > { %v1057_v17 = vadd.f32 %v997_v9, %v774_v59  ;;  %v2563_v22 = vshrl.u32 %v5074_v1, 16  ;;  %v2566_v59 = vshll.u32 %v5074_v1, 16 }
 0x1a0   : > { %v775_v39 = vpop.f32.mrf.mxu1  ;;  %v5056_v62 = vpop.f32.mrf.mxu3 }
 0x1a1   : > { %v1442_v20 = vadd.f32 %v5004_v18, %v1057_v17  ;;  %v776_v27 = vadd.f32 %v775_v39, %v4659_v43  ;;  %v1877_v18 = vsel %vm1872_vm4, %v1874_v10, %v1876_v53 }
 0x1a3   : > { %v1777_v42 = vpop.f32.mrf.mxu0  ;;  %v5058_v44 = vadd.f32 %v1775_v3, %v1442_v20  ;;  %v2263_v20 = vrot.slane %v5021_v63, 2 }
 0x1a6   : > { %v999_v45 = vpop.f32.mrf.mxu2 }
 0x1a7   : > { %v1058_v33 = vadd.f32 %v999_v45, %v776_v27 }
 0x1a8   : > { %v778_v52 = vpop.f32.mrf.mxu1  ;;  %v5068_v3 = vpop.f32.mrf.mxu3 }
 0x1a9   : > { %v1443_v57 = vadd.f32 %v5015_v54, %v1058_v33  ;;  %v779_v10 = vadd.f32 %v778_v52, %v4671_v58  ;;  %v2565_v58 = vrot.slane %v2563_v22, 2  ;;  %v2264_v33 = vsel %vm1872_vm4, %v2261_v13, %v2263_v20 }
 0x1ab   : > { %v1780_v35 = vpop.f32.mrf.mxu0  ;;  %1989 = vmatmul.bf16.gmra.mxu1 %v1877_v18  ;;  %2374 = vmatmul.bf16.gmra.mxu2 %v2262_v47  ;;  %v5070_v43 = vadd.f32 %v1777_v42, %v1443_v57  ;;  %v2568_v42 = vrot.slane %v2566_v59, 3  ;;  %v2917_v57 = vsel %vm2910_vm5, %v2914_v21, %v2916_v29 }
 0x1ad   : > { %2777 = vmatmul.bf16.gmra.mxu3 %v2561_v40  ;;  %v2569_v52 = vor.u32 %v2568_v42, %v2565_v58  ;;  %v2918_v58 = vrot.slane %v5050_v46, 3 }
 0x1ae   : > { %3027 = vmatmul.bf16.gmra.mxu0 %v2915_v37  ;;  %v1002_v50 = vpop.f32.mrf.mxu2  ;;  %v5098_v37 = vld [vmem:[%s4331_s25 + $0x40] sm:$0xff] }
 0x1af   : > { %v1059_v25 = vadd.f32 %v1002_v50, %v779_v10  ;;  %v2570_v63 = vsel %vm2517_vm3, %v2560_v0, %v2569_v52  ;;  %v2572_v21 = vshrl.u32 %v5098_v37, 16  ;;  %v2575_v10 = vshll.u32 %v5098_v37, 16  ;;  %v4262_v0 = vld [vmem:[%s4331_s25 + $0x28] sm:$0xff] }
 0x1b0   : > { %v780_v54 = vpop.f32.mrf.mxu1  ;;  %v5080_v39 = vpop.f32.mrf.mxu3  ;;  %v1880_v59 = vrot.slane %v4262_v0, 2 }
 0x1b1   : > { %v1444_v9 = vadd.f32 %v5031_v24, %v1059_v25  ;;  %v781_v26 = vadd.f32 %v780_v54, %v4681_v2  ;;  %v1879_v24 = vsel %vm1872_vm4, %v1876_v53, %v1878_v51 }
 0x1b3   : > { %v1782_v17 = vpop.f32.mrf.mxu0  ;;  %v5082_v16 = vadd.f32 %v1780_v35, %v1444_v9  ;;  %v2265_v9 = vrot.slane %v5050_v46, 2 }
 0x1b6   : > { %v1004_v32 = vpop.f32.mrf.mxu2 }
 0x1b7   : > { %v1060_v27 = vadd.f32 %v1004_v32, %v781_v26 }
 0x1b8   : > { %v783_v45 = vpop.f32.mrf.mxu1  ;;  %v5092_v35 = vpop.f32.mrf.mxu3 }
 0x1b9   : > { %v1445_v18 = vadd.f32 %v5044_v49, %v1060_v27  ;;  %v784_v53 = vadd.f32 %v783_v45, %v4702_v19  ;;  %v2574_v19 = vrot.slane %v2572_v21, 2  ;;  %v2266_v27 = vsel %vm1872_vm4, %v2263_v20, %v2265_v9 }
 0x1bb   : > { %v1785_v47 = vpop.f32.mrf.mxu0  ;;  %1994 = vmatmul.bf16.gmra.mxu1 %v1879_v24  ;;  %2379 = vmatmul.bf16.gmra.mxu2 %v2264_v33  ;;  %v5094_v2 = vadd.f32 %v1782_v17, %v1445_v18  ;;  %v2577_v17 = vrot.slane %v2575_v10, 3  ;;  %v2919_v18 = vsel %vm2910_vm5, %v2916_v29, %v2918_v58 }
 0x1bd   : > { %2782 = vmatmul.bf16.gmra.mxu3 %v2570_v63  ;;  %v2578_v45 = vor.u32 %v2577_v17, %v2574_v19  ;;  %v2920_v19 = vrot.slane %v5074_v1, 3 }
 0x1be   : > { %3032 = vmatmul.bf16.gmra.mxu0 %v2917_v57  ;;  %v1007_v13 = vpop.f32.mrf.mxu2  ;;  %v5122_v57 = vld [vmem:[%s4331_s25 + $0x48] sm:$0xff] }
 0x1bf   : > { %v1061_v40 = vadd.f32 %v1007_v13, %v784_v53  ;;  %v2579_v46 = vsel %vm2517_vm3, %v2569_v52, %v2578_v45  ;;  %v2581_v29 = vshrl.u32 %v5122_v57, 16  ;;  %v2584_v53 = vshll.u32 %v5122_v57, 16  ;;  %v4263_v52 = vld [vmem:[%s4331_s25 + $0x30] sm:$0xff] }
 0x1c0   : > { %v785_v49 = vpop.f32.mrf.mxu1  ;;  %v5104_v54 = vpop.f32.mrf.mxu3  ;;  %v1882_v10 = vrot.slane %v4263_v52, 2  ;;  %v5511_v52 = vld [vmem:[#allocation8_spill] sm:$0xff] }
 0x1c1   : > { %v1446_v50 = vadd.f32 %v5056_v62, %v1061_v40  ;;  %v786_v11 = vadd.f32 %v785_v49, %v4715_v36  ;;  %v1881_v62 = vsel %vm1872_vm4, %v1878_v51, %v1880_v59 }
 0x1c3   : > { %v1787_v25 = vpop.f32.mrf.mxu0  ;;  %v5106_v22 = vadd.f32 %v1785_v47, %v1446_v50  ;;  %v2267_v50 = vrot.slane %v5074_v1, 2 }
 0x1c6   : > { %v1009_v42 = vpop.f32.mrf.mxu2 }
 0x1c7   : > { %v1062_v26 = vadd.f32 %v1009_v42, %v786_v11 }
 0x1c8   : > { %v788_v32 = vpop.f32.mrf.mxu1  ;;  %v5116_v47 = vpop.f32.mrf.mxu3 }
 0x1c9   : > { %v1447_v24 = vadd.f32 %v5068_v3, %v1062_v26  ;;  %v789_v51 = vadd.f32 %v788_v32, %v4727_v61  ;;  %v2583_v61 = vrot.slane %v2581_v29, 2  ;;  %v2268_v26 = vsel %vm1872_vm4, %v2265_v9, %v2267_v50 }
 0x1cb   : > { %v1790_v33 = vpop.f32.mrf.mxu0  ;;  %1999 = vmatmul.bf16.gmra.mxu1 %v1881_v62  ;;  %2384 = vmatmul.bf16.gmra.mxu2 %v2266_v27  ;;  %v5118_v36 = vadd.f32 %v1787_v25, %v1447_v24  ;;  %v2586_v25 = vrot.slane %v2584_v53, 3  ;;  %v2921_v24 = vsel %vm2910_vm5, %v2918_v58, %v2920_v19 }
 0x1cd   : > { %2787 = vmatmul.bf16.gmra.mxu3 %v2579_v46  ;;  %v2587_v32 = vor.u32 %v2586_v25, %v2583_v61  ;;  %v2922_v25 = vrot.slane %v5098_v37, 3 }
 0x1ce   : > { %3037 = vmatmul.bf16.gmra.mxu0 %v2919_v18  ;;  %v1012_v20 = vpop.f32.mrf.mxu2  ;;  %v5146_v18 = vld [vmem:[%s4331_s25 + $0x50] sm:$0xff] }
 0x1cf   : > { %v1063_v63 = vadd.f32 %v1012_v20, %v789_v51  ;;  %v2588_v1 = vsel %vm2517_vm3, %v2578_v45, %v2587_v32  ;;  %v2590_v58 = vshrl.u32 %v5146_v18, 16  ;;  %v2593_v51 = vshll.u32 %v5146_v18, 16  ;;  %v4264_v45 = vld [vmem:[%s4331_s25 + $0x38] sm:$0xff] }
 0x1d0   : > { %v790_v3 = vpop.f32.mrf.mxu1  ;;  %v5128_v49 = vpop.f32.mrf.mxu3  ;;  %v1884_v53 = vrot.slane %v4264_v45, 2 }
 0x1d1   : > { %v1448_v13 = vadd.f32 %v5080_v39, %v1063_v63  ;;  %v791_v0 = vadd.f32 %v790_v3, %v4735_v15  ;;  %v1883_v39 = vsel %vm1872_vm4, %v1880_v59, %v1882_v10 }
 0x1d3   : > { %v1792_v40 = vpop.f32.mrf.mxu0  ;;  %v5130_v21 = vadd.f32 %v1790_v33, %v1448_v13  ;;  %v2269_v13 = vrot.slane %v5098_v37, 2 }
 0x1d6   : > { %v1014_v17 = vpop.f32.mrf.mxu2 }
 0x1d7   : > { %v1064_v11 = vadd.f32 %v1014_v17, %v791_v0 }
 0x1d8   : > { %v793_v42 = vpop.f32.mrf.mxu1  ;;  %v5140_v33 = vpop.f32.mrf.mxu3 }
 0x1d9   : > { %v1449_v62 = vadd.f32 %v5092_v35, %v1064_v11  ;;  %v794_v59 = vadd.f32 %v793_v42, %v4751_v41  ;;  %v2592_v41 = vrot.slane %v2590_v58, 2  ;;  %v2270_v42 = vsel %vm1872_vm4, %v2267_v50, %v2269_v13 }
 0x1db   : > { %v1795_v27 = vpop.f32.mrf.mxu0  ;;  %2004 = vmatmul.bf16.gmra.mxu1 %v1883_v39  ;;  %2389 = vmatmul.bf16.gmra.mxu2 %v2268_v26  ;;  %v5142_v15 = vadd.f32 %v1792_v40, %v1449_v62  ;;  %v2595_v40 = vrot.slane %v2593_v51, 3 }
 0x1dd   : > { %2792 = vmatmul.bf16.gmra.mxu3 %v2588_v1  ;;  %v2596_v39 = vor.u32 %v2595_v40, %v2592_v41  ;;  %v2271_v41 = vrot.slane %v5122_v57, 2 }
 0x1de   : > { %3042 = vmatmul.bf16.gmra.mxu0 %v2921_v24  ;;  %v1017_v9 = vpop.f32.mrf.mxu2 }
 0x1df   : > { %v1065_v46 = vadd.f32 %v1017_v9, %v794_v59  ;;  %v2597_v1 = vsel %vm2517_vm3, %v2587_v32, %v2596_v39  ;;  %v5170_v59 = vld [vmem:[%s4331_s25 + $0x58] sm:$0xff]  ;;  %v4265_v32 = vld [vmem:[%s4331_s25 + $0x40] sm:$0xff] }
 0x1e0   : > { %v795_v35 = vpop.f32.mrf.mxu1  ;;  %v5152_v3 = vpop.f32.mrf.mxu3  ;;  %v1886_v45 = vrot.slane %v4265_v32, 2 }
 0x1e1   : > { %v1450_v20 = vadd.f32 %v5104_v54, %v1065_v46  ;;  %v796_v61 = vadd.f32 %v795_v35, %v5511_v52  ;;  %v1885_v54 = vsel %vm1872_vm4, %v1882_v10, %v1884_v53  ;;  %v5512_v10 = vld [vmem:[#allocation2_spill] sm:$0xff]  ;;  %v2602_v35 = vshll.u32 %v5170_v59, 16 }
 0x1e3   : > { %v1797_v63 = vpop.f32.mrf.mxu0  ;;  %v5154_v29 = vadd.f32 %v1795_v27, %v1450_v20  ;;  %v2923_v27 = vsel %vm2910_vm5, %v2920_v19, %v2922_v25  ;;  %v2599_v19 = vshrl.u32 %v5170_v59, 16  ;;  %v2604_v52 = vrot.slane %v2602_v35, 3 }
 0x1e5   : > { %v2601_v40 = vrot.slane %v2599_v19, 2 }
 0x1e6   : > { %v1019_v0 = vpop.f32.mrf.mxu2 }
 0x1e7   : > { %v1066_v17 = vadd.f32 %v1019_v0, %v796_v61  ;;  %v5513_v61 = vld [vmem:[#allocation3_spill] sm:$0xff] }
 0x1e8   : > { %v798_v11 = vpop.f32.mrf.mxu1  ;;  %v5164_v24 = vpop.f32.mrf.mxu3 }
 0x1e9   : > { %v1451_v26 = vadd.f32 %v5116_v47, %v1066_v17  ;;  %v799_v50 = vadd.f32 %v798_v11, %v5512_v10  ;;  %v2924_v17 = vrot.slane %v5122_v57, 3 }
 0x1eb   : > { %v1800_v62 = vpop.f32.mrf.mxu0  ;;  %2009 = vmatmul.bf16.gmra.mxu1 %v1885_v54  ;;  %2394 = vmatmul.bf16.gmra.mxu2 %v2270_v42  ;;  %v5166_v37 = vadd.f32 %v1797_v63, %v1451_v26  ;;  %v2272_v26 = vsel %vm1872_vm4, %v2269_v13, %v2271_v41  ;;  %v2925_v10 = vsel %vm2910_vm5, %v2922_v25, %v2924_v17 }
 0x1ed   : > { %2797 = vmatmul.bf16.gmra.mxu3 %v2597_v1 }
 0x1ee   : > { %3047 = vmatmul.bf16.gmra.mxu0 %v2923_v27  ;;  %v1022_v9 = vpop.f32.mrf.mxu2 }
 0x1ef   : > { %v1067_v46 = vadd.f32 %v1022_v9, %v799_v50 }
 0x1f0   : > { %v800_v47 = vpop.f32.mrf.mxu1  ;;  %v5176_v20 = vpop.f32.mrf.mxu3 }
 0x1f1   : > { %v1452_v58 = vadd.f32 %v5128_v49, %v1067_v46  ;;  %v801_v0 = vadd.f32 %v800_v47, %v5513_v61  ;;  %v1887_v49 = vsel %vm1872_vm4, %v1884_v53, %v1886_v45  ;;  %v5194_v46 = vld [vmem:[%s4331_s25 + $0x60] sm:$0xff]  ;;  %v5514_v53 = vld [vmem:[#allocation4_spill] sm:$0xff]  ;;  %v2273_v61 = vrot.slane %v5146_v18, 2 }
 0x1f2   : > { %v2608_v25 = vshrl.u32 %v5194_v46, 16  ;;  %v2611_v35 = vshll.u32 %v5194_v46, 16 }
 0x1f3   : > { %v1802_v51 = vpop.f32.mrf.mxu0  ;;  %v5178_v63 = vadd.f32 %v1800_v62, %v1452_v58  ;;  %v2605_v62 = vor.u32 %v2604_v52, %v2601_v40 }
 0x1f5   : > { %v2606_v9 = vsel %vm2517_vm3, %v2596_v39, %v2605_v62  ;;  %v4266_v39 = vld [vmem:[%s4331_s25 + $0x48] sm:$0xff] }
 0x1f6   : > { %v1024_v11 = vpop.f32.mrf.mxu2  ;;  %v1888_v52 = vrot.slane %v4266_v39, 2 }
 0x1f7   : > { %v1068_v54 = vadd.f32 %v1024_v11, %v801_v0  ;;  %v2610_v0 = vrot.slane %v2608_v25, 2  ;;  %v2613_v11 = vrot.slane %v2611_v35, 3  ;;  %v5218_v25 = vld [vmem:[%s4331_s25 + $0x68] sm:$0xff] }
 0x1f8   : > { %v803_v42 = vpop.f32.mrf.mxu1  ;;  %v5188_v50 = vpop.f32.mrf.mxu3  ;;  %v2620_v39 = vshll.u32 %v5218_v25, 16 }
 0x1f9   : > { %v1453_v27 = vadd.f32 %v5140_v33, %v1068_v54  ;;  %v804_v13 = vadd.f32 %v803_v42, %v5514_v53  ;;  %v5515_v54 = vld [vmem:[#allocation5_spill] sm:$0xff] }
 0x1fb   : > { %v1805_v1 = vpop.f32.mrf.mxu0  ;;  %2014 = vmatmul.bf16.gmra.mxu1 %v1887_v49  ;;  %2399 = vmatmul.bf16.gmra.mxu2 %v2272_v26  ;;  %v5190_v57 = vadd.f32 %v1802_v51, %v1453_v27  ;;  %v2926_v49 = vrot.slane %v5146_v18, 3 }
 0x1fd   : > { %2802 = vmatmul.bf16.gmra.mxu3 %v2606_v9  ;;  %v2274_v9 = vsel %vm1872_vm4, %v2271_v41, %v2273_v61 }
 0x1fe   : > { %3052 = vmatmul.bf16.gmra.mxu0 %v2925_v10  ;;  %v1027_v47 = vpop.f32.mrf.mxu2 }
 0x1ff   : > { %v1069_v19 = vadd.f32 %v1027_v47, %v804_v13  ;;  %v2927_v47 = vsel %vm2910_vm5, %v2924_v17, %v2926_v49  ;;  %v2617_v17 = vshrl.u32 %v5218_v25, 16 }
 0x200   : > { %v805_v33 = vpop.f32.mrf.mxu1  ;;  %v5200_v51 = vpop.f32.mrf.mxu3 }
 0x201   : > { %v1454_v58 = vadd.f32 %v5152_v3, %v1069_v19  ;;  %v806_v42 = vadd.f32 %v805_v33, %v5515_v54  ;;  %v1889_v3 = vsel %vm1872_vm4, %v1886_v45, %v1888_v52  ;;  %v5516_v45 = vld [vmem:[#allocation6_spill] sm:$0xff] }
 0x203   : > { %v1807_v32 = vpop.f32.mrf.mxu0  ;;  %v5202_v40 = vadd.f32 %v1805_v1, %v1454_v58  ;;  %v2614_v1 = vor.u32 %v2613_v11, %v2610_v0 }
 0x205   : > { %v2615_v33 = vsel %vm2517_vm3, %v2605_v62, %v2614_v1  ;;  %v4267_v62 = vld [vmem:[%s4331_s25 + $0x50] sm:$0xff] }
 0x206   : > { %v1029_v26 = vpop.f32.mrf.mxu2 }
 0x207   : > { %v1070_v27 = vadd.f32 %v1029_v26, %v806_v42  ;;  %v1890_v42 = vrot.slane %v4267_v62, 2  ;;  %v2275_v26 = vrot.slane %v5170_v59, 2 }
 0x208   : > { %v808_v10 = vpop.f32.mrf.mxu1  ;;  %v5212_v19 = vpop.f32.mrf.mxu3 }
 0x209   : > { %v1455_v53 = vadd.f32 %v5164_v24, %v1070_v27  ;;  %v809_v41 = vadd.f32 %v808_v10, %v5516_v45  ;;  %v2619_v27 = vrot.slane %v2617_v17, 2  ;;  %v2622_v10 = vrot.slane %v2620_v39, 3  ;;  %v5242_v39 = vld [vmem:[%s4331_s25 + $0x70] sm:$0xff] }
 0x20b   : > { %v1810_v13 = vpop.f32.mrf.mxu0  ;;  %2019 = vmatmul.bf16.gmra.mxu1 %v1889_v3  ;;  %2404 = vmatmul.bf16.gmra.mxu2 %v2274_v9  ;;  %v5214_v18 = vadd.f32 %v1807_v32, %v1455_v53  ;;  %v5517_v3 = vld [vmem:[#allocation7_spill] sm:$0xff]  ;;  %v2928_v53 = vrot.slane %v5170_v59, 3 }
 0x20d   : > { %2807 = vmatmul.bf16.gmra.mxu3 %v2615_v33 }
 0x20e   : > { %3057 = vmatmul.bf16.gmra.mxu0 %v2927_v47  ;;  %v1032_v35 = vpop.f32.mrf.mxu2 }
 0x20f   : > { %v1071_v58 = vadd.f32 %v1032_v35, %v809_v41  ;;  %v2276_v41 = vsel %vm1872_vm4, %v2273_v61, %v2275_v26 }
 0x210   : > { %v810_v24 = vpop.f32.mrf.mxu1  ;;  %v5224_v32 = vpop.f32.mrf.mxu3 }
 0x211   : > { %v1456_v0 = vadd.f32 %v5176_v20, %v1071_v58  ;;  %v811_v9 = vadd.f32 %v810_v24, %v5517_v3  ;;  %v1891_v20 = vsel %vm1872_vm4, %v1888_v52, %v1890_v42 }
 0x213   : > { %v1812_v11 = vpop.f32.mrf.mxu0  ;;  %v5226_v54 = vadd.f32 %v1810_v13, %v1456_v0  ;;  %v2623_v13 = vor.u32 %v2622_v10, %v2619_v27  ;;  %v2929_v0 = vsel %vm2910_vm5, %v2926_v49, %v2928_v53  ;;  %v2626_v49 = vshrl.u32 %v5242_v39, 16 }
 0x214   : > { %v2629_v27 = vshll.u32 %v5242_v39, 16 }
 0x215   : > { %v2624_v24 = vsel %vm2517_vm3, %v2614_v1, %v2623_v13  ;;  %v2277_v1 = vrot.slane %v5194_v46, 2 }
 0x216   : > { %v1034_v47 = vpop.f32.mrf.mxu2 }
 0x217   : > { %v1072_v33 = vadd.f32 %v1034_v47, %v811_v9  ;;  %v4268_v9 = vld [vmem:[%s4331_s25 + $0x58] sm:$0xff] }
 0x218   : > { %v1985_v45 = vpop.f32.mrf.mxu1  ;;  %v5236_v17 = vpop.f32.mrf.mxu3  ;;  %v1892_v47 = vrot.slane %v4268_v9, 2 }
 0x219   : > { %v1457_v35 = vadd.f32 %v5188_v50, %v1072_v33  ;;  %v2075_v52 = vadd.f32 %v1985_v45, %v4776_v30  ;;  %v2628_v33 = vrot.slane %v2626_v49, 2  ;;  %v2930_v45 = vrot.slane %v5194_v46, 3 }
 0x21b   : > { %v3023_v58 = vpop.f32.mrf.mxu0  ;;  %2024 = vmatmul.bf16.gmra.mxu1 %v1891_v20  ;;  %2409 = vmatmul.bf16.gmra.mxu2 %v2276_v41  ;;  %v5238_v59 = vadd.f32 %v1812_v11, %v1457_v35  ;;  %v2631_v20 = vrot.slane %v2629_v27, 3  ;;  %v2931_v46 = vsel %vm2910_vm5, %v2928_v53, %v2930_v45 }
 0x21d   : > { %2812 = vmatmul.bf16.gmra.mxu3 %v2624_v24 }
 0x21e   : > { %3062 = vmatmul.bf16.gmra.mxu0 %v2929_v0  ;;  %v2370_v61 = vpop.f32.mrf.mxu2  ;;  %v5257_v0 = vld [vmem:[%s5494_s2] ss:$0 sm:$0xff] }
 0x21f   : > { %v2460_v62 = vadd.f32 %v2370_v61, %v2075_v52  ;;  %v1893_v52 = vsel %vm1872_vm4, %v1890_v42, %v1892_v47  ;;  %v2278_v61 = vsel %vm1872_vm4, %v2275_v26, %v2277_v1  ;;  %v5269_v42 = vld [vmem:[%s4331_s25 + $0x78] sm:$0xff] }
 0x220   : > { %v1987_v50 = vpop.f32.mrf.mxu1  ;;  %v5247_v3 = vpop.f32.mrf.mxu3 }
 0x221   : > { %v2853_v11 = vadd.f32 %v5200_v51, %v2460_v62  ;;  %v2076_v30 = vadd.f32 %v1987_v50, %v4789_v6  ;;  %v2632_v62 = vor.u32 %v2631_v20, %v2628_v33 }
 0x223   : > { %v3025_v10 = vpop.f32.mrf.mxu0  ;;  %v3113_v35 = vadd.f32 %v3023_v58, %v2853_v11  ;;  %v2633_v11 = vsel %vm2517_vm3, %v2623_v13, %v2632_v62  ;;  %v2635_v13 = vshrl.u32 %v5269_v42, 16 }
 0x225   : > { %v3153_v58 = vadd.f32 %v5257_v0, %v3113_v35 }
 0x226   : > { %v2372_v41 = vpop.f32.mrf.mxu2 }
 0x227   : > { %v2461_v24 = vadd.f32 %v2372_v41, %v2076_v30  ;;  %v3189_v53 = vmax.f32 %v3153_v58, 0.0  ;;  %v2638_v30 = vshll.u32 %v5269_v42, 16 }
 0x228   : > { %v1990_v51 = vpop.f32.mrf.mxu1  ;;  %v5263_v49 = vpop.f32.mrf.mxu3 }
 0x229   : > { %v2854_v6 = vadd.f32 %v5212_v19, %v2461_v24  ;;  %v2077_v19 = vadd.f32 %v1990_v51, %v4804_v28  ;;  %v4269_v51 = vld [vmem:[%s4331_s25 + $0x60] sm:$0xff] }
 0x22b   : > { %v3028_v50 = vpop.f32.mrf.mxu0  ;;  %v3114_v27 = vadd.f32 %v3025_v10, %v2854_v6  ;;  %2029 = vmatmul.bf16.gmra.mxu1 %v1893_v52  ;;  %2414 = vmatmul.bf16.gmra.mxu2 %v2278_v61  ;;  %v1894_v52 = vrot.slane %v4269_v51, 2  ;;  %v2279_v61 = vrot.slane %v5218_v25, 2  ;;  %v2637_v6 = vrot.slane %v2635_v13, 2 }
 0x22d   : > { %v3154_v26 = vadd.f32 %v5257_v0, %v3114_v27  ;;  %2817 = vmatmul.bf16.gmra.mxu3 %v2633_v11  ;;  %v2932_v27 = vrot.slane %v5218_v25, 3 }
 0x22e   : > { %3067 = vmatmul.bf16.gmra.mxu0 %v2931_v46  ;;  %v2375_v9 = vpop.f32.mrf.mxu2  ;;  %v2640_v46 = vrot.slane %v2638_v30, 3 }
 0x22f   : > { %v3190_v33 = vmax.f32 %v3154_v26, 0.0  ;;  %v2462_v20 = vadd.f32 %v2375_v9, %v2077_v19  ;;  %v2933_v13 = vsel %vm2910_vm5, %v2930_v45, %v2932_v27 }
 0x230   : > { %v1992_v10 = vpop.f32.mrf.mxu1  ;;  %v5280_v24 = vpop.f32.mrf.mxu3 }
 0x231   : > { %v4111_v41 = vpack.c.bf16 %v3190_v33, %v3189_v53  ;;  %v2855_v28 = vadd.f32 %v5224_v32, %v2462_v20  ;;  %v2078_v58 = vadd.f32 %v1992_v10, %v4818_v60  ;;  %v1895_v53 = vsel %vm1872_vm4, %v1892_v47, %v1894_v52  ;;  %v5297_v47 = vld [vmem:[%s4331_s25 + $0x80] sm:$0xff] }
 0x232   : > { %v2280_v33 = vsel %vm1872_vm4, %v2277_v1, %v2279_v61  ;;  %v2641_v32 = vor.u32 %v2640_v46, %v2637_v6  ;;  %v2647_v46 = vshll.u32 %v5297_v47, 16 }
 0x233   : > { %v3030_v35 = vpop.f32.mrf.mxu0  ;;  %4112 = vst [vmem:[%s5276_s22] sm:$0xff] %v4111_v41   ;;  %v3115_v26 = vadd.f32 %v3028_v50, %v2855_v28 }
 0x234   : > { %v2642_v50 = vsel %vm2517_vm3, %v2632_v62, %v2641_v32 }
 0x235   : > { %v3155_v60 = vadd.f32 %v5257_v0, %v3115_v26 }
 0x236   : > { %v2377_v11 = vpop.f32.mrf.mxu2 }
 0x237   : > { %v2463_v19 = vadd.f32 %v2377_v11, %v2078_v58  ;;  %v3191_v45 = vmax.f32 %v3155_v60, 0.0 }
 0x238   : > { %v1995_v9 = vpop.f32.mrf.mxu1  ;;  %v5292_v30 = vpop.f32.mrf.mxu3 }
 0x239   : > { %v2856_v20 = vadd.f32 %v5236_v17, %v2463_v19  ;;  %v2079_v17 = vadd.f32 %v1995_v9, %v4827_v14  ;;  %v4270_v19 = vld [vmem:[%s4331_s25 + $0x68] sm:$0xff]  ;;  %v2281_v14 = vrot.slane %v5242_v39, 2 }
 0x23b   : > { %v3033_v41 = vpop.f32.mrf.mxu0  ;;  %v3116_v25 = vadd.f32 %v3030_v35, %v2856_v20  ;;  %2034 = vmatmul.bf16.gmra.mxu1 %v1895_v53  ;;  %2419 = vmatmul.bf16.gmra.mxu2 %v2280_v33  ;;  %v2644_v35 = vshrl.u32 %v5297_v47, 16  ;;  %v1896_v53 = vrot.slane %v4270_v19, 2  ;;  %v2649_v33 = vrot.slane %v2647_v46, 3 }
 0x23d   : > { %v3156_v1 = vadd.f32 %v5257_v0, %v3116_v25  ;;  %2822 = vmatmul.bf16.gmra.mxu3 %v2642_v50  ;;  %v2646_v9 = vrot.slane %v2644_v35, 2 }
 0x23e   : > { %3072 = vmatmul.bf16.gmra.mxu0 %v2933_v13  ;;  %v2380_v10 = vpop.f32.mrf.mxu2  ;;  %v2934_v13 = vrot.slane %v5242_v39, 3 }
 0x23f   : > { %v3192_v28 = vmax.f32 %v3156_v1, 0.0  ;;  %v2464_v51 = vadd.f32 %v2380_v10, %v2079_v17  ;;  %v1897_v17 = vsel %vm1872_vm4, %v1894_v52, %v1896_v53  ;;  %v2282_v10 = vsel %vm1872_vm4, %v2279_v61, %v2281_v14  ;;  %v5320_v52 = vld [vmem:[%s4331_s25 + $0x88] sm:$0xff] }
 0x240   : > { %v1997_v6 = vpop.f32.mrf.mxu1  ;;  %v5303_v62 = vpop.f32.mrf.mxu3  ;;  %v2656_v19 = vshll.u32 %v5320_v52, 16 }
 0x241   : > { %v4116_v58 = vpack.c.bf16 %v3192_v28, %v3191_v45  ;;  %v2857_v26 = vadd.f32 %v5247_v3, %v2464_v51  ;;  %v2080_v20 = vadd.f32 %v1997_v6, %v4841_v4  ;;  %v2650_v3 = vor.u32 %v2649_v33, %v2646_v9 }
 0x242   : > { %v2935_v51 = vsel %vm2910_vm5, %v2932_v27, %v2934_v13 }
 0x243   : > { %v3035_v11 = vpop.f32.mrf.mxu0  ;;  %4201 = vst [vmem:[%s5276_s22 + $0x8] sm:$0xff] %v4116_v58   ;;  %v3117_v25 = vadd.f32 %v3033_v41, %v2857_v26  ;;  %v2651_v41 = vsel %vm2517_vm3, %v2641_v32, %v2650_v3 }
 0x245   : > { %v3157_v4 = vadd.f32 %v5257_v0, %v3117_v25 }
 0x246   : > { %v2382_v60 = vpop.f32.mrf.mxu2 }
 0x247   : > { %v2465_v50 = vadd.f32 %v2382_v60, %v2080_v20  ;;  %v3193_v27 = vmax.f32 %v3157_v4, 0.0  ;;  %v4271_v60 = vld [vmem:[%s4331_s25 + $0x70] sm:$0xff] }
 0x248   : > { %v2000_v1 = vpop.f32.mrf.mxu1  ;;  %v5315_v35 = vpop.f32.mrf.mxu3  ;;  %v1898_v25 = vrot.slane %v4271_v60, 2 }
 0x249   : > { %v2858_v45 = vadd.f32 %v5263_v49, %v2465_v50  ;;  %v2081_v49 = vadd.f32 %v2000_v1, %v4854_v56  ;;  %v2283_v56 = vrot.slane %v5269_v42, 2  ;;  %v2658_v1 = vrot.slane %v2656_v19, 3 }
 0x24b   : > { %v3038_v28 = vpop.f32.mrf.mxu0  ;;  %v3118_v39 = vadd.f32 %v3035_v11, %v2858_v45  ;;  %2039 = vmatmul.bf16.gmra.mxu1 %v1897_v17  ;;  %2424 = vmatmul.bf16.gmra.mxu2 %v2282_v10  ;;  %v2653_v11 = vshrl.u32 %v5320_v52, 16  ;;  %v2936_v10 = vrot.slane %v5269_v42, 3 }
 0x24d   : > { %v3158_v61 = vadd.f32 %v5257_v0, %v3118_v39  ;;  %2827 = vmatmul.bf16.gmra.mxu3 %v2651_v41  ;;  %v2655_v50 = vrot.slane %v2653_v11, 2  ;;  %v1899_v41 = vsel %vm1872_vm4, %v1896_v53, %v1898_v25  ;;  %v5343_v53 = vld [vmem:[%s4331_s25 + $0x90] sm:$0xff] }
 0x24e   : > { %3077 = vmatmul.bf16.gmra.mxu0 %v2935_v51  ;;  %v2385_v6 = vpop.f32.mrf.mxu2 }
 0x24f   : > { %v3194_v46 = vmax.f32 %v3158_v61, 0.0  ;;  %v2466_v58 = vadd.f32 %v2385_v6, %v2081_v49  ;;  %v2284_v61 = vsel %vm1872_vm4, %v2281_v14, %v2283_v56 }
 0x250   : > { %v2002_v26 = vpop.f32.mrf.mxu1  ;;  %v5326_v32 = vpop.f32.mrf.mxu3 }
 0x251   : > { %v4121_v9 = vpack.c.bf16 %v3194_v46, %v3193_v27  ;;  %v2859_v20 = vadd.f32 %v5280_v24, %v2466_v58  ;;  %v2082_v17 = vadd.f32 %v2002_v26, %v4871_v12  ;;  %v2659_v24 = vor.u32 %v2658_v1, %v2655_v50  ;;  %v4272_v1 = vld [vmem:[%s4331_s25 + $0x78] sm:$0xff] }
 0x252   : > { %v2937_v27 = vsel %vm2910_vm5, %v2934_v13, %v2936_v10 }
 0x253   : > { %v3040_v33 = vpop.f32.mrf.mxu0  ;;  %4202 = vst [vmem:[%s5276_s22 + $0x10] sm:$0xff] %v4121_v9   ;;  %v3119_v51 = vadd.f32 %v3038_v28, %v2859_v20  ;;  %v2660_v28 = vsel %vm2517_vm3, %v2650_v3, %v2659_v24  ;;  %v2662_v9 = vshrl.u32 %v5343_v53, 16 }
 0x255   : > { %v3159_v12 = vadd.f32 %v5257_v0, %v3119_v51 }
 0x256   : > { %v2387_v45 = vpop.f32.mrf.mxu2 }
 0x257   : > { %v2467_v4 = vadd.f32 %v2387_v45, %v2082_v17  ;;  %v3195_v13 = vmax.f32 %v3159_v12, 0.0  ;;  %v1900_v17 = vrot.slane %v4272_v1, 2  ;;  %v2664_v45 = vrot.slane %v2662_v9, 2 }
 0x258   : > { %v2005_v39 = vpop.f32.mrf.mxu1  ;;  %v5338_v46 = vpop.f32.mrf.mxu3 }
 0x259   : > { %v2860_v49 = vadd.f32 %v5292_v30, %v2467_v4  ;;  %v2083_v30 = vadd.f32 %v2005_v39, %v4883_v55  ;;  %v2285_v55 = vrot.slane %v5297_v47, 2  ;;  %v2938_v39 = vrot.slane %v5297_v47, 3 }
 0x25a   : > { %v1901_v12 = vsel %vm1872_vm4, %v1898_v25, %v1900_v17  ;;  %v5366_v25 = vld [vmem:[%s4331_s25 + $0x98] sm:$0xff] }
 0x25b   : > { %v3043_v6 = vpop.f32.mrf.mxu0  ;;  %v3120_v42 = vadd.f32 %v3040_v33, %v2860_v49  ;;  %2044 = vmatmul.bf16.gmra.mxu1 %v1899_v41  ;;  %2429 = vmatmul.bf16.gmra.mxu2 %v2284_v61  ;;  %v2665_v33 = vshll.u32 %v5343_v53, 16 }
 0x25d   : > { %v3160_v14 = vadd.f32 %v5257_v0, %v3120_v42  ;;  %2832 = vmatmul.bf16.gmra.mxu3 %v2660_v28  ;;  %v2667_v51 = vrot.slane %v2665_v33, 3  ;;  %v2286_v42 = vsel %vm1872_vm4, %v2283_v56, %v2285_v55  ;;  %v2671_v33 = vshrl.u32 %v5366_v25, 16 }
 0x25e   : > { %3082 = vmatmul.bf16.gmra.mxu0 %v2937_v27  ;;  %v2390_v58 = vpop.f32.mrf.mxu2 }
 0x25f   : > { %v3196_v26 = vmax.f32 %v3160_v14, 0.0  ;;  %v2468_v11 = vadd.f32 %v2390_v58, %v2083_v30  ;;  %v2939_v30 = vsel %vm2910_vm5, %v2936_v10, %v2938_v39 }
 0x260   : > { %v2007_v19 = vpop.f32.mrf.mxu1  ;;  %v5349_v3 = vpop.f32.mrf.mxu3 }
 0x261   : > { %v4126_v20 = vpack.c.bf16 %v3196_v26, %v3195_v13  ;;  %v2861_v50 = vadd.f32 %v5303_v62, %v2468_v11  ;;  %v2084_v4 = vadd.f32 %v2007_v19, %v4897_v34  ;;  %v2668_v62 = vor.u32 %v2667_v51, %v2664_v45  ;;  %v4273_v45 = vld [vmem:[%s4331_s25 + $0x80] sm:$0xff] }
 0x262   : > { %v1902_v51 = vrot.slane %v4273_v45, 2 }
 0x263   : > { %v3045_v60 = vpop.f32.mrf.mxu0  ;;  %4203 = vst [vmem:[%s5276_s22 + $0x18] sm:$0xff] %v4126_v20   ;;  %v3121_v61 = vadd.f32 %v3043_v6, %v2861_v50  ;;  %v2669_v6 = vsel %vm2517_vm3, %v2659_v24, %v2668_v62  ;;  %v2674_v20 = vshll.u32 %v5366_v25, 16 }
 0x265   : > { %v3161_v34 = vadd.f32 %v5257_v0, %v3121_v61  ;;  %v2676_v61 = vrot.slane %v2674_v20, 3 }
 0x266   : > { %v2392_v41 = vpop.f32.mrf.mxu2 }
 0x267   : > { %v2469_v49 = vadd.f32 %v2392_v41, %v2084_v4  ;;  %v3197_v10 = vmax.f32 %v3161_v34, 0.0  ;;  %v2287_v4 = vrot.slane %v5320_v52, 2  ;;  %v2673_v41 = vrot.slane %v2671_v33, 2 }
 0x268   : > { %v2010_v27 = vpop.f32.mrf.mxu1  ;;  %v5361_v58 = vpop.f32.mrf.mxu3 }
 0x269   : > { %v2862_v28 = vadd.f32 %v5315_v35, %v2469_v49  ;;  %v5518_v35 = vld [vmem:[#allocation9_spill] sm:$0xff]  ;;  %v5519_v49 = vld [vmem:[#allocation10_spill] sm:$0xff] }
 0x26a   : > { %v2085_v13 = vadd.f32 %v2010_v27, %v5518_v35 }
 0x26b   : > { %v3048_v14 = vpop.f32.mrf.mxu0  ;;  %v3122_v47 = vadd.f32 %v3045_v60, %v2862_v28  ;;  %2049 = vmatmul.bf16.gmra.mxu1 %v1901_v12  ;;  %2434 = vmatmul.bf16.gmra.mxu2 %v2286_v42  ;;  %v2940_v12 = vrot.slane %v5320_v52, 3 }
 0x26d   : > { %v3162_v56 = vadd.f32 %v5257_v0, %v3122_v47  ;;  %2837 = vmatmul.bf16.gmra.mxu3 %v2669_v6  ;;  %v1903_v47 = vsel %vm1872_vm4, %v1900_v17, %v1902_v51  ;;  %v2288_v6 = vsel %vm1872_vm4, %v2285_v55, %v2287_v4 }
 0x26e   : > { %3087 = vmatmul.bf16.gmra.mxu0 %v2939_v30  ;;  %v2395_v26 = vpop.f32.mrf.mxu2 }
 0x26f   : > { %v3198_v11 = vmax.f32 %v3162_v56, 0.0  ;;  %v2470_v19 = vadd.f32 %v2395_v26, %v2085_v13  ;;  %v2941_v13 = vsel %vm2910_vm5, %v2938_v39, %v2940_v12  ;;  %v2496_v26 = vld [vmem:[%s4331_s25 + $0xa0] sm:$0x7] }
 0x270   : > { %v2012_v9 = vpop.f32.mrf.mxu1  ;;  %v5372_v24 = vpop.f32.mrf.mxu3 }
 0x271   : > { %v4131_v60 = vpack.c.bf16 %v3198_v11, %v3197_v10  ;;  %v2863_v1 = vadd.f32 %v5326_v32, %v2470_v19  ;;  %v2086_v27 = vadd.f32 %v2012_v9, %v5519_v49  ;;  %v2677_v32 = vor.u32 %v2676_v61, %v2673_v41 }
 0x272   : > { %v2515_v11 = vunpack.c.l.b16 %v2496_v26 }
 0x273   : > { %v3050_v50 = vpop.f32.mrf.mxu0  ;;  %4204 = vst [vmem:[%s5276_s22 + $0x20] sm:$0xff] %v4131_v60   ;;  %v3123_v28 = vadd.f32 %v3048_v14, %v2863_v1  ;;  %v2678_v17 = vsel %vm2517_vm3, %v2668_v62, %v2677_v32  ;;  %v5520_v14 = vld [vmem:[#allocation11_spill] sm:$0xff] }
 0x274   : > { %v5389_v55 = vpack.c.b16 %v2515_v11, %v2515_v11 }
 0x275   : > { %v3163_v52 = vadd.f32 %v5257_v0, %v3123_v28  ;;  %v2289_v28 = vrot.slane %v5343_v53, 2 }
 0x276   : > { %v2397_v42 = vpop.f32.mrf.mxu2  ;;  %v2683_v45 = vshll.u32 %v5389_v55, 16 }
 0x277   : > { %v2471_v30 = vadd.f32 %v2397_v42, %v2086_v27  ;;  %v3199_v33 = vmax.f32 %v3163_v52, 0.0  ;;  %v4274_v27 = vld [vmem:[%s4331_s25 + $0x88] sm:$0xff] }
 0x278   : > { %v2015_v34 = vpop.f32.mrf.mxu1  ;;  %v5385_v10 = vpop.f32.mrf.mxu3  ;;  %v1904_v42 = vrot.slane %v4274_v27, 2  ;;  %v2291_v27 = vrot.slane %v5366_v25, 2 }
 0x279   : > { %v2864_v56 = vadd.f32 %v5338_v46, %v2471_v30  ;;  %v2087_v39 = vadd.f32 %v2015_v34, %v5520_v14  ;;  %v2685_v34 = vrot.slane %v2683_v45, 3 }
 0x27b   : > { %v3053_v35 = vpop.f32.mrf.mxu0  ;;  %v3124_v19 = vadd.f32 %v3050_v50, %v2864_v56  ;;  %2054 = vmatmul.bf16.gmra.mxu1 %v1903_v47  ;;  %2439 = vmatmul.bf16.gmra.mxu2 %v2288_v6  ;;  %v2680_v50 = vshrl.u32 %v5389_v55, 16  ;;  %v5521_v47 = vld [vmem:[#allocation12_spill] sm:$0xff]  ;;  %v2942_v56 = vrot.slane %v5343_v53, 3 }
 0x27d   : > { %v3164_v46 = vadd.f32 %v5257_v0, %v3124_v19  ;;  %2842 = vmatmul.bf16.gmra.mxu3 %v2678_v17  ;;  %v2682_v30 = vrot.slane %v2680_v50, 2  ;;  %v1905_v19 = vsel %vm1872_vm4, %v1902_v51, %v1904_v42  ;;  %v2290_v17 = vsel %vm1872_vm4, %v2287_v4, %v2289_v28 }
 0x27e   : > { %3092 = vmatmul.bf16.gmra.mxu0 %v2941_v13  ;;  %v2400_v9 = vpop.f32.mrf.mxu2 }
 0x27f   : > { %v3200_v20 = vmax.f32 %v3164_v46, 0.0  ;;  %v2472_v60 = vadd.f32 %v2400_v9, %v2087_v39  ;;  %v2686_v46 = vor.u32 %v2685_v34, %v2682_v30  ;;  %v2943_v39 = vsel %vm2910_vm5, %v2940_v12, %v2942_v56 }
 0x280   : > { %v2017_v1 = vpop.f32.mrf.mxu1  ;;  %v5395_v62 = vpop.f32.mrf.mxu3  ;;  %v2944_v30 = vrot.slane %v5366_v25, 3 }
 0x281   : > { %v4136_v41 = vpack.c.bf16 %v3200_v20, %v3199_v33  ;;  %v2865_v49 = vadd.f32 %v5349_v3, %v2472_v60  ;;  %v2088_v6 = vadd.f32 %v2017_v1, %v5521_v47  ;;  %v2687_v53 = vsel %vm2517_vm3, %v2677_v32, %v2686_v46 }
 0x283   : > { %v3055_v61 = vpop.f32.mrf.mxu0  ;;  %4205 = vst [vmem:[%s5276_s22 + $0x28] sm:$0xff] %v4136_v41   ;;  %v3125_v26 = vadd.f32 %v3053_v35, %v2865_v49  ;;  %v4275_v49 = vld [vmem:[%s4331_s25 + $0x90] sm:$0xff] }
 0x284   : > { %v1906_v32 = vrot.slane %v4275_v49, 2 }
 0x285   : > { %v3165_v33 = vadd.f32 %v5257_v0, %v3125_v26 }
 0x286   : > { %v2402_v13 = vpop.f32.mrf.mxu2  ;;  %v1907_v26 = vsel %vm1872_vm4, %v1904_v42, %v1906_v32 }
 0x287   : > { %v2473_v11 = vadd.f32 %v2402_v13, %v2088_v6  ;;  %v3201_v35 = vmax.f32 %v3165_v33, 0.0 }
 0x288   : > { %v2020_v52 = vpop.f32.mrf.mxu1  ;;  %v5407_v9 = vpop.f32.mrf.mxu3 }
 0x289   : > { %v2866_v3 = vadd.f32 %v5361_v58, %v2473_v11  ;;  %v2089_v4 = vadd.f32 %v2020_v52, %v4981_v5  ;;  %v2292_v11 = vsel %vm1872_vm4, %v2289_v28, %v2291_v27 }
 0x28b   : > { %v3058_v14 = vpop.f32.mrf.mxu0  ;;  %v3126_v20 = vadd.f32 %v3055_v61, %v2866_v3  ;;  %2059 = vmatmul.bf16.gmra.mxu1 %v1905_v19  ;;  %2444 = vmatmul.bf16.gmra.mxu2 %v2290_v17  ;;  %v2147_v17 = vld [vmem:[%s4331_s25 + $0xa0] sm:$0x3] }
 0x28c   : > { %v2238_v25 = vunpack.c.l.b16 %v2147_v17 }
 0x28d   : > { %v3166_v51 = vadd.f32 %v5257_v0, %v3126_v20  ;;  %2847 = vmatmul.bf16.gmra.mxu3 %v2687_v53 }
 0x28e   : > { %3097 = vmatmul.bf16.gmra.mxu0 %v2943_v39  ;;  %v2405_v58 = vpop.f32.mrf.mxu2 }
 0x28f   : > { %v3202_v60 = vmax.f32 %v3166_v51, 0.0  ;;  %v2474_v12 = vadd.f32 %v2405_v58, %v2089_v4 }
 0x290   : > { %v2022_v1 = vpop.f32.mrf.mxu1  ;;  %v5413_v41 = vpop.f32.mrf.mxu3 }
 0x291   : > { %v4141_v50 = vpack.c.bf16 %v3202_v60, %v3201_v35  ;;  %v2867_v61 = vadd.f32 %v5372_v24, %v2474_v12  ;;  %v2090_v5 = vadd.f32 %v2022_v1, %v4992_v23  ;;  %v2945_v24 = vsel %vm2910_vm5, %v2942_v56, %v2944_v30 }
 0x292   : > { %v2257_v56 = vpack.c.b16 %v2238_v25, %v2238_v25  ;;  %v1908_v35 = vrot.slane %v4987_v7, 2  ;;  %v2946_v1 = vrot.slane %v5389_v55, 3 }
 0x293   : > { %v3060_v45 = vpop.f32.mrf.mxu0  ;;  %4206 = vst [vmem:[%s5276_s22 + $0x30] sm:$0xff] %v4141_v50   ;;  %v3127_v47 = vadd.f32 %v3058_v14, %v2867_v61 }
 0x294   : > { %v2293_v60 = vrot.slane %v2257_v56, 2  ;;  %v1909_v49 = vsel %vm1872_vm4, %v1906_v32, %v1908_v35 }
 0x295   : > { %v3167_v3 = vadd.f32 %v5257_v0, %v3127_v47 }
 0x296   : > { %v2407_v34 = vpop.f32.mrf.mxu2 }
 0x297   : > { %v2475_v6 = vadd.f32 %v2407_v34, %v2090_v5  ;;  %v3203_v39 = vmax.f32 %v3167_v3, 0.0  ;;  %v2294_v5 = vsel %vm1872_vm4, %v2291_v27, %v2293_v60 }
 0x298   : > { %v2025_v13 = vpop.f32.mrf.mxu1  ;;  %v2810_v46 = vpop.f32.mrf.mxu3 }
 0x299   : > { %v2868_v52 = vadd.f32 %v5385_v10, %v2475_v6  ;;  %v2091_v42 = vadd.f32 %v2025_v13, %v5006_v38 }
 0x29b   : > { %v3063_v19 = vpop.f32.mrf.mxu0  ;;  %v3128_v23 = vadd.f32 %v3060_v45, %v2868_v52  ;;  %2064 = vmatmul.bf16.gmra.mxu1 %v1907_v26  ;;  %2449 = vmatmul.bf16.gmra.mxu2 %v2292_v11 }
 0x29d   : > { %v3168_v14 = vadd.f32 %v5257_v0, %v3128_v23 }
 0x29e   : > { %3102 = vmatmul.bf16.gmra.mxu0 %v2945_v24  ;;  %v2410_v28 = vpop.f32.mrf.mxu2 }
 0x29f   : > { %v3204_v10 = vmax.f32 %v3168_v14, 0.0  ;;  %v2476_v33 = vadd.f32 %v2410_v28, %v2091_v42 }
 0x2a0   : > { %v2027_v20 = vpop.f32.mrf.mxu1  ;;  %v2813_v4 = vpop.f32.mrf.mxu3 }
 0x2a1   : > { %v4146_v53 = vpack.c.bf16 %v3204_v10, %v3203_v39  ;;  %v2869_v58 = vadd.f32 %v5395_v62, %v2476_v33  ;;  %v2092_v12 = vadd.f32 %v2027_v20, %v5017_v31  ;;  %v2947_v62 = vsel %vm2910_vm5, %v2944_v30, %v2946_v1 }
 0x2a3   : > { %v3065_v51 = vpop.f32.mrf.mxu0  ;;  %4207 = vst [vmem:[%s5276_s22 + $0x38] sm:$0xff] %v4146_v53   ;;  %v3129_v50 = vadd.f32 %v3063_v19, %v2869_v58 }
 0x2a5   : > { %v3169_v7 = vadd.f32 %v5257_v0, %v3129_v50 }
 0x2a6   : > { %v2412_v38 = vpop.f32.mrf.mxu2 }
 0x2a7   : > { %v2477_v45 = vadd.f32 %v2412_v38, %v2092_v12  ;;  %v3205_v26 = vmax.f32 %v3169_v7, 0.0 }
 0x2a8   : > { %v2030_v61 = vpop.f32.mrf.mxu1  ;;  %v2815_v31 = vpop.f32.mrf.mxu3 }
 0x2a9   : > { %v2870_v34 = vadd.f32 %v5407_v9, %v2477_v45  ;;  %v2093_v13 = vadd.f32 %v2030_v61, %v5034_v48 }
 0x2ab   : > { %v3068_v47 = vpop.f32.mrf.mxu0  ;;  %v3130_v6 = vadd.f32 %v3065_v51, %v2870_v34  ;;  %2069 = vmatmul.bf16.gmra.mxu1 %v1909_v49  ;;  %2454 = vmatmul.bf16.gmra.mxu2 %v2294_v5 }
 0x2ad   : > { %v3170_v55 = vadd.f32 %v5257_v0, %v3130_v6 }
 0x2ae   : > { %3107 = vmatmul.bf16.gmra.mxu0 %v2947_v62  ;;  %v2415_v32 = vpop.f32.mrf.mxu2 }
 0x2af   : > { %v3206_v27 = vmax.f32 %v3170_v55, 0.0  ;;  %v2478_v11 = vadd.f32 %v2415_v32, %v2093_v13 }
 0x2b0   : > { %v2032_v9 = vpop.f32.mrf.mxu1  ;;  %v2818_v3 = vpop.f32.mrf.mxu3 }
 0x2b1   : > { %v4151_v52 = vpack.c.bf16 %v3206_v27, %v3205_v26  ;;  %v2871_v30 = vadd.f32 %v5413_v41, %v2478_v11  ;;  %v2094_v24 = vadd.f32 %v2032_v9, %v5046_v8 }
 0x2b3   : > { %v3070_v19 = vpop.f32.mrf.mxu0  ;;  %4208 = vst [vmem:[%s5276_s22 + $0x40] sm:$0xff] %v4151_v52   ;;  %v3131_v23 = vadd.f32 %v3068_v47, %v2871_v30 }
 0x2b5   : > { %v3171_v28 = vadd.f32 %v5257_v0, %v3131_v23 }
 0x2b6   : > { %v2417_v17 = vpop.f32.mrf.mxu2 }
 0x2b7   : > { %v2479_v25 = vadd.f32 %v2417_v17, %v2094_v24  ;;  %v3207_v56 = vmax.f32 %v3171_v28, 0.0 }
 0x2b8   : > { %v2035_v14 = vpop.f32.mrf.mxu1  ;;  %v2820_v51 = vpop.f32.mrf.mxu3 }
 0x2b9   : > { %v2872_v42 = vadd.f32 %v2810_v46, %v2479_v25  ;;  %v2095_v33 = vadd.f32 %v2035_v14, %v5058_v44 }
 0x2bb   : > { %v3073_v48 = vpop.f32.mrf.mxu0  ;;  %v3132_v39 = vadd.f32 %v3070_v19, %v2872_v42 }
 0x2bd   : > { %v3172_v10 = vadd.f32 %v5257_v0, %v3132_v39 }
 0x2be   : > { %v2420_v20 = vpop.f32.mrf.mxu2 }
 0x2bf   : > { %v3208_v41 = vmax.f32 %v3172_v10, 0.0  ;;  %v2480_v53 = vadd.f32 %v2420_v20, %v2095_v33 }
 0x2c0   : > { %v2037_v8 = vpop.f32.mrf.mxu1  ;;  %v2823_v44 = vpop.f32.mrf.mxu3 }
 0x2c1   : > { %v4156_v58 = vpack.c.bf16 %v3208_v41, %v3207_v56  ;;  %v2873_v60 = vadd.f32 %v2813_v4, %v2480_v53  ;;  %v2096_v46 = vadd.f32 %v2037_v8, %v5070_v43 }
 0x2c3   : > { %v3075_v35 = vpop.f32.mrf.mxu0  ;;  %4209 = vst [vmem:[%s5276_s22 + $0x48] sm:$0xff] %v4156_v58   ;;  %v3133_v1 = vadd.f32 %v3073_v48, %v2873_v60 }
 0x2c5   : > { %v3173_v49 = vadd.f32 %v5257_v0, %v3133_v1 }
 0x2c6   : > { %v2422_v12 = vpop.f32.mrf.mxu2 }
 0x2c7   : > { %v2481_v38 = vadd.f32 %v2422_v12, %v2096_v46  ;;  %v3209_v7 = vmax.f32 %v3173_v49, 0.0 }
 0x2c8   : > { %v2040_v50 = vpop.f32.mrf.mxu1  ;;  %v2825_v26 = vpop.f32.mrf.mxu3 }
 0x2c9   : > { %v2874_v45 = vadd.f32 %v2815_v31, %v2481_v38  ;;  %v2097_v47 = vadd.f32 %v2040_v50, %v5082_v16 }
 0x2cb   : > { %v3078_v61 = vpop.f32.mrf.mxu0  ;;  %v3134_v5 = vadd.f32 %v3075_v35, %v2874_v45 }
 0x2cd   : > { %v3174_v34 = vadd.f32 %v5257_v0, %v3134_v5 }
 0x2ce   : > { %v2425_v62 = vpop.f32.mrf.mxu2 }
 0x2cf   : > { %v3210_v4 = vmax.f32 %v3174_v34, 0.0  ;;  %v2482_v6 = vadd.f32 %v2425_v62, %v2097_v47 }
 0x2d0   : > { %v2042_v43 = vpop.f32.mrf.mxu1  ;;  %v2828_v14 = vpop.f32.mrf.mxu3 }
 0x2d1   : > { %v4161_v55 = vpack.c.bf16 %v3210_v4, %v3209_v7  ;;  %v2875_v32 = vadd.f32 %v2818_v3, %v2482_v6  ;;  %v2098_v31 = vadd.f32 %v2042_v43, %v5094_v2 }
 0x2d3   : > { %v3080_v13 = vpop.f32.mrf.mxu0  ;;  %4210 = vst [vmem:[%s5276_s22 + $0x50] sm:$0xff] %v4161_v55   ;;  %v3135_v11 = vadd.f32 %v3078_v61, %v2875_v32 }
 0x2d5   : > { %v3175_v16 = vadd.f32 %v5257_v0, %v3135_v11 }
 0x2d6   : > { %v2427_v27 = vpop.f32.mrf.mxu2 }
 0x2d7   : > { %v2483_v9 = vadd.f32 %v2427_v27, %v2098_v31  ;;  %v3211_v3 = vmax.f32 %v3175_v16, 0.0 }
 0x2d8   : > { %v2045_v52 = vpop.f32.mrf.mxu1  ;;  %v2830_v8 = vpop.f32.mrf.mxu3 }
 0x2d9   : > { %v2876_v19 = vadd.f32 %v2820_v51, %v2483_v9  ;;  %v2099_v23 = vadd.f32 %v2045_v52, %v5106_v22 }
 0x2db   : > { %v3083_v30 = vpop.f32.mrf.mxu0  ;;  %v3136_v24 = vadd.f32 %v3080_v13, %v2876_v19 }
 0x2dd   : > { %v3176_v17 = vadd.f32 %v5257_v0, %v3136_v24 }
 0x2de   : > { %v2430_v25 = vpop.f32.mrf.mxu2 }
 0x2df   : > { %v3212_v42 = vmax.f32 %v3176_v17, 0.0  ;;  %v2484_v48 = vadd.f32 %v2430_v25, %v2099_v23 }
 0x2e0   : > { %v2047_v2 = vpop.f32.mrf.mxu1 }
 0x2e1   : > { %v4166_v28 = vpack.c.bf16 %v3212_v42, %v3211_v3  ;;  %v2877_v10 = vadd.f32 %v2823_v44, %v2484_v48  ;;  %v2100_v33 = vadd.f32 %v2047_v2, %v5118_v36  ;;  %v2833_v44 = vpop.f32.mrf.mxu3 }
 0x2e3   : > { %v3085_v39 = vpop.f32.mrf.mxu0  ;;  %4211 = vst [vmem:[%s5276_s22 + $0x58] sm:$0xff] %v4166_v28   ;;  %v3137_v56 = vadd.f32 %v3083_v30, %v2877_v10 }
 0x2e5   : > { %v3177_v58 = vadd.f32 %v5257_v0, %v3137_v56 }
 0x2e6   : > { %v2432_v20 = vpop.f32.mrf.mxu2 }
 0x2e7   : > { %v2485_v41 = vadd.f32 %v2432_v20, %v2100_v33  ;;  %v3213_v1 = vmax.f32 %v3177_v58, 0.0 }
 0x2e8   : > { %v2050_v53 = vpop.f32.mrf.mxu1 }
 0x2e9   : > { %v2878_v51 = vadd.f32 %v2825_v26, %v2485_v41  ;;  %v2101_v46 = vadd.f32 %v2050_v53, %v5130_v21  ;;  %v2835_v55 = vpop.f32.mrf.mxu3 }
 0x2eb   : > { %v3088_v22 = vpop.f32.mrf.mxu0  ;;  %v3138_v35 = vadd.f32 %v3085_v39, %v2878_v51 }
 0x2ed   : > { %v3178_v60 = vadd.f32 %v5257_v0, %v3138_v35 }
 0x2ee   : > { %v2435_v12 = vpop.f32.mrf.mxu2 }
 0x2ef   : > { %v3214_v38 = vmax.f32 %v3178_v60, 0.0  ;;  %v2486_v50 = vadd.f32 %v2435_v12, %v2101_v46 }
 0x2f0   : > { %v2052_v36 = vpop.f32.mrf.mxu1 }
 0x2f1   : > { %v4171_v45 = vpack.c.bf16 %v3214_v38, %v3213_v1  ;;  %v2879_v49 = vadd.f32 %v2828_v14, %v2486_v50  ;;  %v2102_v5 = vadd.f32 %v2052_v36, %v5142_v15  ;;  %v2838_v24 = vpop.f32.mrf.mxu3 }
 0x2f3   : > { %v3090_v61 = vpop.f32.mrf.mxu0  ;;  %4212 = vst [vmem:[%s5276_s22 + $0x60] sm:$0xff] %v4171_v45   ;;  %v3139_v47 = vadd.f32 %v3088_v22, %v2879_v49 }
 0x2f5   : > { %v3179_v21 = vadd.f32 %v5257_v0, %v3139_v47 }
 0x2f6   : > { %v2437_v34 = vpop.f32.mrf.mxu2 }
 0x2f7   : > { %v2487_v62 = vadd.f32 %v2437_v34, %v2102_v5  ;;  %v3215_v31 = vmax.f32 %v3179_v21, 0.0 }
 0x2f8   : > { %v2055_v7 = vpop.f32.mrf.mxu1 }
 0x2f9   : > { %v2880_v4 = vadd.f32 %v2830_v8, %v2487_v62  ;;  %v2103_v32 = vadd.f32 %v2055_v7, %v5154_v29  ;;  %v2840_v20 = vpop.f32.mrf.mxu3 }
 0x2fb   : > { %v3093_v6 = vpop.f32.mrf.mxu0  ;;  %v3140_v43 = vadd.f32 %v3090_v61, %v2880_v4 }
 0x2fd   : > { %v3180_v13 = vadd.f32 %v5257_v0, %v3140_v43 }
 0x2fe   : > { %v2440_v26 = vpop.f32.mrf.mxu2 }
 0x2ff   : > { %v3216_v27 = vmax.f32 %v3180_v13, 0.0  ;;  %v2488_v11 = vadd.f32 %v2440_v26, %v2103_v32 }
 0x300   : > { %v2057_v15 = vpop.f32.mrf.mxu1 }
 0x301   : > { %v4176_v9 = vpack.c.bf16 %v3216_v27, %v3215_v31  ;;  %v2881_v19 = vadd.f32 %v2833_v44, %v2488_v11  ;;  %v2104_v30 = vadd.f32 %v2057_v15, %v5166_v37  ;;  %v2843_v46 = vpop.f32.mrf.mxu3 }
 0x303   : > { %v3095_v52 = vpop.f32.mrf.mxu0  ;;  %4213 = vst [vmem:[%s5276_s22 + $0x68] sm:$0xff] %v4176_v9   ;;  %v3141_v17 = vadd.f32 %v3093_v6, %v2881_v19 }
 0x305   : > { %v3181_v29 = vadd.f32 %v5257_v0, %v3141_v17 }
 0x306   : > { %v2442_v16 = vpop.f32.mrf.mxu2 }
 0x307   : > { %v2489_v23 = vadd.f32 %v2442_v16, %v2104_v30  ;;  %v3217_v39 = vmax.f32 %v3181_v29, 0.0  ;;  %v4276_v29 = vld [vmem:[%s5494_s2] ss:$0 sm:$0xff] }
 0x308   : > { %v2060_v25 = vpop.f32.mrf.mxu1 }
 0x309   : > { %v2882_v14 = vadd.f32 %v2835_v55, %v2489_v23  ;;  %v2105_v2 = vadd.f32 %v2060_v25, %v5178_v63  ;;  %v2845_v34 = vpop.f32.mrf.mxu3 }
 0x30b   : > { %v3098_v3 = vpop.f32.mrf.mxu0  ;;  %v3142_v42 = vadd.f32 %v3095_v52, %v2882_v14 }
 0x30d   : > { %v3182_v48 = vadd.f32 %v5257_v0, %v3142_v42 }
 0x30e   : > { %v2445_v28 = vpop.f32.mrf.mxu2 }
 0x30f   : > { %v3218_v10 = vmax.f32 %v3182_v48, 0.0  ;;  %v2490_v33 = vadd.f32 %v2445_v28, %v2105_v2 }
 0x310   : > { %v2062_v37 = vpop.f32.mrf.mxu1 }
 0x311   : > { %v4181_v56 = vpack.c.bf16 %v3218_v10, %v3217_v39  ;;  %v2883_v53 = vadd.f32 %v2838_v24, %v2490_v33  ;;  %v2106_v8 = vadd.f32 %v2062_v37, %v5190_v57  ;;  %v2848_v26 = vpop.f32.mrf.mxu3 }
 0x313   : > { %v3100_v41 = vpop.f32.mrf.mxu0  ;;  %4214 = vst [vmem:[%s5276_s22 + $0x70] sm:$0xff] %v4181_v56   ;;  %v3143_v22 = vadd.f32 %v3098_v3, %v2883_v53 }
 0x315   : > { %v3183_v63 = vadd.f32 %v5257_v0, %v3143_v22 }
 0x316   : > { %v2447_v51 = vpop.f32.mrf.mxu2 }
 0x317   : > { %v2491_v58 = vadd.f32 %v2447_v51, %v2106_v8  ;;  %v3219_v45 = vmax.f32 %v3183_v63, 0.0 }
 0x318   : > { %v2065_v35 = vpop.f32.mrf.mxu1 }
 0x319   : > { %v2884_v60 = vadd.f32 %v2840_v20, %v2491_v58  ;;  %v2107_v50 = vadd.f32 %v2065_v35, %v5202_v40  ;;  %v2850_v23 = vpop.f32.mrf.mxu3 }
 0x31b   : > { %v3144_v12 = vadd.f32 %v3100_v41, %v2884_v60  ;;  %v3103_v1 = vpop.f32.mrf.mxu0 }
 0x31d   : > { %v3184_v38 = vadd.f32 %v5257_v0, %v3144_v12 }
 0x31e   : > { %v2450_v36 = vpop.f32.mrf.mxu2 }
 0x31f   : > { %v3220_v61 = vmax.f32 %v3184_v38, 0.0  ;;  %v2492_v44 = vadd.f32 %v2450_v36, %v2107_v50 }
 0x320   : > { %v2067_v57 = vpop.f32.mrf.mxu1 }
 0x321   : > { %v4186_v49 = vpack.c.bf16 %v3220_v61, %v3219_v45  ;;  %v2885_v5 = vadd.f32 %v2843_v46, %v2492_v44  ;;  %v2108_v47 = vadd.f32 %v2067_v57, %v5214_v18 }
 0x323   : > { %4215 = vst [vmem:[%s5276_s22 + $0x78] sm:$0xff] %v4186_v49   ;;  %v3105_v62 = vpop.f32.mrf.mxu0  ;;  %v3145_v4 = vadd.f32 %v3103_v1, %v2885_v5 }
 0x325   : > { %v3185_v40 = vadd.f32 %v5257_v0, %v3145_v4 }
 0x326   : > { %v2452_v7 = vpop.f32.mrf.mxu2 }
 0x327   : > { %v2493_v6 = vadd.f32 %v2452_v7, %v2108_v47  ;;  %v3221_v27 = vmax.f32 %v3185_v40, 0.0 }
 0x328   : > { %v2070_v21 = vpop.f32.mrf.mxu1 }
 0x329   : > { %v2886_v43 = vadd.f32 %v2845_v34, %v2493_v6  ;;  %v2109_v32 = vadd.f32 %v2070_v21, %v5226_v54 }
 0x32b   : > { %v3146_v55 = vadd.f32 %v3105_v62, %v2886_v43  ;;  %v3108_v18 = vpop.f32.mrf.mxu0 }
 0x32d   : > { %v3186_v13 = vadd.f32 %v5257_v0, %v3146_v55 }
 0x32e   : > { %v2455_v31 = vpop.f32.mrf.mxu2 }
 0x32f   : > { %v3222_v11 = vmax.f32 %v3186_v13, 0.0  ;;  %v2494_v15 = vadd.f32 %v2455_v31, %v2109_v32 }
 0x330   : > { %v2072_v52 = vpop.f32.mrf.mxu1 }
 0x331   : > { %v4191_v9 = vpack.c.bf16 %v3222_v11, %v3221_v27  ;;  %v2887_v19 = vadd.f32 %v2848_v26, %v2494_v15  ;;  %v2110_v30 = vadd.f32 %v2072_v52, %v5238_v59 }
 0x333   : > { %4216 = vst [vmem:[%s5276_s22 + $0x80] sm:$0xff] %v4191_v9   ;;  %v3147_v24 = vadd.f32 %v3108_v18, %v2887_v19  ;;  %v3110_v14 = vpop.f32.mrf.mxu0 }
 0x335   : > { %v3187_v54 = vadd.f32 %v5257_v0, %v3147_v24 }
 0x336   : > { %v2457_v16 = vpop.f32.mrf.mxu2 }
 0x337   : > { %v2495_v17 = vadd.f32 %v2457_v16, %v2110_v30  ;;  %v3223_v48 = vmax.f32 %v3187_v54, 0.0 }
 0x339   : > { %v2888_v25 = vadd.f32 %v2850_v23, %v2495_v17 }
 0x33b   : > { %v3148_v3 = vadd.f32 %v3110_v14, %v2888_v25 }
 0x33d   : > { %v3188_v42 = vadd.f32 %v4276_v29, %v3148_v3 }
 0x33f   : > { %v3224_v2 = vmax.f32 %v3188_v42, 0.0 }
 0x341   : > { %v4196_v28 = vpack.c.bf16 %v3224_v2, %v3223_v48 }
 0x343   : > { %4217 = vst [vmem:[%s5276_s22 + $0x88] sm:$0xff] %v4196_v28  }
 0x344 PF: > { %s13_s12 = sadd.s32 1, %s4283_s12  }
 0x345   : > { %p10_p4 = scmp.ge.s32.totalorder %s13_s12, 4  }
 0x347   :  { %12 = sbr.rel (!%p10_p4) target bundleno = 1 (0x1), region = 70 }

</bundles_post_ra>
